<compile_context>
chip_gen: v7x
topology: tpu7x:2x2x1
jax: 0.10.0
libtpu: 0.0.40
codegen_flags: <defaults>
</compile_context>

<pallas_src>
import math

import jax
import jax.numpy as jnp
from jax.experimental import pallas as pl
from jax.experimental.pallas import tpu as pltpu  # noqa: F401  (TPU backend)

# ----------------------------- config (small) --------------------------------
VOCAB       = 100
VOCAB_PAD   = 128        # embedding table padded to a full lane tile
D_MODEL     = 32
N_HEAD      = 4
D_HEAD      = 8          # d_model // n_head
HD          = N_HEAD * D_HEAD
D_INNER     = 64
N_LAYER     = 2
NUM_LABELS  = 6
LN_EPS      = 1e-12
BATCH       = 2
SEQ         = 8
BS          = BATCH * SEQ
R           = 2 * SEQ    # relative positions (klen + qlen, no mems)


# ------------------------------ fused Pallas kernel ---------------------------
def _fused_kernel(ids_ref, emb_ref, pos_ref, mask_ref, shift_ref, pool_ref,
                  wqkv_ref, wr_ref, wo_ref, rwb_ref, rrb_ref,
                  ln1g_ref, ln1b_ref, w1_ref, b1_ref, w2_ref, b2_ref,
                  ln2g_ref, ln2b_ref, clsw_ref, clsb_ref, out_ref):
    f32 = jnp.float32
    scale = 1.0 / math.sqrt(D_HEAD)

    # ---- word embedding lookup: one-hot @ table on the MXU (no XLA gather) ----
    ids = ids_ref[...]                                              # (BS, 1) int32
    lanes = jax.lax.broadcasted_iota(jnp.int32, (BS, VOCAB_PAD), 1)
    onehot = (lanes == ids).astype(f32)                             # (BS, VOCAB_PAD)
    h = jnp.dot(onehot, emb_ref[...], preferred_element_type=f32)   # (BS, D)

    pos = pos_ref[...]            # (R, D)   relative positional encoding
    mask = mask_ref[...]          # (BS, BS) additive bias (attn mask + batch block mask)
    shift_sel = shift_ref[...]    # (BS, BS, R) 0/1 rel_shift selection tensor

    def layernorm(x, g, b):
        mu = jnp.mean(x, axis=-1, keepdims=True)
        var = jnp.mean((x - mu) ** 2, axis=-1, keepdims=True)
        return (x - mu) * jax.lax.rsqrt(var + LN_EPS) * g + b

    # TODO(synk): segment (token_type_ids) embedding term `ef` of XLNet rel-attn
    # is omitted (token_type_ids=None path); head_mask / mems also unused.
    for li in range(N_LAYER):       # layers unrolled; weights already resident in VMEM
        # fused QKV projection (one matmul, 96 output lanes)
        qkv = jnp.dot(h, wqkv_ref[li], preferred_element_type=f32)      # (BS, 3*HD)
        q = qkv[:, 0:HD]
        k = qkv[:, HD:2 * HD]
        v = qkv[:, 2 * HD:3 * HD]
        kr = jnp.dot(pos, wr_ref[li], preferred_element_type=f32)       # (R, HD)

        # fold the 1/sqrt(d_head) scale into the biased queries
        q_rw = (q + rwb_ref[li]) * scale                                 # (BS, HD)
        q_rr = (q + rrb_ref[li]) * scale
        wo = wo_ref[li]                                                  # (HD, D)

        attn_out = jnp.zeros((BS, D_MODEL), f32)
        for hh in range(N_HEAD):
            sl = slice(hh * D_HEAD, (hh + 1) * D_HEAD)
            # one set of matmuls covers both batch elements; the additive block
            # mask (-1e30 on cross-batch keys) keeps batches independent.
            ac = jax.lax.dot_general(q_rw[:, sl], k[:, sl],
                                     (((1,), (1,)), ((), ())),
                                     preferred_element_type=f32)         # (BS, BS)
            bd_raw = jax.lax.dot_general(q_rr[:, sl], kr[:, sl],
                                         (((1,), (1,)), ((), ())),
                                         preferred_element_type=f32)     # (BS, R)
            # XLNet rel_shift: bd[r, c] = bd_raw[r, S + (c % S) - (r % S)]
            bd = jnp.sum(bd_raw[:, None, :] * shift_sel, axis=-1)        # (BS, BS)

            score = ac + bd + mask
            score = score - jnp.max(score, axis=-1, keepdims=True)
            p = jnp.exp(score)
            p = p * pl.reciprocal(jnp.sum(p, axis=-1, keepdims=True), approx=True)
            o_h = jnp.dot(p, v[:, sl], preferred_element_type=f32)       # (BS, Dh)
            # per-head slice of the output projection == concat(o_h) @ Wo
            attn_out = attn_out + jnp.dot(o_h, wo[sl, :],
                                          preferred_element_type=f32)

        # dropout (identity in eval) + residual + LayerNorm
        h = layernorm(attn_out + h, ln1g_ref[li], ln1b_ref[li])

        # position-wise FFN: Linear -> erf-gelu -> Linear, residual + LayerNorm
        ff = jnp.dot(h, w1_ref[li], preferred_element_type=f32) + b1_ref[li]
        ff = 0.5 * ff * (1.0 + jax.lax.erf(ff * (1.0 / math.sqrt(2.0))))
        ff = jnp.dot(ff, w2_ref[li], preferred_element_type=f32) + b2_ref[li]
        h = layernorm(ff + h, ln2g_ref[li], ln2b_ref[li])

    # mean over seq (matmul with a pooling matrix) + classifier, all in-kernel
    pooled = jnp.dot(pool_ref[...], h, preferred_element_type=f32)       # (B, D)
    logits = jnp.dot(pooled, clsw_ref[...], preferred_element_type=f32) + clsb_ref[...]
    out_ref[...] = logits.astype(out_ref.dtype)


# ------------------------------ host-side glue --------------------------------
def relative_positional_encoding(qlen, klen, d_model):
    pos_seq = jnp.arange(klen, -qlen, -1.0, dtype=jnp.float32)             # (q+k,)
    inv_freq = 1.0 / (10000.0 ** (jnp.arange(0, d_model, 2, dtype=jnp.float32) / d_model))
    sinusoid = jnp.einsum("i,j->ij", pos_seq, inv_freq)
    return jnp.concatenate([jnp.sin(sinusoid), jnp.cos(sinusoid)], axis=-1)  # (q+k, D)


def init_params(key):
    def normal(k, shape):
        return (0.02 * jax.random.normal(k, shape)).astype(jnp.float32)

    ks = jax.random.split(key, 10)
    L = N_LAYER
    return {
        "word_emb": normal(ks[0], (VOCAB_PAD, D_MODEL)),  # rows >= VOCAB never indexed
        "Wqkv":     normal(ks[1], (L, D_MODEL, 3 * HD)),  # concat of Wq|Wk|Wv
        "Wr":       normal(ks[2], (L, D_MODEL, HD)),
        "Wo":       normal(ks[3], (L, HD, D_MODEL)),
        "r_w_bias": normal(ks[4], (L, 1, HD)),
        "r_r_bias": normal(ks[5], (L, 1, HD)),
        "ln1_g": jnp.ones((L, 1, D_MODEL), jnp.float32),
        "ln1_b": jnp.zeros((L, 1, D_MODEL), jnp.float32),
        "W1": normal(ks[6], (L, D_MODEL, D_INNER)),
        "b1": jnp.zeros((L, 1, D_INNER), jnp.float32),
        "W2": normal(ks[7], (L, D_INNER, D_MODEL)),
        "b2": jnp.zeros((L, 1, D_MODEL), jnp.float32),
        "ln2_g": jnp.ones((L, 1, D_MODEL), jnp.float32),
        "ln2_b": jnp.zeros((L, 1, D_MODEL), jnp.float32),
        "cls_W": normal(ks[8], (D_MODEL, NUM_LABELS)),
        "cls_b": jnp.zeros((1, NUM_LABELS), jnp.float32),
    }


@jax.jit
def forward(params, input_ids, attention_mask):
    # Tiny host-side constants (constant-folded / fused under jit).
    ids2d = input_ids.reshape(BS, 1).astype(jnp.int32)
    pos_emb = relative_positional_encoding(SEQ, SEQ, D_MODEL)              # (R, D)

    # Additive score bias: HF XLNet "score - 1e30 * attn_mask" over keys, plus
    # a -1e30 block mask separating the two batch elements (so both batches
    # can share one 16x16 score matrix per head inside the kernel).
    key_bias = (1.0 - attention_mask.reshape(BS).astype(jnp.float32)) * (-1e30)
    batch_id = jnp.arange(BS, dtype=jnp.int32) // SEQ
    block_bias = jnp.where(batch_id[:, None] == batch_id[None, :], 0.0, -1e30)
    mask_full = key_bias[None, :] + block_bias                             # (BS, BS)

    # rel_shift selection tensor: shift_sel[r, c, m] = 1 iff m == S + (c%S) - (r%S)
    r_idx = jnp.arange(BS)[:, None, None]
    c_idx = jnp.arange(BS)[None, :, None]
    m_idx = jnp.arange(R)[None, None, :]
    shift_sel = (m_idx == (SEQ + (c_idx % SEQ) - (r_idx % SEQ))).astype(jnp.float32)

    # mean-pool matrix: pooled = pool_mat @ h   (torch.mean over dim=1)
    pool_mat = (batch_id[None, :] == jnp.arange(BATCH, dtype=jnp.int32)[:, None]
                ).astype(jnp.float32) / SEQ                                # (B, BS)

    # Single fused pallas_call: no grid, every operand mapped whole into VMEM.
    return pl.pallas_call(
        _fused_kernel,
        out_shape=jax.ShapeDtypeStruct((BATCH, NUM_LABELS), jnp.float32),
    )(ids2d, params["word_emb"], pos_emb, mask_full, shift_sel, pool_mat,
      params["Wqkv"], params["Wr"], params["Wo"],
      params["r_w_bias"], params["r_r_bias"],
      params["ln1_g"], params["ln1_b"],
      params["W1"], params["b1"], params["W2"], params["b2"],
      params["ln2_g"], params["ln2_b"],
      params["cls_W"], params["cls_b"])


# ----------------------------------- main -------------------------------------
if __name__ == "__main__":
    key = jax.random.PRNGKey(0)
    params = init_params(key)

    ids_key = jax.random.fold_in(key, 123)
    input_ids = jax.random.randint(ids_key, (BATCH, SEQ), 0, VOCAB, dtype=jnp.int32)
    attention_mask = jnp.ones((BATCH, SEQ), dtype=jnp.float32)

    logits = forward(params, input_ids, attention_mask)
    logits = jax.block_until_ready(logits)
    assert logits.shape == (BATCH, NUM_LABELS)
    assert bool(jnp.all(jnp.isfinite(logits)))
    print("KERNEL_OK")
</pallas_src>

<mosaic_0001>
module attributes {stable_mosaic.version = 11 : i64} {
  func.func @_fused_kernel(%arg0: memref<16x1xi32, #tpu.memory_space<vmem>>, %arg1: memref<128x32xf32, #tpu.memory_space<vmem>>, %arg2: memref<16x32xf32, #tpu.memory_space<vmem>>, %arg3: memref<16x16xf32, #tpu.memory_space<vmem>>, %arg4: memref<16x16x16xf32, #tpu.memory_space<vmem>>, %arg5: memref<2x16xf32, #tpu.memory_space<vmem>>, %arg6: memref<2x32x96xf32, #tpu.memory_space<vmem>>, %arg7: memref<2x32x32xf32, #tpu.memory_space<vmem>>, %arg8: memref<2x32x32xf32, #tpu.memory_space<vmem>>, %arg9: memref<2x1x32xf32, #tpu.memory_space<vmem>>, %arg10: memref<2x1x32xf32, #tpu.memory_space<vmem>>, %arg11: memref<2x1x32xf32, #tpu.memory_space<vmem>>, %arg12: memref<2x1x32xf32, #tpu.memory_space<vmem>>, %arg13: memref<2x32x64xf32, #tpu.memory_space<vmem>>, %arg14: memref<2x1x64xf32, #tpu.memory_space<vmem>>, %arg15: memref<2x64x32xf32, #tpu.memory_space<vmem>>, %arg16: memref<2x1x32xf32, #tpu.memory_space<vmem>>, %arg17: memref<2x1x32xf32, #tpu.memory_space<vmem>>, %arg18: memref<2x1x32xf32, #tpu.memory_space<vmem>>, %arg19: memref<32x6xf32, #tpu.memory_space<vmem>>, %arg20: memref<1x6xf32, #tpu.memory_space<vmem>>, %arg21: memref<2x6xf32, #tpu.memory_space<vmem>>) attributes {dimension_semantics = [], scalar_prefetch = 0 : i64, scratch_operands = 0 : i64, tpu.core_type = #tpu.core_type<tc>} {
    %c0 = arith.constant 0 : index
    %c0_0 = arith.constant 0 : index
    %0 = vector.load %arg0[%c0, %c0_0] : memref<16x1xi32, #tpu.memory_space<vmem>>, vector<16x1xi32>
    %1 = tpu.iota {dimensions = array<i32: 1>} : vector<16x128xi32>
    %2 = vector.broadcast %0 : vector<16x1xi32> to vector<16x128xi32>
    %3 = arith.cmpi eq, %1, %2 : vector<16x128xi32>
    %4 = arith.extui %3 : vector<16x128xi1> to vector<16x128xi32>
    %5 = arith.sitofp %4 : vector<16x128xi32> to vector<16x128xf32>
    %c0_1 = arith.constant 0 : index
    %c0_2 = arith.constant 0 : index
    %6 = vector.load %arg1[%c0_1, %c0_2] : memref<128x32xf32, #tpu.memory_space<vmem>>, vector<128x32xf32>
    %cst = arith.constant dense<0.000000e+00> : vector<16x32xf32>
    %7 = tpu.matmul %5, %6, %cst {dimension_numbers = #tpu.dot_dimension_numbers<[1], [0], [0], [1], [0, 0, 1, 1], [], []>} : vector<16x128xf32>, vector<128x32xf32>, vector<16x32xf32> -> vector<16x32xf32>
    %c0_3 = arith.constant 0 : index
    %c0_4 = arith.constant 0 : index
    %8 = vector.load %arg2[%c0_3, %c0_4] : memref<16x32xf32, #tpu.memory_space<vmem>>, vector<16x32xf32>
    %c0_5 = arith.constant 0 : index
    %c0_6 = arith.constant 0 : index
    %9 = vector.load %arg3[%c0_5, %c0_6] : memref<16x16xf32, #tpu.memory_space<vmem>>, vector<16x16xf32>
    %c0_7 = arith.constant 0 : index
    %c0_8 = arith.constant 0 : index
    %c0_9 = arith.constant 0 : index
    %10 = vector.load %arg4[%c0_7, %c0_8, %c0_9] : memref<16x16x16xf32, #tpu.memory_space<vmem>>, vector<16x16x16xf32>
    %c0_10 = arith.constant 0 : index
    %c0_11 = arith.constant 0 : index
    %c0_12 = arith.constant 0 : index
    %11 = vector.load %arg6[%c0_10, %c0_11, %c0_12] : memref<2x32x96xf32, #tpu.memory_space<vmem>>, vector<1x32x96xf32>
    %12 = vector.shape_cast %11 : vector<1x32x96xf32> to vector<32x96xf32>
    %cst_13 = arith.constant dense<0.000000e+00> : vector<16x96xf32>
    %13 = tpu.matmul %7, %12, %cst_13 {dimension_numbers = #tpu.dot_dimension_numbers<[1], [0], [0], [1], [0, 0, 1, 1], [], []>} : vector<16x32xf32>, vector<32x96xf32>, vector<16x96xf32> -> vector<16x96xf32>
    %14 = vector.extract_strided_slice %13 {offsets = [0, 0], sizes = [16, 32], strides = [1, 1]} : vector<16x96xf32> to vector<16x32xf32>
    %15 = vector.extract_strided_slice %13 {offsets = [0, 32], sizes = [16, 32], strides = [1, 1]} : vector<16x96xf32> to vector<16x32xf32>
    %16 = vector.extract_strided_slice %13 {offsets = [0, 64], sizes = [16, 32], strides = [1, 1]} : vector<16x96xf32> to vector<16x32xf32>
    %c0_14 = arith.constant 0 : index
    %c0_15 = arith.constant 0 : index
    %c0_16 = arith.constant 0 : index
    %17 = vector.load %arg7[%c0_14, %c0_15, %c0_16] : memref<2x32x32xf32, #tpu.memory_space<vmem>>, vector<1x32x32xf32>
    %18 = vector.shape_cast %17 : vector<1x32x32xf32> to vector<32x32xf32>
    %cst_17 = arith.constant dense<0.000000e+00> : vector<16x32xf32>
    %19 = tpu.matmul %8, %18, %cst_17 {dimension_numbers = #tpu.dot_dimension_numbers<[1], [0], [0], [1], [0, 0, 1, 1], [], []>} : vector<16x32xf32>, vector<32x32xf32>, vector<16x32xf32> -> vector<16x32xf32>
    %c0_18 = arith.constant 0 : index
    %c0_19 = arith.constant 0 : index
    %c0_20 = arith.constant 0 : index
    %20 = vector.load %arg9[%c0_18, %c0_19, %c0_20] : memref<2x1x32xf32, #tpu.memory_space<vmem>>, vector<1x1x32xf32>
    %21 = vector.shape_cast %20 : vector<1x1x32xf32> to vector<1x32xf32>
    %22 = vector.broadcast %21 : vector<1x32xf32> to vector<16x32xf32>
    %23 = arith.addf %14, %22 : vector<16x32xf32>
    %cst_21 = arith.constant 0.353553385 : f32
    %24 = vector.broadcast %cst_21 : f32 to vector<16x32xf32>
    %25 = arith.mulf %23, %24 : vector<16x32xf32>
    %c0_22 = arith.constant 0 : index
    %c0_23 = arith.constant 0 : index
    %c0_24 = arith.constant 0 : index
    %26 = vector.load %arg10[%c0_22, %c0_23, %c0_24] : memref<2x1x32xf32, #tpu.memory_space<vmem>>, vector<1x1x32xf32>
    %27 = vector.shape_cast %26 : vector<1x1x32xf32> to vector<1x32xf32>
    %28 = vector.broadcast %27 : vector<1x32xf32> to vector<16x32xf32>
    %29 = arith.addf %14, %28 : vector<16x32xf32>
    %cst_25 = arith.constant 0.353553385 : f32
    %30 = vector.broadcast %cst_25 : f32 to vector<16x32xf32>
    %31 = arith.mulf %29, %30 : vector<16x32xf32>
    %c0_26 = arith.constant 0 : index
    %c0_27 = arith.constant 0 : index
    %c0_28 = arith.constant 0 : index
    %32 = vector.load %arg8[%c0_26, %c0_27, %c0_28] : memref<2x32x32xf32, #tpu.memory_space<vmem>>, vector<1x32x32xf32>
    %33 = vector.shape_cast %32 : vector<1x32x32xf32> to vector<32x32xf32>
    %cst_29 = arith.constant 0.000000e+00 : f32
    %34 = vector.broadcast %cst_29 : f32 to vector<16x32xf32>
    %35 = vector.extract_strided_slice %25 {offsets = [0, 0], sizes = [16, 8], strides = [1, 1]} : vector<16x32xf32> to vector<16x8xf32>
    %36 = vector.extract_strided_slice %15 {offsets = [0, 0], sizes = [16, 8], strides = [1, 1]} : vector<16x32xf32> to vector<16x8xf32>
    %cst_30 = arith.constant dense<0.000000e+00> : vector<16x16xf32>
    %37 = tpu.matmul %35, %36, %cst_30 {dimension_numbers = #tpu.dot_dimension_numbers<[1], [1], [0], [0], [0, 0, 1, 0], [], []>} : vector<16x8xf32>, vector<16x8xf32>, vector<16x16xf32> -> vector<16x16xf32>
    %38 = vector.extract_strided_slice %31 {offsets = [0, 0], sizes = [16, 8], strides = [1, 1]} : vector<16x32xf32> to vector<16x8xf32>
    %39 = vector.extract_strided_slice %19 {offsets = [0, 0], sizes = [16, 8], strides = [1, 1]} : vector<16x32xf32> to vector<16x8xf32>
    %cst_31 = arith.constant dense<0.000000e+00> : vector<16x16xf32>
    %40 = tpu.matmul %38, %39, %cst_31 {dimension_numbers = #tpu.dot_dimension_numbers<[1], [1], [0], [0], [0, 0, 1, 0], [], []>} : vector<16x8xf32>, vector<16x8xf32>, vector<16x16xf32> -> vector<16x16xf32>
    %41 = vector.shape_cast %40 : vector<16x16xf32> to vector<16x1x16xf32>
    %42 = vector.broadcast %41 : vector<16x1x16xf32> to vector<16x16x16xf32>
    %43 = arith.mulf %42, %10 : vector<16x16x16xf32>
    %cst_32 = arith.constant dense<0.000000e+00> : vector<16x16xf32>
    %44 = vector.multi_reduction <add>, %43, %cst_32 [2] : vector<16x16x16xf32> to vector<16x16xf32>
    %45 = arith.addf %37, %44 : vector<16x16xf32>
    %46 = arith.addf %45, %9 : vector<16x16xf32>
    %cst_33 = arith.constant dense<0xFF800000> : vector<16xf32>
    %47 = vector.multi_reduction <maximumf>, %46, %cst_33 [1] : vector<16x16xf32> to vector<16xf32>
    %48 = vector.shape_cast %47 : vector<16xf32> to vector<16x1xf32>
    %49 = vector.broadcast %48 : vector<16x1xf32> to vector<16x16xf32>
    %50 = arith.subf %46, %49 : vector<16x16xf32>
    %51 = math.exp %50 : vector<16x16xf32>
    %cst_34 = arith.constant dense<0.000000e+00> : vector<16xf32>
    %52 = vector.multi_reduction <add>, %51, %cst_34 [1] : vector<16x16xf32> to vector<16xf32>
    %53 = vector.shape_cast %52 : vector<16xf32> to vector<16x1xf32>
    %54 = tpu.reciprocal %53 {approx = true} : vector<16x1xf32> -> vector<16x1xf32>
    %55 = vector.broadcast %54 : vector<16x1xf32> to vector<16x16xf32>
    %56 = arith.mulf %51, %55 : vector<16x16xf32>
    %57 = vector.extract_strided_slice %16 {offsets = [0, 0], sizes = [16, 8], strides = [1, 1]} : vector<16x32xf32> to vector<16x8xf32>
    %cst_35 = arith.constant dense<0.000000e+00> : vector<16x8xf32>
    %58 = tpu.matmul %56, %57, %cst_35 {dimension_numbers = #tpu.dot_dimension_numbers<[1], [0], [0], [1], [0, 0, 1, 1], [], []>} : vector<16x16xf32>, vector<16x8xf32>, vector<16x8xf32> -> vector<16x8xf32>
    %59 = vector.extract_strided_slice %33 {offsets = [0, 0], sizes = [8, 32], strides = [1, 1]} : vector<32x32xf32> to vector<8x32xf32>
    %cst_36 = arith.constant dense<0.000000e+00> : vector<16x32xf32>
    %60 = tpu.matmul %58, %59, %cst_36 {dimension_numbers = #tpu.dot_dimension_numbers<[1], [0], [0], [1], [0, 0, 1, 1], [], []>} : vector<16x8xf32>, vector<8x32xf32>, vector<16x32xf32> -> vector<16x32xf32>
    %61 = arith.addf %34, %60 : vector<16x32xf32>
    %62 = vector.extract_strided_slice %25 {offsets = [0, 8], sizes = [16, 8], strides = [1, 1]} : vector<16x32xf32> to vector<16x8xf32>
    %63 = vector.extract_strided_slice %15 {offsets = [0, 8], sizes = [16, 8], strides = [1, 1]} : vector<16x32xf32> to vector<16x8xf32>
    %cst_37 = arith.constant dense<0.000000e+00> : vector<16x16xf32>
    %64 = tpu.matmul %62, %63, %cst_37 {dimension_numbers = #tpu.dot_dimension_numbers<[1], [1], [0], [0], [0, 0, 1, 0], [], []>} : vector<16x8xf32>, vector<16x8xf32>, vector<16x16xf32> -> vector<16x16xf32>
    %65 = vector.extract_strided_slice %31 {offsets = [0, 8], sizes = [16, 8], strides = [1, 1]} : vector<16x32xf32> to vector<16x8xf32>
    %66 = vector.extract_strided_slice %19 {offsets = [0, 8], sizes = [16, 8], strides = [1, 1]} : vector<16x32xf32> to vector<16x8xf32>
    %cst_38 = arith.constant dense<0.000000e+00> : vector<16x16xf32>
    %67 = tpu.matmul %65, %66, %cst_38 {dimension_numbers = #tpu.dot_dimension_numbers<[1], [1], [0], [0], [0, 0, 1, 0], [], []>} : vector<16x8xf32>, vector<16x8xf32>, vector<16x16xf32> -> vector<16x16xf32>
    %68 = vector.shape_cast %67 : vector<16x16xf32> to vector<16x1x16xf32>
    %69 = vector.broadcast %68 : vector<16x1x16xf32> to vector<16x16x16xf32>
    %70 = arith.mulf %69, %10 : vector<16x16x16xf32>
    %cst_39 = arith.constant dense<0.000000e+00> : vector<16x16xf32>
    %71 = vector.multi_reduction <add>, %70, %cst_39 [2] : vector<16x16x16xf32> to vector<16x16xf32>
    %72 = arith.addf %64, %71 : vector<16x16xf32>
    %73 = arith.addf %72, %9 : vector<16x16xf32>
    %cst_40 = arith.constant dense<0xFF800000> : vector<16xf32>
    %74 = vector.multi_reduction <maximumf>, %73, %cst_40 [1] : vector<16x16xf32> to vector<16xf32>
    %75 = vector.shape_cast %74 : vector<16xf32> to vector<16x1xf32>
    %76 = vector.broadcast %75 : vector<16x1xf32> to vector<16x16xf32>
    %77 = arith.subf %73, %76 : vector<16x16xf32>
    %78 = math.exp %77 : vector<16x16xf32>
    %cst_41 = arith.constant dense<0.000000e+00> : vector<16xf32>
    %79 = vector.multi_reduction <add>, %78, %cst_41 [1] : vector<16x16xf32> to vector<16xf32>
    %80 = vector.shape_cast %79 : vector<16xf32> to vector<16x1xf32>
    %81 = tpu.reciprocal %80 {approx = true} : vector<16x1xf32> -> vector<16x1xf32>
    %82 = vector.broadcast %81 : vector<16x1xf32> to vector<16x16xf32>
    %83 = arith.mulf %78, %82 : vector<16x16xf32>
    %84 = vector.extract_strided_slice %16 {offsets = [0, 8], sizes = [16, 8], strides = [1, 1]} : vector<16x32xf32> to vector<16x8xf32>
    %cst_42 = arith.constant dense<0.000000e+00> : vector<16x8xf32>
    %85 = tpu.matmul %83, %84, %cst_42 {dimension_numbers = #tpu.dot_dimension_numbers<[1], [0], [0], [1], [0, 0, 1, 1], [], []>} : vector<16x16xf32>, vector<16x8xf32>, vector<16x8xf32> -> vector<16x8xf32>
    %86 = vector.extract_strided_slice %33 {offsets = [8, 0], sizes = [8, 32], strides = [1, 1]} : vector<32x32xf32> to vector<8x32xf32>
    %cst_43 = arith.constant dense<0.000000e+00> : vector<16x32xf32>
    %87 = tpu.matmul %85, %86, %cst_43 {dimension_numbers = #tpu.dot_dimension_numbers<[1], [0], [0], [1], [0, 0, 1, 1], [], []>} : vector<16x8xf32>, vector<8x32xf32>, vector<16x32xf32> -> vector<16x32xf32>
    %88 = arith.addf %61, %87 : vector<16x32xf32>
    %89 = vector.extract_strided_slice %25 {offsets = [0, 16], sizes = [16, 8], strides = [1, 1]} : vector<16x32xf32> to vector<16x8xf32>
    %90 = vector.extract_strided_slice %15 {offsets = [0, 16], sizes = [16, 8], strides = [1, 1]} : vector<16x32xf32> to vector<16x8xf32>
    %cst_44 = arith.constant dense<0.000000e+00> : vector<16x16xf32>
    %91 = tpu.matmul %89, %90, %cst_44 {dimension_numbers = #tpu.dot_dimension_numbers<[1], [1], [0], [0], [0, 0, 1, 0], [], []>} : vector<16x8xf32>, vector<16x8xf32>, vector<16x16xf32> -> vector<16x16xf32>
    %92 = vector.extract_strided_slice %31 {offsets = [0, 16], sizes = [16, 8], strides = [1, 1]} : vector<16x32xf32> to vector<16x8xf32>
    %93 = vector.extract_strided_slice %19 {offsets = [0, 16], sizes = [16, 8], strides = [1, 1]} : vector<16x32xf32> to vector<16x8xf32>
    %cst_45 = arith.constant dense<0.000000e+00> : vector<16x16xf32>
    %94 = tpu.matmul %92, %93, %cst_45 {dimension_numbers = #tpu.dot_dimension_numbers<[1], [1], [0], [0], [0, 0, 1, 0], [], []>} : vector<16x8xf32>, vector<16x8xf32>, vector<16x16xf32> -> vector<16x16xf32>
    %95 = vector.shape_cast %94 : vector<16x16xf32> to vector<16x1x16xf32>
    %96 = vector.broadcast %95 : vector<16x1x16xf32> to vector<16x16x16xf32>
    %97 = arith.mulf %96, %10 : vector<16x16x16xf32>
    %cst_46 = arith.constant dense<0.000000e+00> : vector<16x16xf32>
    %98 = vector.multi_reduction <add>, %97, %cst_46 [2] : vector<16x16x16xf32> to vector<16x16xf32>
    %99 = arith.addf %91, %98 : vector<16x16xf32>
    %100 = arith.addf %99, %9 : vector<16x16xf32>
    %cst_47 = arith.constant dense<0xFF800000> : vector<16xf32>
    %101 = vector.multi_reduction <maximumf>, %100, %cst_47 [1] : vector<16x16xf32> to vector<16xf32>
    %102 = vector.shape_cast %101 : vector<16xf32> to vector<16x1xf32>
    %103 = vector.broadcast %102 : vector<16x1xf32> to vector<16x16xf32>
    %104 = arith.subf %100, %103 : vector<16x16xf32>
    %105 = math.exp %104 : vector<16x16xf32>
    %cst_48 = arith.constant dense<0.000000e+00> : vector<16xf32>
    %106 = vector.multi_reduction <add>, %105, %cst_48 [1] : vector<16x16xf32> to vector<16xf32>
    %107 = vector.shape_cast %106 : vector<16xf32> to vector<16x1xf32>
    %108 = tpu.reciprocal %107 {approx = true} : vector<16x1xf32> -> vector<16x1xf32>
    %109 = vector.broadcast %108 : vector<16x1xf32> to vector<16x16xf32>
    %110 = arith.mulf %105, %109 : vector<16x16xf32>
    %111 = vector.extract_strided_slice %16 {offsets = [0, 16], sizes = [16, 8], strides = [1, 1]} : vector<16x32xf32> to vector<16x8xf32>
    %cst_49 = arith.constant dense<0.000000e+00> : vector<16x8xf32>
    %112 = tpu.matmul %110, %111, %cst_49 {dimension_numbers = #tpu.dot_dimension_numbers<[1], [0], [0], [1], [0, 0, 1, 1], [], []>} : vector<16x16xf32>, vector<16x8xf32>, vector<16x8xf32> -> vector<16x8xf32>
    %113 = vector.extract_strided_slice %33 {offsets = [16, 0], sizes = [8, 32], strides = [1, 1]} : vector<32x32xf32> to vector<8x32xf32>
    %cst_50 = arith.constant dense<0.000000e+00> : vector<16x32xf32>
    %114 = tpu.matmul %112, %113, %cst_50 {dimension_numbers = #tpu.dot_dimension_numbers<[1], [0], [0], [1], [0, 0, 1, 1], [], []>} : vector<16x8xf32>, vector<8x32xf32>, vector<16x32xf32> -> vector<16x32xf32>
    %115 = arith.addf %88, %114 : vector<16x32xf32>
    %116 = vector.extract_strided_slice %25 {offsets = [0, 24], sizes = [16, 8], strides = [1, 1]} : vector<16x32xf32> to vector<16x8xf32>
    %117 = vector.extract_strided_slice %15 {offsets = [0, 24], sizes = [16, 8], strides = [1, 1]} : vector<16x32xf32> to vector<16x8xf32>
    %cst_51 = arith.constant dense<0.000000e+00> : vector<16x16xf32>
    %118 = tpu.matmul %116, %117, %cst_51 {dimension_numbers = #tpu.dot_dimension_numbers<[1], [1], [0], [0], [0, 0, 1, 0], [], []>} : vector<16x8xf32>, vector<16x8xf32>, vector<16x16xf32> -> vector<16x16xf32>
    %119 = vector.extract_strided_slice %31 {offsets = [0, 24], sizes = [16, 8], strides = [1, 1]} : vector<16x32xf32> to vector<16x8xf32>
    %120 = vector.extract_strided_slice %19 {offsets = [0, 24], sizes = [16, 8], strides = [1, 1]} : vector<16x32xf32> to vector<16x8xf32>
    %cst_52 = arith.constant dense<0.000000e+00> : vector<16x16xf32>
    %121 = tpu.matmul %119, %120, %cst_52 {dimension_numbers = #tpu.dot_dimension_numbers<[1], [1], [0], [0], [0, 0, 1, 0], [], []>} : vector<16x8xf32>, vector<16x8xf32>, vector<16x16xf32> -> vector<16x16xf32>
    %122 = vector.shape_cast %121 : vector<16x16xf32> to vector<16x1x16xf32>
    %123 = vector.broadcast %122 : vector<16x1x16xf32> to vector<16x16x16xf32>
    %124 = arith.mulf %123, %10 : vector<16x16x16xf32>
    %cst_53 = arith.constant dense<0.000000e+00> : vector<16x16xf32>
    %125 = vector.multi_reduction <add>, %124, %cst_53 [2] : vector<16x16x16xf32> to vector<16x16xf32>
    %126 = arith.addf %118, %125 : vector<16x16xf32>
    %127 = arith.addf %126, %9 : vector<16x16xf32>
    %cst_54 = arith.constant dense<0xFF800000> : vector<16xf32>
    %128 = vector.multi_reduction <maximumf>, %127, %cst_54 [1] : vector<16x16xf32> to vector<16xf32>
    %129 = vector.shape_cast %128 : vector<16xf32> to vector<16x1xf32>
    %130 = vector.broadcast %129 : vector<16x1xf32> to vector<16x16xf32>
    %131 = arith.subf %127, %130 : vector<16x16xf32>
    %132 = math.exp %131 : vector<16x16xf32>
    %cst_55 = arith.constant dense<0.000000e+00> : vector<16xf32>
    %133 = vector.multi_reduction <add>, %132, %cst_55 [1] : vector<16x16xf32> to vector<16xf32>
    %134 = vector.shape_cast %133 : vector<16xf32> to vector<16x1xf32>
    %135 = tpu.reciprocal %134 {approx = true} : vector<16x1xf32> -> vector<16x1xf32>
    %136 = vector.broadcast %135 : vector<16x1xf32> to vector<16x16xf32>
    %137 = arith.mulf %132, %136 : vector<16x16xf32>
    %138 = vector.extract_strided_slice %16 {offsets = [0, 24], sizes = [16, 8], strides = [1, 1]} : vector<16x32xf32> to vector<16x8xf32>
    %cst_56 = arith.constant dense<0.000000e+00> : vector<16x8xf32>
    %139 = tpu.matmul %137, %138, %cst_56 {dimension_numbers = #tpu.dot_dimension_numbers<[1], [0], [0], [1], [0, 0, 1, 1], [], []>} : vector<16x16xf32>, vector<16x8xf32>, vector<16x8xf32> -> vector<16x8xf32>
    %140 = vector.extract_strided_slice %33 {offsets = [24, 0], sizes = [8, 32], strides = [1, 1]} : vector<32x32xf32> to vector<8x32xf32>
    %cst_57 = arith.constant dense<0.000000e+00> : vector<16x32xf32>
    %141 = tpu.matmul %139, %140, %cst_57 {dimension_numbers = #tpu.dot_dimension_numbers<[1], [0], [0], [1], [0, 0, 1, 1], [], []>} : vector<16x8xf32>, vector<8x32xf32>, vector<16x32xf32> -> vector<16x32xf32>
    %142 = arith.addf %115, %141 : vector<16x32xf32>
    %143 = arith.addf %142, %7 : vector<16x32xf32>
    %c0_58 = arith.constant 0 : index
    %c0_59 = arith.constant 0 : index
    %c0_60 = arith.constant 0 : index
    %144 = vector.load %arg11[%c0_58, %c0_59, %c0_60] : memref<2x1x32xf32, #tpu.memory_space<vmem>>, vector<1x1x32xf32>
    %145 = vector.shape_cast %144 : vector<1x1x32xf32> to vector<1x32xf32>
    %c0_61 = arith.constant 0 : index
    %c0_62 = arith.constant 0 : index
    %c0_63 = arith.constant 0 : index
    %146 = vector.load %arg12[%c0_61, %c0_62, %c0_63] : memref<2x1x32xf32, #tpu.memory_space<vmem>>, vector<1x1x32xf32>
    %147 = vector.shape_cast %146 : vector<1x1x32xf32> to vector<1x32xf32>
    %cst_64 = arith.constant dense<0.000000e+00> : vector<16xf32>
    %148 = vector.multi_reduction <add>, %143, %cst_64 [1] : vector<16x32xf32> to vector<16xf32>
    %149 = vector.shape_cast %148 : vector<16xf32> to vector<16x1xf32>
    %cst_65 = arith.constant 3.200000e+01 : f32
    %150 = vector.broadcast %cst_65 : f32 to vector<16x1xf32>
    %151 = arith.divf %149, %150 : vector<16x1xf32>
    %152 = vector.broadcast %151 : vector<16x1xf32> to vector<16x32xf32>
    %153 = arith.subf %143, %152 : vector<16x32xf32>
    %154 = arith.mulf %153, %153 : vector<16x32xf32>
    %cst_66 = arith.constant dense<0.000000e+00> : vector<16xf32>
    %155 = vector.multi_reduction <add>, %154, %cst_66 [1] : vector<16x32xf32> to vector<16xf32>
    %156 = vector.shape_cast %155 : vector<16xf32> to vector<16x1xf32>
    %cst_67 = arith.constant 3.200000e+01 : f32
    %157 = vector.broadcast %cst_67 : f32 to vector<16x1xf32>
    %158 = arith.divf %156, %157 : vector<16x1xf32>
    %159 = vector.broadcast %151 : vector<16x1xf32> to vector<16x32xf32>
    %160 = arith.subf %143, %159 : vector<16x32xf32>
    %cst_68 = arith.constant 9.99999996E-13 : f32
    %161 = vector.broadcast %cst_68 : f32 to vector<16x1xf32>
    %162 = arith.addf %158, %161 : vector<16x1xf32>
    %163 = math.rsqrt %162 : vector<16x1xf32>
    %164 = vector.broadcast %163 : vector<16x1xf32> to vector<16x32xf32>
    %165 = arith.mulf %160, %164 : vector<16x32xf32>
    %166 = vector.broadcast %145 : vector<1x32xf32> to vector<16x32xf32>
    %167 = arith.mulf %165, %166 : vector<16x32xf32>
    %168 = vector.broadcast %147 : vector<1x32xf32> to vector<16x32xf32>
    %169 = arith.addf %167, %168 : vector<16x32xf32>
    %c0_69 = arith.constant 0 : index
    %c0_70 = arith.constant 0 : index
    %c0_71 = arith.constant 0 : index
    %170 = vector.load %arg13[%c0_69, %c0_70, %c0_71] : memref<2x32x64xf32, #tpu.memory_space<vmem>>, vector<1x32x64xf32>
    %171 = vector.shape_cast %170 : vector<1x32x64xf32> to vector<32x64xf32>
    %cst_72 = arith.constant dense<0.000000e+00> : vector<16x64xf32>
    %172 = tpu.matmul %169, %171, %cst_72 {dimension_numbers = #tpu.dot_dimension_numbers<[1], [0], [0], [1], [0, 0, 1, 1], [], []>} : vector<16x32xf32>, vector<32x64xf32>, vector<16x64xf32> -> vector<16x64xf32>
    %c0_73 = arith.constant 0 : index
    %c0_74 = arith.constant 0 : index
    %c0_75 = arith.constant 0 : index
    %173 = vector.load %arg14[%c0_73, %c0_74, %c0_75] : memref<2x1x64xf32, #tpu.memory_space<vmem>>, vector<1x1x64xf32>
    %174 = vector.shape_cast %173 : vector<1x1x64xf32> to vector<1x64xf32>
    %175 = vector.broadcast %174 : vector<1x64xf32> to vector<16x64xf32>
    %176 = arith.addf %172, %175 : vector<16x64xf32>
    %cst_76 = arith.constant 5.000000e-01 : f32
    %177 = vector.broadcast %cst_76 : f32 to vector<16x64xf32>
    %178 = arith.mulf %177, %176 : vector<16x64xf32>
    %cst_77 = arith.constant 0.707106769 : f32
    %179 = vector.broadcast %cst_77 : f32 to vector<16x64xf32>
    %180 = arith.mulf %176, %179 : vector<16x64xf32>
    %181 = math.erf %180 : vector<16x64xf32>
    %cst_78 = arith.constant 1.000000e+00 : f32
    %182 = vector.broadcast %cst_78 : f32 to vector<16x64xf32>
    %183 = arith.addf %182, %181 : vector<16x64xf32>
    %184 = arith.mulf %178, %183 : vector<16x64xf32>
    %c0_79 = arith.constant 0 : index
    %c0_80 = arith.constant 0 : index
    %c0_81 = arith.constant 0 : index
    %185 = vector.load %arg15[%c0_79, %c0_80, %c0_81] : memref<2x64x32xf32, #tpu.memory_space<vmem>>, vector<1x64x32xf32>
    %186 = vector.shape_cast %185 : vector<1x64x32xf32> to vector<64x32xf32>
    %cst_82 = arith.constant dense<0.000000e+00> : vector<16x32xf32>
    %187 = tpu.matmul %184, %186, %cst_82 {dimension_numbers = #tpu.dot_dimension_numbers<[1], [0], [0], [1], [0, 0, 1, 1], [], []>} : vector<16x64xf32>, vector<64x32xf32>, vector<16x32xf32> -> vector<16x32xf32>
    %c0_83 = arith.constant 0 : index
    %c0_84 = arith.constant 0 : index
    %c0_85 = arith.constant 0 : index
    %188 = vector.load %arg16[%c0_83, %c0_84, %c0_85] : memref<2x1x32xf32, #tpu.memory_space<vmem>>, vector<1x1x32xf32>
    %189 = vector.shape_cast %188 : vector<1x1x32xf32> to vector<1x32xf32>
    %190 = vector.broadcast %189 : vector<1x32xf32> to vector<16x32xf32>
    %191 = arith.addf %187, %190 : vector<16x32xf32>
    %192 = arith.addf %191, %169 : vector<16x32xf32>
    %c0_86 = arith.constant 0 : index
    %c0_87 = arith.constant 0 : index
    %c0_88 = arith.constant 0 : index
    %193 = vector.load %arg17[%c0_86, %c0_87, %c0_88] : memref<2x1x32xf32, #tpu.memory_space<vmem>>, vector<1x1x32xf32>
    %194 = vector.shape_cast %193 : vector<1x1x32xf32> to vector<1x32xf32>
    %c0_89 = arith.constant 0 : index
    %c0_90 = arith.constant 0 : index
    %c0_91 = arith.constant 0 : index
    %195 = vector.load %arg18[%c0_89, %c0_90, %c0_91] : memref<2x1x32xf32, #tpu.memory_space<vmem>>, vector<1x1x32xf32>
    %196 = vector.shape_cast %195 : vector<1x1x32xf32> to vector<1x32xf32>
    %cst_92 = arith.constant dense<0.000000e+00> : vector<16xf32>
    %197 = vector.multi_reduction <add>, %192, %cst_92 [1] : vector<16x32xf32> to vector<16xf32>
    %198 = vector.shape_cast %197 : vector<16xf32> to vector<16x1xf32>
    %cst_93 = arith.constant 3.200000e+01 : f32
    %199 = vector.broadcast %cst_93 : f32 to vector<16x1xf32>
    %200 = arith.divf %198, %199 : vector<16x1xf32>
    %201 = vector.broadcast %200 : vector<16x1xf32> to vector<16x32xf32>
    %202 = arith.subf %192, %201 : vector<16x32xf32>
    %203 = arith.mulf %202, %202 : vector<16x32xf32>
    %cst_94 = arith.constant dense<0.000000e+00> : vector<16xf32>
    %204 = vector.multi_reduction <add>, %203, %cst_94 [1] : vector<16x32xf32> to vector<16xf32>
    %205 = vector.shape_cast %204 : vector<16xf32> to vector<16x1xf32>
    %cst_95 = arith.constant 3.200000e+01 : f32
    %206 = vector.broadcast %cst_95 : f32 to vector<16x1xf32>
    %207 = arith.divf %205, %206 : vector<16x1xf32>
    %208 = vector.broadcast %200 : vector<16x1xf32> to vector<16x32xf32>
    %209 = arith.subf %192, %208 : vector<16x32xf32>
    %cst_96 = arith.constant 9.99999996E-13 : f32
    %210 = vector.broadcast %cst_96 : f32 to vector<16x1xf32>
    %211 = arith.addf %207, %210 : vector<16x1xf32>
    %212 = math.rsqrt %211 : vector<16x1xf32>
    %213 = vector.broadcast %212 : vector<16x1xf32> to vector<16x32xf32>
    %214 = arith.mulf %209, %213 : vector<16x32xf32>
    %215 = vector.broadcast %194 : vector<1x32xf32> to vector<16x32xf32>
    %216 = arith.mulf %214, %215 : vector<16x32xf32>
    %217 = vector.broadcast %196 : vector<1x32xf32> to vector<16x32xf32>
    %218 = arith.addf %216, %217 : vector<16x32xf32>
    %c1 = arith.constant 1 : index
    %c0_97 = arith.constant 0 : index
    %c0_98 = arith.constant 0 : index
    %219 = vector.load %arg6[%c1, %c0_97, %c0_98] : memref<2x32x96xf32, #tpu.memory_space<vmem>>, vector<1x32x96xf32>
    %220 = vector.shape_cast %219 : vector<1x32x96xf32> to vector<32x96xf32>
    %cst_99 = arith.constant dense<0.000000e+00> : vector<16x96xf32>
    %221 = tpu.matmul %218, %220, %cst_99 {dimension_numbers = #tpu.dot_dimension_numbers<[1], [0], [0], [1], [0, 0, 1, 1], [], []>} : vector<16x32xf32>, vector<32x96xf32>, vector<16x96xf32> -> vector<16x96xf32>
    %222 = vector.extract_strided_slice %221 {offsets = [0, 0], sizes = [16, 32], strides = [1, 1]} : vector<16x96xf32> to vector<16x32xf32>
    %223 = vector.extract_strided_slice %221 {offsets = [0, 32], sizes = [16, 32], strides = [1, 1]} : vector<16x96xf32> to vector<16x32xf32>
    %224 = vector.extract_strided_slice %221 {offsets = [0, 64], sizes = [16, 32], strides = [1, 1]} : vector<16x96xf32> to vector<16x32xf32>
    %c1_100 = arith.constant 1 : index
    %c0_101 = arith.constant 0 : index
    %c0_102 = arith.constant 0 : index
    %225 = vector.load %arg7[%c1_100, %c0_101, %c0_102] : memref<2x32x32xf32, #tpu.memory_space<vmem>>, vector<1x32x32xf32>
    %226 = vector.shape_cast %225 : vector<1x32x32xf32> to vector<32x32xf32>
    %cst_103 = arith.constant dense<0.000000e+00> : vector<16x32xf32>
    %227 = tpu.matmul %8, %226, %cst_103 {dimension_numbers = #tpu.dot_dimension_numbers<[1], [0], [0], [1], [0, 0, 1, 1], [], []>} : vector<16x32xf32>, vector<32x32xf32>, vector<16x32xf32> -> vector<16x32xf32>
    %c1_104 = arith.constant 1 : index
    %c0_105 = arith.constant 0 : index
    %c0_106 = arith.constant 0 : index
    %228 = vector.load %arg9[%c1_104, %c0_105, %c0_106] : memref<2x1x32xf32, #tpu.memory_space<vmem>>, vector<1x1x32xf32>
    %229 = vector.shape_cast %228 : vector<1x1x32xf32> to vector<1x32xf32>
    %230 = vector.broadcast %229 : vector<1x32xf32> to vector<16x32xf32>
    %231 = arith.addf %222, %230 : vector<16x32xf32>
    %cst_107 = arith.constant 0.353553385 : f32
    %232 = vector.broadcast %cst_107 : f32 to vector<16x32xf32>
    %233 = arith.mulf %231, %232 : vector<16x32xf32>
    %c1_108 = arith.constant 1 : index
    %c0_109 = arith.constant 0 : index
    %c0_110 = arith.constant 0 : index
    %234 = vector.load %arg10[%c1_108, %c0_109, %c0_110] : memref<2x1x32xf32, #tpu.memory_space<vmem>>, vector<1x1x32xf32>
    %235 = vector.shape_cast %234 : vector<1x1x32xf32> to vector<1x32xf32>
    %236 = vector.broadcast %235 : vector<1x32xf32> to vector<16x32xf32>
    %237 = arith.addf %222, %236 : vector<16x32xf32>
    %cst_111 = arith.constant 0.353553385 : f32
    %238 = vector.broadcast %cst_111 : f32 to vector<16x32xf32>
    %239 = arith.mulf %237, %238 : vector<16x32xf32>
    %c1_112 = arith.constant 1 : index
    %c0_113 = arith.constant 0 : index
    %c0_114 = arith.constant 0 : index
    %240 = vector.load %arg8[%c1_112, %c0_113, %c0_114] : memref<2x32x32xf32, #tpu.memory_space<vmem>>, vector<1x32x32xf32>
    %241 = vector.shape_cast %240 : vector<1x32x32xf32> to vector<32x32xf32>
    %cst_115 = arith.constant 0.000000e+00 : f32
    %242 = vector.broadcast %cst_115 : f32 to vector<16x32xf32>
    %243 = vector.extract_strided_slice %233 {offsets = [0, 0], sizes = [16, 8], strides = [1, 1]} : vector<16x32xf32> to vector<16x8xf32>
    %244 = vector.extract_strided_slice %223 {offsets = [0, 0], sizes = [16, 8], strides = [1, 1]} : vector<16x32xf32> to vector<16x8xf32>
    %cst_116 = arith.constant dense<0.000000e+00> : vector<16x16xf32>
    %245 = tpu.matmul %243, %244, %cst_116 {dimension_numbers = #tpu.dot_dimension_numbers<[1], [1], [0], [0], [0, 0, 1, 0], [], []>} : vector<16x8xf32>, vector<16x8xf32>, vector<16x16xf32> -> vector<16x16xf32>
    %246 = vector.extract_strided_slice %239 {offsets = [0, 0], sizes = [16, 8], strides = [1, 1]} : vector<16x32xf32> to vector<16x8xf32>
    %247 = vector.extract_strided_slice %227 {offsets = [0, 0], sizes = [16, 8], strides = [1, 1]} : vector<16x32xf32> to vector<16x8xf32>
    %cst_117 = arith.constant dense<0.000000e+00> : vector<16x16xf32>
    %248 = tpu.matmul %246, %247, %cst_117 {dimension_numbers = #tpu.dot_dimension_numbers<[1], [1], [0], [0], [0, 0, 1, 0], [], []>} : vector<16x8xf32>, vector<16x8xf32>, vector<16x16xf32> -> vector<16x16xf32>
    %249 = vector.shape_cast %248 : vector<16x16xf32> to vector<16x1x16xf32>
    %250 = vector.broadcast %249 : vector<16x1x16xf32> to vector<16x16x16xf32>
    %251 = arith.mulf %250, %10 : vector<16x16x16xf32>
    %cst_118 = arith.constant dense<0.000000e+00> : vector<16x16xf32>
    %252 = vector.multi_reduction <add>, %251, %cst_118 [2] : vector<16x16x16xf32> to vector<16x16xf32>
    %253 = arith.addf %245, %252 : vector<16x16xf32>
    %254 = arith.addf %253, %9 : vector<16x16xf32>
    %cst_119 = arith.constant dense<0xFF800000> : vector<16xf32>
    %255 = vector.multi_reduction <maximumf>, %254, %cst_119 [1] : vector<16x16xf32> to vector<16xf32>
    %256 = vector.shape_cast %255 : vector<16xf32> to vector<16x1xf32>
    %257 = vector.broadcast %256 : vector<16x1xf32> to vector<16x16xf32>
    %258 = arith.subf %254, %257 : vector<16x16xf32>
    %259 = math.exp %258 : vector<16x16xf32>
    %cst_120 = arith.constant dense<0.000000e+00> : vector<16xf32>
    %260 = vector.multi_reduction <add>, %259, %cst_120 [1] : vector<16x16xf32> to vector<16xf32>
    %261 = vector.shape_cast %260 : vector<16xf32> to vector<16x1xf32>
    %262 = tpu.reciprocal %261 {approx = true} : vector<16x1xf32> -> vector<16x1xf32>
    %263 = vector.broadcast %262 : vector<16x1xf32> to vector<16x16xf32>
    %264 = arith.mulf %259, %263 : vector<16x16xf32>
    %265 = vector.extract_strided_slice %224 {offsets = [0, 0], sizes = [16, 8], strides = [1, 1]} : vector<16x32xf32> to vector<16x8xf32>
    %cst_121 = arith.constant dense<0.000000e+00> : vector<16x8xf32>
    %266 = tpu.matmul %264, %265, %cst_121 {dimension_numbers = #tpu.dot_dimension_numbers<[1], [0], [0], [1], [0, 0, 1, 1], [], []>} : vector<16x16xf32>, vector<16x8xf32>, vector<16x8xf32> -> vector<16x8xf32>
    %267 = vector.extract_strided_slice %241 {offsets = [0, 0], sizes = [8, 32], strides = [1, 1]} : vector<32x32xf32> to vector<8x32xf32>
    %cst_122 = arith.constant dense<0.000000e+00> : vector<16x32xf32>
    %268 = tpu.matmul %266, %267, %cst_122 {dimension_numbers = #tpu.dot_dimension_numbers<[1], [0], [0], [1], [0, 0, 1, 1], [], []>} : vector<16x8xf32>, vector<8x32xf32>, vector<16x32xf32> -> vector<16x32xf32>
    %269 = arith.addf %242, %268 : vector<16x32xf32>
    %270 = vector.extract_strided_slice %233 {offsets = [0, 8], sizes = [16, 8], strides = [1, 1]} : vector<16x32xf32> to vector<16x8xf32>
    %271 = vector.extract_strided_slice %223 {offsets = [0, 8], sizes = [16, 8], strides = [1, 1]} : vector<16x32xf32> to vector<16x8xf32>
    %cst_123 = arith.constant dense<0.000000e+00> : vector<16x16xf32>
    %272 = tpu.matmul %270, %271, %cst_123 {dimension_numbers = #tpu.dot_dimension_numbers<[1], [1], [0], [0], [0, 0, 1, 0], [], []>} : vector<16x8xf32>, vector<16x8xf32>, vector<16x16xf32> -> vector<16x16xf32>
    %273 = vector.extract_strided_slice %239 {offsets = [0, 8], sizes = [16, 8], strides = [1, 1]} : vector<16x32xf32> to vector<16x8xf32>
    %274 = vector.extract_strided_slice %227 {offsets = [0, 8], sizes = [16, 8], strides = [1, 1]} : vector<16x32xf32> to vector<16x8xf32>
    %cst_124 = arith.constant dense<0.000000e+00> : vector<16x16xf32>
    %275 = tpu.matmul %273, %274, %cst_124 {dimension_numbers = #tpu.dot_dimension_numbers<[1], [1], [0], [0], [0, 0, 1, 0], [], []>} : vector<16x8xf32>, vector<16x8xf32>, vector<16x16xf32> -> vector<16x16xf32>
    %276 = vector.shape_cast %275 : vector<16x16xf32> to vector<16x1x16xf32>
    %277 = vector.broadcast %276 : vector<16x1x16xf32> to vector<16x16x16xf32>
    %278 = arith.mulf %277, %10 : vector<16x16x16xf32>
    %cst_125 = arith.constant dense<0.000000e+00> : vector<16x16xf32>
    %279 = vector.multi_reduction <add>, %278, %cst_125 [2] : vector<16x16x16xf32> to vector<16x16xf32>
    %280 = arith.addf %272, %279 : vector<16x16xf32>
    %281 = arith.addf %280, %9 : vector<16x16xf32>
    %cst_126 = arith.constant dense<0xFF800000> : vector<16xf32>
    %282 = vector.multi_reduction <maximumf>, %281, %cst_126 [1] : vector<16x16xf32> to vector<16xf32>
    %283 = vector.shape_cast %282 : vector<16xf32> to vector<16x1xf32>
    %284 = vector.broadcast %283 : vector<16x1xf32> to vector<16x16xf32>
    %285 = arith.subf %281, %284 : vector<16x16xf32>
    %286 = math.exp %285 : vector<16x16xf32>
    %cst_127 = arith.constant dense<0.000000e+00> : vector<16xf32>
    %287 = vector.multi_reduction <add>, %286, %cst_127 [1] : vector<16x16xf32> to vector<16xf32>
    %288 = vector.shape_cast %287 : vector<16xf32> to vector<16x1xf32>
    %289 = tpu.reciprocal %288 {approx = true} : vector<16x1xf32> -> vector<16x1xf32>
    %290 = vector.broadcast %289 : vector<16x1xf32> to vector<16x16xf32>
    %291 = arith.mulf %286, %290 : vector<16x16xf32>
    %292 = vector.extract_strided_slice %224 {offsets = [0, 8], sizes = [16, 8], strides = [1, 1]} : vector<16x32xf32> to vector<16x8xf32>
    %cst_128 = arith.constant dense<0.000000e+00> : vector<16x8xf32>
    %293 = tpu.matmul %291, %292, %cst_128 {dimension_numbers = #tpu.dot_dimension_numbers<[1], [0], [0], [1], [0, 0, 1, 1], [], []>} : vector<16x16xf32>, vector<16x8xf32>, vector<16x8xf32> -> vector<16x8xf32>
    %294 = vector.extract_strided_slice %241 {offsets = [8, 0], sizes = [8, 32], strides = [1, 1]} : vector<32x32xf32> to vector<8x32xf32>
    %cst_129 = arith.constant dense<0.000000e+00> : vector<16x32xf32>
    %295 = tpu.matmul %293, %294, %cst_129 {dimension_numbers = #tpu.dot_dimension_numbers<[1], [0], [0], [1], [0, 0, 1, 1], [], []>} : vector<16x8xf32>, vector<8x32xf32>, vector<16x32xf32> -> vector<16x32xf32>
    %296 = arith.addf %269, %295 : vector<16x32xf32>
    %297 = vector.extract_strided_slice %233 {offsets = [0, 16], sizes = [16, 8], strides = [1, 1]} : vector<16x32xf32> to vector<16x8xf32>
    %298 = vector.extract_strided_slice %223 {offsets = [0, 16], sizes = [16, 8], strides = [1, 1]} : vector<16x32xf32> to vector<16x8xf32>
    %cst_130 = arith.constant dense<0.000000e+00> : vector<16x16xf32>
    %299 = tpu.matmul %297, %298, %cst_130 {dimension_numbers = #tpu.dot_dimension_numbers<[1], [1], [0], [0], [0, 0, 1, 0], [], []>} : vector<16x8xf32>, vector<16x8xf32>, vector<16x16xf32> -> vector<16x16xf32>
    %300 = vector.extract_strided_slice %239 {offsets = [0, 16], sizes = [16, 8], strides = [1, 1]} : vector<16x32xf32> to vector<16x8xf32>
    %301 = vector.extract_strided_slice %227 {offsets = [0, 16], sizes = [16, 8], strides = [1, 1]} : vector<16x32xf32> to vector<16x8xf32>
    %cst_131 = arith.constant dense<0.000000e+00> : vector<16x16xf32>
    %302 = tpu.matmul %300, %301, %cst_131 {dimension_numbers = #tpu.dot_dimension_numbers<[1], [1], [0], [0], [0, 0, 1, 0], [], []>} : vector<16x8xf32>, vector<16x8xf32>, vector<16x16xf32> -> vector<16x16xf32>
    %303 = vector.shape_cast %302 : vector<16x16xf32> to vector<16x1x16xf32>
    %304 = vector.broadcast %303 : vector<16x1x16xf32> to vector<16x16x16xf32>
    %305 = arith.mulf %304, %10 : vector<16x16x16xf32>
    %cst_132 = arith.constant dense<0.000000e+00> : vector<16x16xf32>
    %306 = vector.multi_reduction <add>, %305, %cst_132 [2] : vector<16x16x16xf32> to vector<16x16xf32>
    %307 = arith.addf %299, %306 : vector<16x16xf32>
    %308 = arith.addf %307, %9 : vector<16x16xf32>
    %cst_133 = arith.constant dense<0xFF800000> : vector<16xf32>
    %309 = vector.multi_reduction <maximumf>, %308, %cst_133 [1] : vector<16x16xf32> to vector<16xf32>
    %310 = vector.shape_cast %309 : vector<16xf32> to vector<16x1xf32>
    %311 = vector.broadcast %310 : vector<16x1xf32> to vector<16x16xf32>
    %312 = arith.subf %308, %311 : vector<16x16xf32>
    %313 = math.exp %312 : vector<16x16xf32>
    %cst_134 = arith.constant dense<0.000000e+00> : vector<16xf32>
    %314 = vector.multi_reduction <add>, %313, %cst_134 [1] : vector<16x16xf32> to vector<16xf32>
    %315 = vector.shape_cast %314 : vector<16xf32> to vector<16x1xf32>
    %316 = tpu.reciprocal %315 {approx = true} : vector<16x1xf32> -> vector<16x1xf32>
    %317 = vector.broadcast %316 : vector<16x1xf32> to vector<16x16xf32>
    %318 = arith.mulf %313, %317 : vector<16x16xf32>
    %319 = vector.extract_strided_slice %224 {offsets = [0, 16], sizes = [16, 8], strides = [1, 1]} : vector<16x32xf32> to vector<16x8xf32>
    %cst_135 = arith.constant dense<0.000000e+00> : vector<16x8xf32>
    %320 = tpu.matmul %318, %319, %cst_135 {dimension_numbers = #tpu.dot_dimension_numbers<[1], [0], [0], [1], [0, 0, 1, 1], [], []>} : vector<16x16xf32>, vector<16x8xf32>, vector<16x8xf32> -> vector<16x8xf32>
    %321 = vector.extract_strided_slice %241 {offsets = [16, 0], sizes = [8, 32], strides = [1, 1]} : vector<32x32xf32> to vector<8x32xf32>
    %cst_136 = arith.constant dense<0.000000e+00> : vector<16x32xf32>
    %322 = tpu.matmul %320, %321, %cst_136 {dimension_numbers = #tpu.dot_dimension_numbers<[1], [0], [0], [1], [0, 0, 1, 1], [], []>} : vector<16x8xf32>, vector<8x32xf32>, vector<16x32xf32> -> vector<16x32xf32>
    %323 = arith.addf %296, %322 : vector<16x32xf32>
    %324 = vector.extract_strided_slice %233 {offsets = [0, 24], sizes = [16, 8], strides = [1, 1]} : vector<16x32xf32> to vector<16x8xf32>
    %325 = vector.extract_strided_slice %223 {offsets = [0, 24], sizes = [16, 8], strides = [1, 1]} : vector<16x32xf32> to vector<16x8xf32>
    %cst_137 = arith.constant dense<0.000000e+00> : vector<16x16xf32>
    %326 = tpu.matmul %324, %325, %cst_137 {dimension_numbers = #tpu.dot_dimension_numbers<[1], [1], [0], [0], [0, 0, 1, 0], [], []>} : vector<16x8xf32>, vector<16x8xf32>, vector<16x16xf32> -> vector<16x16xf32>
    %327 = vector.extract_strided_slice %239 {offsets = [0, 24], sizes = [16, 8], strides = [1, 1]} : vector<16x32xf32> to vector<16x8xf32>
    %328 = vector.extract_strided_slice %227 {offsets = [0, 24], sizes = [16, 8], strides = [1, 1]} : vector<16x32xf32> to vector<16x8xf32>
    %cst_138 = arith.constant dense<0.000000e+00> : vector<16x16xf32>
    %329 = tpu.matmul %327, %328, %cst_138 {dimension_numbers = #tpu.dot_dimension_numbers<[1], [1], [0], [0], [0, 0, 1, 0], [], []>} : vector<16x8xf32>, vector<16x8xf32>, vector<16x16xf32> -> vector<16x16xf32>
    %330 = vector.shape_cast %329 : vector<16x16xf32> to vector<16x1x16xf32>
    %331 = vector.broadcast %330 : vector<16x1x16xf32> to vector<16x16x16xf32>
    %332 = arith.mulf %331, %10 : vector<16x16x16xf32>
    %cst_139 = arith.constant dense<0.000000e+00> : vector<16x16xf32>
    %333 = vector.multi_reduction <add>, %332, %cst_139 [2] : vector<16x16x16xf32> to vector<16x16xf32>
    %334 = arith.addf %326, %333 : vector<16x16xf32>
    %335 = arith.addf %334, %9 : vector<16x16xf32>
    %cst_140 = arith.constant dense<0xFF800000> : vector<16xf32>
    %336 = vector.multi_reduction <maximumf>, %335, %cst_140 [1] : vector<16x16xf32> to vector<16xf32>
    %337 = vector.shape_cast %336 : vector<16xf32> to vector<16x1xf32>
    %338 = vector.broadcast %337 : vector<16x1xf32> to vector<16x16xf32>
    %339 = arith.subf %335, %338 : vector<16x16xf32>
    %340 = math.exp %339 : vector<16x16xf32>
    %cst_141 = arith.constant dense<0.000000e+00> : vector<16xf32>
    %341 = vector.multi_reduction <add>, %340, %cst_141 [1] : vector<16x16xf32> to vector<16xf32>
    %342 = vector.shape_cast %341 : vector<16xf32> to vector<16x1xf32>
    %343 = tpu.reciprocal %342 {approx = true} : vector<16x1xf32> -> vector<16x1xf32>
    %344 = vector.broadcast %343 : vector<16x1xf32> to vector<16x16xf32>
    %345 = arith.mulf %340, %344 : vector<16x16xf32>
    %346 = vector.extract_strided_slice %224 {offsets = [0, 24], sizes = [16, 8], strides = [1, 1]} : vector<16x32xf32> to vector<16x8xf32>
    %cst_142 = arith.constant dense<0.000000e+00> : vector<16x8xf32>
    %347 = tpu.matmul %345, %346, %cst_142 {dimension_numbers = #tpu.dot_dimension_numbers<[1], [0], [0], [1], [0, 0, 1, 1], [], []>} : vector<16x16xf32>, vector<16x8xf32>, vector<16x8xf32> -> vector<16x8xf32>
    %348 = vector.extract_strided_slice %241 {offsets = [24, 0], sizes = [8, 32], strides = [1, 1]} : vector<32x32xf32> to vector<8x32xf32>
    %cst_143 = arith.constant dense<0.000000e+00> : vector<16x32xf32>
    %349 = tpu.matmul %347, %348, %cst_143 {dimension_numbers = #tpu.dot_dimension_numbers<[1], [0], [0], [1], [0, 0, 1, 1], [], []>} : vector<16x8xf32>, vector<8x32xf32>, vector<16x32xf32> -> vector<16x32xf32>
    %350 = arith.addf %323, %349 : vector<16x32xf32>
    %351 = arith.addf %350, %218 : vector<16x32xf32>
    %c1_144 = arith.constant 1 : index
    %c0_145 = arith.constant 0 : index
    %c0_146 = arith.constant 0 : index
    %352 = vector.load %arg11[%c1_144, %c0_145, %c0_146] : memref<2x1x32xf32, #tpu.memory_space<vmem>>, vector<1x1x32xf32>
    %353 = vector.shape_cast %352 : vector<1x1x32xf32> to vector<1x32xf32>
    %c1_147 = arith.constant 1 : index
    %c0_148 = arith.constant 0 : index
    %c0_149 = arith.constant 0 : index
    %354 = vector.load %arg12[%c1_147, %c0_148, %c0_149] : memref<2x1x32xf32, #tpu.memory_space<vmem>>, vector<1x1x32xf32>
    %355 = vector.shape_cast %354 : vector<1x1x32xf32> to vector<1x32xf32>
    %cst_150 = arith.constant dense<0.000000e+00> : vector<16xf32>
    %356 = vector.multi_reduction <add>, %351, %cst_150 [1] : vector<16x32xf32> to vector<16xf32>
    %357 = vector.shape_cast %356 : vector<16xf32> to vector<16x1xf32>
    %cst_151 = arith.constant 3.200000e+01 : f32
    %358 = vector.broadcast %cst_151 : f32 to vector<16x1xf32>
    %359 = arith.divf %357, %358 : vector<16x1xf32>
    %360 = vector.broadcast %359 : vector<16x1xf32> to vector<16x32xf32>
    %361 = arith.subf %351, %360 : vector<16x32xf32>
    %362 = arith.mulf %361, %361 : vector<16x32xf32>
    %cst_152 = arith.constant dense<0.000000e+00> : vector<16xf32>
    %363 = vector.multi_reduction <add>, %362, %cst_152 [1] : vector<16x32xf32> to vector<16xf32>
    %364 = vector.shape_cast %363 : vector<16xf32> to vector<16x1xf32>
    %cst_153 = arith.constant 3.200000e+01 : f32
    %365 = vector.broadcast %cst_153 : f32 to vector<16x1xf32>
    %366 = arith.divf %364, %365 : vector<16x1xf32>
    %367 = vector.broadcast %359 : vector<16x1xf32> to vector<16x32xf32>
    %368 = arith.subf %351, %367 : vector<16x32xf32>
    %cst_154 = arith.constant 9.99999996E-13 : f32
    %369 = vector.broadcast %cst_154 : f32 to vector<16x1xf32>
    %370 = arith.addf %366, %369 : vector<16x1xf32>
    %371 = math.rsqrt %370 : vector<16x1xf32>
    %372 = vector.broadcast %371 : vector<16x1xf32> to vector<16x32xf32>
    %373 = arith.mulf %368, %372 : vector<16x32xf32>
    %374 = vector.broadcast %353 : vector<1x32xf32> to vector<16x32xf32>
    %375 = arith.mulf %373, %374 : vector<16x32xf32>
    %376 = vector.broadcast %355 : vector<1x32xf32> to vector<16x32xf32>
    %377 = arith.addf %375, %376 : vector<16x32xf32>
    %c1_155 = arith.constant 1 : index
    %c0_156 = arith.constant 0 : index
    %c0_157 = arith.constant 0 : index
    %378 = vector.load %arg13[%c1_155, %c0_156, %c0_157] : memref<2x32x64xf32, #tpu.memory_space<vmem>>, vector<1x32x64xf32>
    %379 = vector.shape_cast %378 : vector<1x32x64xf32> to vector<32x64xf32>
    %cst_158 = arith.constant dense<0.000000e+00> : vector<16x64xf32>
    %380 = tpu.matmul %377, %379, %cst_158 {dimension_numbers = #tpu.dot_dimension_numbers<[1], [0], [0], [1], [0, 0, 1, 1], [], []>} : vector<16x32xf32>, vector<32x64xf32>, vector<16x64xf32> -> vector<16x64xf32>
    %c1_159 = arith.constant 1 : index
    %c0_160 = arith.constant 0 : index
    %c0_161 = arith.constant 0 : index
    %381 = vector.load %arg14[%c1_159, %c0_160, %c0_161] : memref<2x1x64xf32, #tpu.memory_space<vmem>>, vector<1x1x64xf32>
    %382 = vector.shape_cast %381 : vector<1x1x64xf32> to vector<1x64xf32>
    %383 = vector.broadcast %382 : vector<1x64xf32> to vector<16x64xf32>
    %384 = arith.addf %380, %383 : vector<16x64xf32>
    %cst_162 = arith.constant 5.000000e-01 : f32
    %385 = vector.broadcast %cst_162 : f32 to vector<16x64xf32>
    %386 = arith.mulf %385, %384 : vector<16x64xf32>
    %cst_163 = arith.constant 0.707106769 : f32
    %387 = vector.broadcast %cst_163 : f32 to vector<16x64xf32>
    %388 = arith.mulf %384, %387 : vector<16x64xf32>
    %389 = math.erf %388 : vector<16x64xf32>
    %cst_164 = arith.constant 1.000000e+00 : f32
    %390 = vector.broadcast %cst_164 : f32 to vector<16x64xf32>
    %391 = arith.addf %390, %389 : vector<16x64xf32>
    %392 = arith.mulf %386, %391 : vector<16x64xf32>
    %c1_165 = arith.constant 1 : index
    %c0_166 = arith.constant 0 : index
    %c0_167 = arith.constant 0 : index
    %393 = vector.load %arg15[%c1_165, %c0_166, %c0_167] : memref<2x64x32xf32, #tpu.memory_space<vmem>>, vector<1x64x32xf32>
    %394 = vector.shape_cast %393 : vector<1x64x32xf32> to vector<64x32xf32>
    %cst_168 = arith.constant dense<0.000000e+00> : vector<16x32xf32>
    %395 = tpu.matmul %392, %394, %cst_168 {dimension_numbers = #tpu.dot_dimension_numbers<[1], [0], [0], [1], [0, 0, 1, 1], [], []>} : vector<16x64xf32>, vector<64x32xf32>, vector<16x32xf32> -> vector<16x32xf32>
    %c1_169 = arith.constant 1 : index
    %c0_170 = arith.constant 0 : index
    %c0_171 = arith.constant 0 : index
    %396 = vector.load %arg16[%c1_169, %c0_170, %c0_171] : memref<2x1x32xf32, #tpu.memory_space<vmem>>, vector<1x1x32xf32>
    %397 = vector.shape_cast %396 : vector<1x1x32xf32> to vector<1x32xf32>
    %398 = vector.broadcast %397 : vector<1x32xf32> to vector<16x32xf32>
    %399 = arith.addf %395, %398 : vector<16x32xf32>
    %400 = arith.addf %399, %377 : vector<16x32xf32>
    %c1_172 = arith.constant 1 : index
    %c0_173 = arith.constant 0 : index
    %c0_174 = arith.constant 0 : index
    %401 = vector.load %arg17[%c1_172, %c0_173, %c0_174] : memref<2x1x32xf32, #tpu.memory_space<vmem>>, vector<1x1x32xf32>
    %402 = vector.shape_cast %401 : vector<1x1x32xf32> to vector<1x32xf32>
    %c1_175 = arith.constant 1 : index
    %c0_176 = arith.constant 0 : index
    %c0_177 = arith.constant 0 : index
    %403 = vector.load %arg18[%c1_175, %c0_176, %c0_177] : memref<2x1x32xf32, #tpu.memory_space<vmem>>, vector<1x1x32xf32>
    %404 = vector.shape_cast %403 : vector<1x1x32xf32> to vector<1x32xf32>
    %cst_178 = arith.constant dense<0.000000e+00> : vector<16xf32>
    %405 = vector.multi_reduction <add>, %400, %cst_178 [1] : vector<16x32xf32> to vector<16xf32>
    %406 = vector.shape_cast %405 : vector<16xf32> to vector<16x1xf32>
    %cst_179 = arith.constant 3.200000e+01 : f32
    %407 = vector.broadcast %cst_179 : f32 to vector<16x1xf32>
    %408 = arith.divf %406, %407 : vector<16x1xf32>
    %409 = vector.broadcast %408 : vector<16x1xf32> to vector<16x32xf32>
    %410 = arith.subf %400, %409 : vector<16x32xf32>
    %411 = arith.mulf %410, %410 : vector<16x32xf32>
    %cst_180 = arith.constant dense<0.000000e+00> : vector<16xf32>
    %412 = vector.multi_reduction <add>, %411, %cst_180 [1] : vector<16x32xf32> to vector<16xf32>
    %413 = vector.shape_cast %412 : vector<16xf32> to vector<16x1xf32>
    %cst_181 = arith.constant 3.200000e+01 : f32
    %414 = vector.broadcast %cst_181 : f32 to vector<16x1xf32>
    %415 = arith.divf %413, %414 : vector<16x1xf32>
    %416 = vector.broadcast %408 : vector<16x1xf32> to vector<16x32xf32>
    %417 = arith.subf %400, %416 : vector<16x32xf32>
    %cst_182 = arith.constant 9.99999996E-13 : f32
    %418 = vector.broadcast %cst_182 : f32 to vector<16x1xf32>
    %419 = arith.addf %415, %418 : vector<16x1xf32>
    %420 = math.rsqrt %419 : vector<16x1xf32>
    %421 = vector.broadcast %420 : vector<16x1xf32> to vector<16x32xf32>
    %422 = arith.mulf %417, %421 : vector<16x32xf32>
    %423 = vector.broadcast %402 : vector<1x32xf32> to vector<16x32xf32>
    %424 = arith.mulf %422, %423 : vector<16x32xf32>
    %425 = vector.broadcast %404 : vector<1x32xf32> to vector<16x32xf32>
    %426 = arith.addf %424, %425 : vector<16x32xf32>
    %c0_183 = arith.constant 0 : index
    %c0_184 = arith.constant 0 : index
    %427 = vector.load %arg5[%c0_183, %c0_184] : memref<2x16xf32, #tpu.memory_space<vmem>>, vector<2x16xf32>
    %cst_185 = arith.constant dense<0.000000e+00> : vector<2x32xf32>
    %428 = tpu.matmul %427, %426, %cst_185 {dimension_numbers = #tpu.dot_dimension_numbers<[1], [0], [0], [1], [0, 0, 1, 1], [], []>} : vector<2x16xf32>, vector<16x32xf32>, vector<2x32xf32> -> vector<2x32xf32>
    %c0_186 = arith.constant 0 : index
    %c0_187 = arith.constant 0 : index
    %429 = vector.load %arg19[%c0_186, %c0_187] : memref<32x6xf32, #tpu.memory_space<vmem>>, vector<32x6xf32>
    %cst_188 = arith.constant dense<0.000000e+00> : vector<2x6xf32>
    %430 = tpu.matmul %428, %429, %cst_188 {dimension_numbers = #tpu.dot_dimension_numbers<[1], [0], [0], [1], [0, 0, 1, 1], [], []>} : vector<2x32xf32>, vector<32x6xf32>, vector<2x6xf32> -> vector<2x6xf32>
    %c0_189 = arith.constant 0 : index
    %c0_190 = arith.constant 0 : index
    %431 = vector.load %arg20[%c0_189, %c0_190] : memref<1x6xf32, #tpu.memory_space<vmem>>, vector<1x6xf32>
    %432 = vector.broadcast %431 : vector<1x6xf32> to vector<2x6xf32>
    %433 = arith.addf %430, %432 : vector<2x6xf32>
    %c0_191 = arith.constant 0 : index
    %c0_192 = arith.constant 0 : index
    %434 = vector.load %arg21[%c0_191, %c0_192] : memref<2x6xf32, #tpu.memory_space<vmem>>, vector<2x6xf32>
    tpu.vector_store %arg21[%c0_191, %c0_192], %433 {strides = array<i32>} : memref<2x6xf32, #tpu.memory_space<vmem>>, vector<2x6xf32>,
    return
  }
}

</mosaic_0001>

<bundles_post_ra>
// kernel: forward.1
= control target key start
LH: loop header
LB: loop body
LE: loop exit
PB: predicated region body
PF: predicated region fallthrough
CT: control target
= control target key end

     0   :  { %s12740_s0 = inlined_call_operand.vmem [shape: s32[16,1], index: 0, kind: input, shape index: {}]   ;;  %s12741_s1 = inlined_call_operand.vmem [shape: f32[128,32], index: 1, kind: input, shape index: {}]   ;;  %s12742_s2 = inlined_call_operand.vmem [shape: f32[16,32], index: 2, kind: input, shape index: {}]   ;;  %s12743_s3 = inlined_call_operand.vmem [shape: f32[16,16], index: 3, kind: input, shape index: {}]   ;;  %s12744_s4 = inlined_call_operand.vmem [shape: f32[16,16,16], index: 4, kind: input, shape index: {}]   ;;  %s12745_s5 = inlined_call_operand.vmem [shape: f32[2,16], index: 5, kind: input, shape index: {}]   ;;  %s12746_s6 = inlined_call_operand.vmem [shape: f32[2,32,96], index: 6, kind: input, shape index: {}]   ;;  %s12747_s7 = inlined_call_operand.vmem [shape: f32[2,32,32], index: 7, kind: input, shape index: {}]   ;;  %s12748_s8 = inlined_call_operand.vmem [shape: f32[2,32,32], index: 8, kind: input, shape index: {}]   ;;  %s12749_s9 = inlined_call_operand.vmem [shape: f32[2,1,32], index: 9, kind: input, shape index: {}]   ;;  %s12750_s10 = inlined_call_operand.vmem [shape: f32[2,1,32], index: 10, kind: input, shape index: {}]   ;;  %s12751_s11 = inlined_call_operand.vmem [shape: f32[2,1,32], index: 11, kind: input, shape index: {}]   ;;  %s12752_s12 = inlined_call_operand.vmem [shape: f32[2,1,32], index: 12, kind: input, shape index: {}]   ;;  %s12753_s13 = inlined_call_operand.vmem [shape: f32[2,32,64], index: 13, kind: input, shape index: {}]   ;;  %s12754_s14 = inlined_call_operand.vmem [shape: f32[2,1,64], index: 14, kind: input, shape index: {}]   ;;  %s12755_s15 = inlined_call_operand.vmem [shape: f32[2,64,32], index: 15, kind: input, shape index: {}]   ;;  %s12756_s16 = inlined_call_operand.vmem [shape: f32[2,1,32], index: 16, kind: input, shape index: {}]   ;;  %s12757_s17 = inlined_call_operand.vmem [shape: f32[2,1,32], index: 17, kind: input, shape index: {}]   ;;  %s12758_s18 = inlined_call_operand.vmem [shape: f32[2,1,32], index: 18, kind: input, shape index: {}]   ;;  %s12759_s19 = inlined_call_operand.vmem [shape: f32[32,6], index: 19, kind: input, shape index: {}]   ;;  %s12760_s20 = inlined_call_operand.vmem [shape: f32[1,6], index: 20, kind: input, shape index: {}]   ;;  %s12761_s21 = inlined_call_operand.hbm [shape: f32[2,6], index: 21, kind: output, shape index: {}]  }
   0x1   :  { %12851 = sst [smem:[#allocation25_spill]] %s12740_s0 }
   0x2   :  { %12852 = sst [smem:[#allocation26_spill]] %s12741_s1 }
   0x3   :  { %12853 = sst [smem:[#allocation27_spill]] %s12742_s2 }
   0x4   :  { %12854 = sst [smem:[#allocation28_spill]] %s12743_s3 }
   0x5   :  { %12855 = sst [smem:[#allocation29_spill]] %s12744_s4 }
   0x6   :  { %12856 = sst [smem:[#allocation30_spill]] %s12745_s5 }
   0x7   :  { %12857 = sst [smem:[#allocation31_spill]] %s12756_s16 }
   0x8   :  { %s12858_s26 = sld [smem:[#allocation25_spill]]  ;;  %s12859_s16 = sld [smem:[#allocation26_spill]]  ;;  %v9711_v2 = vmov 0  }
   0x9   :  { %9384 = vset.pattern.permute.xlu0 %v9711_v2 }
   0xe   :  { %v69_v0 = vld [vmem:[%s12858_s26] sm:$0xff]  ;;  %v86_v3 = vld [vmem:[%s12859_s16 + $0x8] sm:$0xff]  ;;  %v87_v4 = vld [vmem:[%s12859_s16 + $0x10] sm:$0xff] }
   0xf   :  { %v85_v1 = vld [vmem:[%s12859_s16] sm:$0xff]  ;;  %v88_v5 = vld [vmem:[%s12859_s16 + $0x18] sm:$0xff]  ;;  %74 = vperm.xlu0 %9384, %v69_v0   ;;  %v70_v8 = vld [vmem:[%s12858_s26 + $0x8] sm:$0xff] }
  0x10   :  { %v9105_v6 = vpack.c.bf16 %v86_v3, %v85_v1  ;;  %v9109_v7 = vpack.c.bf16 %v88_v5, %v87_v4  ;;  %v89_v9 = vld [vmem:[%s12859_s16 + $0x20] sm:$0xff]  ;;  %v90_v10 = vld [vmem:[%s12859_s16 + $0x28] sm:$0xff]  ;;  %v91_v12 = vld [vmem:[%s12859_s16 + $0x30] sm:$0xff] }
  0x11   :  { %v9113_v11 = vpack.c.bf16 %v90_v10, %v89_v9  ;;  %v92_v13 = vld [vmem:[%s12859_s16 + $0x38] sm:$0xff] }
  0x12   :  { %9106 = vmatprep.subr.bf16.mxu0 %v9105_v6 }
  0x13   :  { %9108 = vmatpush3.bf16.msra.mxu0 %v9105_v6  ;;  %77 = vperm.xlu0 %9384, %v70_v8  }
  0x14   :  { %9110 = vmatprep.subr.bf16.mxu0 %v9109_v7 }
  0x15   :  { %26 = vsyncpa [#allocation3], 0  ;;  %v212_v14 = vld [vmem:[%s12746_s6] sm:$0xff]  ;;  %v213_v15 = vld [vmem:[%s12746_s6 + $0x8] sm:$0xff]  ;;  %v9117_v20 = vpack.c.bf16 %v92_v13, %v91_v12  ;;  %v71_v33 = vlaneseq  ;;  %v9712_v36 = vmov 1.0   ;;  %vm216_vm2 = vcmask 261120  }
  0x16   :  { %v214_v16 = vld [vmem:[%s12746_s6 + $0x10] sm:$0xff]  ;;  %v9137_v17 = vpack.c.bf16 %v213_v15, %v212_v14  ;;  %v215_v18 = vld [vmem:[%s12746_s6 + $0x18] sm:$0xff]  ;;  %v93_v21 = vld [vmem:[%s12859_s16 + $0x40] sm:$0xff]  ;;  %s12862_s30 = sld [smem:[#allocation27_spill]]  ;;  %vm409_vm3 = vcmask 64512   ;;  %s9713_s2 = smov 96  }
  0x17   :  { %9112 = vmatpush3.bf16.msra.mxu0 %v9109_v7  ;;  %v9141_v19 = vpack.c.bf16 %v215_v18, %v214_v16  ;;  %v94_v22 = vld [vmem:[%s12859_s16 + $0x48] sm:$0xff]  ;;  %v95_v24 = vld [vmem:[%s12859_s16 + $0x50] sm:$0xff]  ;;  %v96_v25 = vld [vmem:[%s12859_s16 + $0x58] sm:$0xff]  ;;  %v9906_v34 = vand.u32 127, %v71_v33  ;;  %v9714_v6 = vmov 1966171168  }
  0x18   :  { %9114 = vmatprep.subr.bf16.mxu0 %v9113_v11  ;;  %9138 = vmatprep.subr.bf16.mxu1 %v9137_v17  ;;  %v9121_v23 = vpack.c.bf16 %v94_v22, %v93_v21  ;;  %v9125_v26 = vpack.c.bf16 %v96_v25, %v95_v24  ;;  %v97_v27 = vld [vmem:[%s12859_s16 + $0x60] sm:$0xff]  ;;  %v98_v28 = vld [vmem:[%s12859_s16 + $0x68] sm:$0xff]  ;;  %v99_v30 = vld [vmem:[%s12859_s16 + $0x70] sm:$0xff]  ;;  %v501_v7 = vunpack.c.l.s4 %v9714_v6  ;;  %v9981_v9 = vshrl.u32 %v71_v33, 7  ;;  %s12865_s3 = sld [smem:[#allocation29_spill]]  ;;  %s12881_s27 = sld [smem:[#allocation28_spill]] }
  0x19   :  { %9140 = vmatpush3.bf16.msra.mxu1 %v9137_v17  ;;  %v9129_v29 = vpack.c.bf16 %v98_v28, %v97_v27  ;;  %v100_v31 = vld [vmem:[%s12859_s16 + $0x78] sm:$0xff]  ;;  %v298_v38 = vld [vmem:[%s12747_s7] sm:$0xff]  ;;  %v299_v39 = vld [vmem:[%s12747_s7 + $0x8] sm:$0xff]  ;;  %vm709_vm5 = vcmask 130048   ;;  %vm853_vm6 = vcmask 130112   ;;  %vm990_vm7 = vcmask 1041409  }
  0x1a   :  { %9142 = vmatprep.subr.bf16.mxu1 %v9141_v19  ;;  %v9133_v32 = vpack.c.bf16 %v100_v31, %v99_v30  ;;  %v9145_v40 = vpack.c.bf16 %v299_v39, %v298_v38  ;;  %v300_v41 = vld [vmem:[%s12747_s7 + $0x10] sm:$0xff]  ;;  %v301_v42 = vld [vmem:[%s12747_s7 + $0x18] sm:$0xff]  ;;  %v8379_v48 = vld [vmem:[%s12749_s9] ss:$0 sm:$0xff]  ;;  %v502_v8 = vunpack.c.0.s8 %v501_v7  ;;  %v9989_v15 = vsub.s32 0, %v9981_v9  ;;  %s9715_s26 = smov 120  }
  0x1b   :  { %9116 = vmatpush3.bf16.msra.mxu0 %v9113_v11  ;;  %v9149_v45 = vpack.c.bf16 %v301_v42, %v300_v41  ;;  %v8380_v49 = vld [vmem:[%s12750_s10] ss:$0 sm:$0xff]  ;;  %vm9954_vm4 = vmpackc.low %vm409_vm3, %vm409_vm3  ;;  %vm992_vm8 = vcmask 1042434   ;;  %vm994_vm9 = vcmask 1043459   ;;  %vm996_vm10 = vcmask 1044484   ;;  %s9716_s0 = smov 88  }
  0x1c   :  { %9118 = vmatprep.subr.bf16.mxu0 %v9117_v20  ;;  %v176_v46 = vld [vmem:[%s12862_s30] sm:$0xff]  ;;  %v177_v47 = vld [vmem:[%s12862_s30 + $0x8] sm:$0xff]  ;;  %v9984_v10 = vsub.s32 %v502_v8, %v9981_v9  ;;  %vm998_vm11 = vcmask 1045509   ;;  %vm1002_vm12 = vcmask 1047559   ;;  %vm1000_vm13 = vcmask 1046534   ;;  %s12812_s4 = smov 64  }
  0x1d   :  { %9144 = vmatpush3.bf16.msra.mxu1 %v9141_v19  ;;  %s12811_s5 = smov 56   ;;  %s12809_s22 = smov 112   ;;  %vm4080_vm14 = vcmask 523264   ;;  %vm9726_vm15 = vmmov 0  }
  0x1e   :  { %9146 = vmatprep.subr.bf16.mxu1 %v9145_v40  ;;  %v9999_v21 = vld [vmem:[%s12865_s3 + $0x88] sm:$0xff]  ;;  %v10004_v22 = vld [vmem:[%s12865_s3 + $0x80] sm:$0xff]  ;;  %v10037_v38 = vld [vmem:[%s12865_s3 + $0x98] sm:$0xff]  ;;  %s12808_s23 = smov 80   ;;  %s12805_s1 = smov 104  }
  0x1f   :  { %9120 = vmatpush3.bf16.msra.mxu0 %v9117_v20  ;;  %v10011_v25 = vld [vmem:[%s12865_s3 + $0x8] sm:$0xff]  ;;  %s12807_s24 = smov 48   ;;  %s12804_s16 = smov 72  }
  0x20   :  { %9122 = vmatprep.subr.bf16.mxu0 %v9121_v23  ;;  %s12803_s29 = smov 40   ;;  %s12975_s28 = smov 112  }
  0x23   :  { %9124 = vmatpush3.bf16.msra.mxu0 %v9121_v23 }
  0x24   :  { %9126 = vmatprep.subr.bf16.mxu0 %v9125_v26 }
  0x27   :  { %9128 = vmatpush3.bf16.msra.mxu0 %v9125_v26  ;;  %v10016_v26 = vld [vmem:[%s12865_s3] sm:$0xff] }
  0x28   :  { %9130 = vmatprep.subr.bf16.mxu0 %v9129_v29 }
  0x2b   :  { %9132 = vmatpush3.bf16.msra.mxu0 %v9129_v29 }
  0x2c   :  { %9134 = vmatprep.subr.bf16.mxu0 %v9133_v32 }
  0x2f   :  { %9136 = vmatpush3.bf16.msra.mxu0 %v9133_v32 }
  0x8e   :  { %v75_v35 = vpop.permute.xlu0 %74 }
  0x8f   :  { %vm79_vm0 = vcmp.eq.s32.totalorder %v9906_v34, %v75_v35 }
  0x90   :  { %8772 = vmatprep.mubr.msk.f32.mxu0 %vm79_vm0, %v9712_v36  ;;  %vm8355_vm0 = vcmask 41984  }
  0x92   :  { %v78_v37 = vpop.permute.xlu0 %77 }
  0x93   :  { %vm80_vm1 = vcmp.eq.s32.totalorder %v9906_v34, %v78_v37  ;;  %v10032_v37 = vld [vmem:[%s12865_s3 + $0x90] sm:$0xff] }
  0x94   :  { %8773 = vmatmul.mubr.msk.f32.vlgmr.msra.gmra.mrb[0].mxu0 %vm80_vm1, %v9712_v36 }
 0x167   :  { %v9922_v43 = vpop.f32.mrb[0].mxu0 }
 0x168   :  { %12860 = vst [vmem:[#allocation5_spill] sm:$0xff] %v9922_v43  ;;  %v9924_v44 = vpop.f32.mrb[1].mxu0 }
 0x169   :  { %12861 = vst [vmem:[#allocation6_spill] sm:$0xff] %v9924_v44  ;;  %8783 = vmatprep.mubr.msk.f32.mxu1 %vm216_vm2, %v9924_v44 }
 0x16a   :  { %8784 = vmatmul.mubr.msk.f32.vlgmr.msra.gmra.mrb[0].mxu1 %vm216_vm2, %v9922_v43 }
 0x16b   :  { %9148 = vmatpush3.bf16.msra.mxu1 %v9145_v40  ;;  %8794 = vmatprep.mubr.msk.f32.mxu1 %vm216_vm2, %v176_v46 }
 0x16c   :  { %9150 = vmatprep.subr.bf16.mxu1 %v9149_v45 }
 0x16f   :  { %9152 = vmatpush3.bf16.msra.mxu1 %v9149_v45 }
 0x172   :  { %8795 = vmatmul.mubr.msk.f32.vlgmr.msra.gmra.mrb[2].mxu1 %vm216_vm2, %v177_v47 }
 0x23d   :  { %v8785_v50 = vpop.f32.mrb[0].mxu1 }
 0x23e   :  { %v289_v51 = vpop.f32.mrb[1].mxu1  ;;  %v391_v52 = vadd.f32 %v8785_v50, %v8379_v48  ;;  %v402_v61 = vadd.f32 %v8785_v50, %v8380_v49 }
 0x23f   :  { %v9944_v53 = vpack.i.bf16 %v8785_v50, %v289_v51  ;;  %v401_v54 = vadd.f32 %v8380_v49, %v289_v51  ;;  %v390_v62 = vadd.f32 %v8379_v48, %v289_v51  ;;  %v10051_v48 = vld [vmem:[%s12865_s3 + $0xa0] sm:$0xff]  ;;  %v10056_v49 = vld [vmem:[%s12865_s3 + $0xa8] sm:$0xff] }
 0x240   :  { %v9964_v63 = vmul.f32 0.35355338, %v402_v61  ;;  %v9976_v5 = vmul.f32 0.35355338, %v391_v52  ;;  %v10070_v61 = vld [vmem:[%s12865_s3 + $0xc0] sm:$0xff] }
 0x241   :  { %9386 = vrot.lane.b32.xlu1 %v9944_v53, %s9713_s2  ;;  %v9948_v55 = vmul.f32 0.35355338, %v401_v54  ;;  %v9966_v0 = vmul.f32 0.35355338, %v390_v62  ;;  %12866 = vst [vmem:[#allocation7_spill] sm:$0xff] %v10070_v61  ;;  %v10075_v62 = vld [vmem:[%s12865_s3 + $0xc8] sm:$0xff] }
 0x242   :  { %12867 = vst [vmem:[#allocation8_spill] sm:$0xff] %v10075_v62 }
 0x243   :  { %8801 = vmatprep.mubr.msk.f32.mxu1 %vm409_vm3, %v9948_v55 }
 0x245   :  { %v8796_v56 = vpop.f32.mrb[2].mxu1 }
 0x246   :  { %v374_v57 = vpop.f32.mrb[3].mxu1 }
 0x247   :  { %v9958_v59 = vpack.i.bf16 %v8796_v56, %v374_v57  ;;  %v9153_v60 = vpack.c.bf16 %v8796_v56, %v374_v57 }
 0x249   :  { %9155 = vmatprep.subr.msk.bf16.mxu1 %vm9954_vm4, %v9153_v60 }
 0x24a   :  { %9158 = vmatpush3.bf16.xpose.msk.msra.mxu1 %vm9954_vm4, %v9153_v60 }
 0x251   :  { %8802 = vmatmul.mubr.msk.f32.vlgmr.msra.gmra.mrb[4].mxu1 %vm409_vm3, %v9964_v63 }
 0x252   :  { %8808 = vmatprep.mubr.msk.f32.mxu1 %vm409_vm3, %v9966_v0 }
 0x2b3   :  { %v9387_v1 = vpop.permute.xlu1 %9386 }
 0x2b4   :  { %v9389_v2 = vunpack.i.h.bf16 %v9387_v1  ;;  %v9388_v3 = vunpack.i.l.bf16 %v9387_v1 }
 0x2b6   :  { %v9159_v4 = vpack.c.bf16 %v9389_v2, %v9388_v3 }
 0x2b8   :  { %9161 = vmatprep.subr.msk.bf16.mxu1 %vm9954_vm4, %v9159_v4 }
 0x2b9   :  { %9164 = vmatpush3.bf16.xpose.msk.msra.mxu1 %vm9954_vm4, %v9159_v4 }
 0x2c0   :  { %8809 = vmatmul.mubr.msk.f32.vlgmr.msra.gmra.mrb[6].mxu1 %vm409_vm3, %v9976_v5 }
 0x324   :  { %v8803_v11 = vpop.f32.mrb[4].mxu1 }
 0x325   :  { %v555_v12 = vrot.slane %v8803_v11, %v9984_v10  ;;  %v488_v13 = vpop.f32.mrb[5].mxu1  ;;  %v548_v19 = vcombine.high %v8803_v11, %v8803_v11  ;;  %v10089_v11 = vld [vmem:[%s12865_s3 + $0x18] sm:$0xff] }
 0x326   :  { %v506_v14 = vrot.slane %v488_v13, %v9984_v10  ;;  %v499_v50 = vcombine.high %v488_v13, %v488_v13 }
 0x327   :  { %v563_v16 = vcombine.high %v555_v12, %v555_v12  ;;  %v571_v17 = vrot.slane %v555_v12, %v9984_v10  ;;  %v10021_v29 = vrot.slane %v548_v19, %v9984_v10  ;;  %v10094_v12 = vld [vmem:[%s12865_s3 + $0x10] sm:$0xff] }
 0x328   :  { %v522_v18 = vrot.slane %v506_v14, %v9984_v10  ;;  %v514_v40 = vcombine.high %v506_v14, %v506_v14  ;;  %v10078_v1 = vrot.slane %v499_v50, %v9984_v10  ;;  %v10151_v50 = vld [vmem:[%s12865_s3 + $0xb0] sm:$0xff] }
 0x329   :  { %v9994_v20 = vrot.slane %v563_v16, %v9984_v10  ;;  %v632_v23 = vrot.slane %v571_v17, %v9989_v15  ;;  %v593_v30 = vcombine.high %v571_v17, %v571_v17  ;;  %v10041_v39 = vrot.slane %v10021_v29, %v9984_v10 }
 0x32a   :  { %v600_v24 = vrot.slane %v522_v18, %v9989_v15  ;;  %v10059_v51 = vrot.slane %v514_v40, %v9984_v10  ;;  %v544_v2 = vcombine.high %v522_v18, %v522_v18  ;;  %v10098_v13 = vrot.slane %v10078_v1, %v9984_v10 }
 0x32b   :  { %v694_v27 = vmul.f32 %v632_v23, %v9999_v21  ;;  %v693_v28 = vmul.f32 %v632_v23, %v10004_v22  ;;  %v636_v31 = vrot.slane %v9994_v20, %v9989_v15  ;;  %v640_v41 = vrot.slane %v593_v30, %v9989_v15  ;;  %v10108_v23 = vld [vmem:[%s12865_s3 + $0x28] sm:$0xff] }
 0x32c   :  { %v678_v35 = vmul.f32 %v600_v24, %v10011_v25  ;;  %v677_v36 = vmul.f32 %v600_v24, %v10016_v26  ;;  %v648_v52 = vrot.slane %v10041_v39, %v9989_v15  ;;  %v604_v3 = vrot.slane %v10059_v51, %v9989_v15  ;;  %v10113_v24 = vld [vmem:[%s12865_s3 + $0x20] sm:$0xff] }
 0x32d   :  { %v761_v32 = vsel %vm709_vm5, %v694_v27, 0.0  ;;  %v758_v33 = vsel %vm709_vm5, %v693_v28, 0.0  ;;  %v695_v46 = vmul.f32 %v636_v31, %v10032_v37  ;;  %v696_v47 = vmul.f32 %v636_v31, %v10037_v38 }
 0x32e   :  { %762 = vadd.xlane.f32.xlu1 %v761_v32  ;;  %759 = vadd.xlane.f32.xlu0 %v758_v33  ;;  %v713_v42 = vsel %vm709_vm5, %v678_v35, 0.0  ;;  %v710_v45 = vsel %vm709_vm5, %v677_v36, 0.0  ;;  %v697_v57 = vmul.f32 %v640_v41, %v10051_v48  ;;  %v698_v60 = vmul.f32 %v640_v41, %v10056_v49  ;;  %v10126_v35 = vld [vmem:[%s12865_s3 + $0x48] sm:$0xff] }
 0x32f   :  { %v764_v54 = vsel %vm709_vm5, %v695_v46, 0.0  ;;  %v767_v56 = vsel %vm709_vm5, %v696_v47, 0.0  ;;  %v701_v7 = vmul.f32 %v648_v52, %v10070_v61  ;;  %v702_v8 = vmul.f32 %v648_v52, %v10075_v62 }
 0x330   :  { %v770_v4 = vsel %vm709_vm5, %v697_v57, 0.0  ;;  %v773_v6 = vsel %vm709_vm5, %v698_v60, 0.0  ;;  %v608_v14 = vrot.slane %v544_v2, %v9989_v15  ;;  %v680_v18 = vmul.f32 %v604_v3, %v10089_v11 }
 0x331   :  { %v782_v16 = vsel %vm709_vm5, %v701_v7, 0.0  ;;  %v785_v17 = vsel %vm709_vm5, %v702_v8, 0.0  ;;  %v679_v19 = vmul.f32 %v604_v3, %v10094_v12  ;;  %v564_v27 = vcombine.high %v10021_v29, %v10021_v29  ;;  %v10131_v29 = vld [vmem:[%s12865_s3 + $0x40] sm:$0xff]  ;;  %v10164_v3 = vld [vmem:[%s12865_s3 + $0xd8] sm:$0xff] }
 0x332   :  { %714 = vadd.xlane.f32.xlu0 %v713_v42  ;;  %711 = vadd.xlane.f32.xlu1 %v710_v45  ;;  %v682_v28 = vmul.f32 %v608_v14, %v10108_v23  ;;  %v616_v30 = vrot.slane %v10098_v13, %v9989_v15  ;;  %v719_v31 = vsel %vm709_vm5, %v680_v18, 0.0  ;;  %v681_v33 = vmul.f32 %v608_v14, %v10113_v24  ;;  %v10183_v18 = vld [vmem:[%s12865_s3 + $0xe8] sm:$0xff] }
 0x333   :  { %v716_v32 = vsel %vm709_vm5, %v679_v19, 0.0  ;;  %v595_v36 = vcombine.high %v9994_v20, %v9994_v20  ;;  %v10141_v47 = vrot.slane %v564_v27, %v9984_v10  ;;  %v10146_v20 = vld [vmem:[%s12865_s3 + $0xb8] sm:$0xff]  ;;  %12869 = vst [vmem:[#allocation10_spill] sm:$0xff] %v10164_v3  ;;  %v546_v7 = vcombine.high %v10059_v51, %v10059_v51  ;;  %12871 = vst [vmem:[#allocation12_spill] sm:$0xff] %v10183_v18 }
 0x334   :  { %v686_v40 = vmul.f32 %v616_v30, %v10126_v35  ;;  %v685_v41 = vmul.f32 %v616_v30, %v10131_v29  ;;  %v725_v42 = vsel %vm709_vm5, %v682_v28, 0.0  ;;  %v722_v45 = vsel %vm709_vm5, %v681_v33, 0.0  ;;  %12868 = vst [vmem:[#allocation9_spill] sm:$0xff] %v10146_v20  ;;  %v10204_v33 = vld [vmem:[%s12865_s3 + $0x30] sm:$0xff] }
 0x335   :  { %v644_v46 = vrot.slane %v595_v36, %v9989_v15  ;;  %v652_v2 = vrot.slane %v10141_v47, %v9989_v15  ;;  %v612_v51 = vrot.slane %v546_v7, %v9989_v15  ;;  %v10236_v7 = vld [vmem:[%s12865_s3 + $0x60] sm:$0xff] }
 0x336   :  { %765 = vadd.xlane.f32.xlu0 %v764_v54  ;;  %768 = vadd.xlane.f32.xlu1 %v767_v56  ;;  %v737_v52 = vsel %vm709_vm5, %v686_v40, 0.0  ;;  %v594_v54 = vcombine.high %v10041_v39, %v10041_v39  ;;  %v734_v56 = vsel %vm709_vm5, %v685_v41, 0.0  ;;  %v10169_v39 = vld [vmem:[%s12865_s3 + $0xd0] sm:$0xff]  ;;  %v545_v40 = vcombine.high %v10098_v13, %v10098_v13  ;;  %12876 = vst [vmem:[#allocation17_spill] sm:$0xff] %v10236_v7 }
 0x337   :  { %v700_v57 = vmul.f32 %v644_v46, %v10146_v20  ;;  %v699_v60 = vmul.f32 %v644_v46, %v10151_v50  ;;  %12870 = vst [vmem:[#allocation11_spill] sm:$0xff] %v10169_v39  ;;  %v683_v46 = vmul.f32 %v612_v51, %v10204_v33 }
 0x338   :  { %v624_v13 = vrot.slane %v545_v40, %v9989_v15 }
 0x339   :  { %v779_v8 = vsel %vm709_vm5, %v700_v57, 0.0  ;;  %v776_v14 = vsel %vm709_vm5, %v699_v60, 0.0  ;;  %v728_v60 = vsel %vm709_vm5, %v683_v46, 0.0 }
 0x33a   :  { %771 = vadd.xlane.f32.xlu0 %v770_v4  ;;  %774 = vadd.xlane.f32.xlu1 %v773_v6  ;;  %v515_v4 = vcombine.high %v10078_v1, %v10078_v1  ;;  %v656_v6 = vrot.slane %v594_v54, %v9989_v15  ;;  %v10188_v1 = vld [vmem:[%s12865_s3 + $0xe0] sm:$0xff]  ;;  %v10221_v54 = vld [vmem:[%s12865_s3 + $0x50] sm:$0xff] }
 0x33b   :  { %12872 = vst [vmem:[#allocation13_spill] sm:$0xff] %v10188_v1  ;;  %12874 = vst [vmem:[#allocation15_spill] sm:$0xff] %v10221_v54 }
 0x33c   :  { %v543_v19 = vrot.slane %v515_v4, %v9984_v10  ;;  %v706_v30 = vmul.f32 %v656_v6, %v10183_v18  ;;  %v848_v18 = vadd.s32 4294967288, %v9906_v34 }
 0x33e   :  { %783 = vadd.xlane.f32.xlu0 %v782_v16  ;;  %786 = vadd.xlane.f32.xlu1 %v785_v17  ;;  %v704_v16 = vmul.f32 %v652_v2, %v10164_v3  ;;  %v703_v17 = vmul.f32 %v652_v2, %v10169_v39  ;;  %v620_v36 = vrot.slane %v543_v19, %v9989_v15  ;;  %v797_v41 = vsel %vm709_vm5, %v706_v30, 0.0 }
 0x33f   :  { %v10306_v3 = vsub.s32 %v848_v18, %v9981_v9 }
 0x340   :  { %v791_v27 = vsel %vm709_vm5, %v704_v16, 0.0  ;;  %v788_v28 = vsel %vm709_vm5, %v703_v17, 0.0  ;;  %v687_v4 = vmul.f32 %v620_v36, %v10221_v54 }
 0x342   :  { %720 = vadd.xlane.f32.xlu1 %v719_v31  ;;  %717 = vadd.xlane.f32.xlu0 %v716_v32  ;;  %v705_v31 = vmul.f32 %v656_v6, %v10188_v1  ;;  %v10199_v32 = vld [vmem:[%s12865_s3 + $0x38] sm:$0xff]  ;;  %v10231_v6 = vld [vmem:[%s12865_s3 + $0x68] sm:$0xff]  ;;  %v740_v17 = vsel %vm709_vm5, %v687_v4, 0.0  ;;  %v10303_v1 = vsub.s32 %v9906_v34, %v9981_v9 }
 0x343   :  { %12875 = vst [vmem:[#allocation16_spill] sm:$0xff] %v10231_v6 }
 0x346   :  { %726 = vadd.xlane.f32.xlu1 %v725_v42  ;;  %723 = vadd.xlane.f32.xlu0 %v722_v45  ;;  %v794_v42 = vsel %vm709_vm5, %v705_v31, 0.0  ;;  %v684_v45 = vmul.f32 %v612_v51, %v10199_v32 }
 0x348   :  { %v731_v57 = vsel %vm709_vm5, %v684_v45, 0.0 }
 0x34a   :  { %738 = vadd.xlane.f32.xlu1 %v737_v52  ;;  %735 = vadd.xlane.f32.xlu0 %v734_v56  ;;  %v10216_v52 = vld [vmem:[%s12865_s3 + $0x58] sm:$0xff]  ;;  %v547_v56 = vcombine.high %v543_v19, %v543_v19  ;;  %v596_v19 = vcombine.high %v10141_v47, %v10141_v47 }
 0x34b   :  { %12873 = vst [vmem:[#allocation14_spill] sm:$0xff] %v10216_v52  ;;  %v688_v2 = vmul.f32 %v620_v36, %v10216_v52 }
 0x34c   :  { %v628_v51 = vrot.slane %v547_v56, %v9989_v15  ;;  %v660_v40 = vrot.slane %v596_v19, %v9989_v15 }
 0x34d   :  { %v743_v16 = vsel %vm709_vm5, %v688_v2, 0.0 }
 0x34e   :  { %780 = vadd.xlane.f32.xlu1 %v779_v8  ;;  %777 = vadd.xlane.f32.xlu0 %v776_v14  ;;  %v690_v8 = vmul.f32 %v624_v13, %v10231_v6  ;;  %v689_v14 = vmul.f32 %v624_v13, %v10236_v7 }
 0x350   :  { %v749_v30 = vsel %vm709_vm5, %v690_v8, 0.0  ;;  %v746_v31 = vsel %vm709_vm5, %v689_v14, 0.0 }
 0x352   :  { %792 = vadd.xlane.f32.xlu1 %v791_v27  ;;  %789 = vadd.xlane.f32.xlu0 %v788_v28  ;;  %v10248_v27 = vld [vmem:[%s12865_s3 + $0x78] sm:$0xff]  ;;  %v10253_v28 = vld [vmem:[%s12865_s3 + $0x70] sm:$0xff] }
 0x353   :  { %12877 = vst [vmem:[#allocation18_spill] sm:$0xff] %v10248_v27  ;;  %12878 = vst [vmem:[#allocation19_spill] sm:$0xff] %v10253_v28  ;;  %v692_v36 = vmul.f32 %v628_v51, %v10248_v27  ;;  %v691_v47 = vmul.f32 %v628_v51, %v10253_v28 }
 0x355   :  { %v755_v45 = vsel %vm709_vm5, %v692_v36, 0.0  ;;  %v752_v46 = vsel %vm709_vm5, %v691_v47, 0.0 }
 0x356   :  { %798 = vadd.xlane.f32.xlu1 %v797_v41  ;;  %795 = vadd.xlane.f32.xlu0 %v794_v42  ;;  %v10263_v41 = vld [vmem:[%s12865_s3 + $0xf8] sm:$0xff]  ;;  %v10268_v42 = vld [vmem:[%s12865_s3 + $0xf0] sm:$0xff] }
 0x357   :  { %12879 = vst [vmem:[#allocation20_spill] sm:$0xff] %v10263_v41  ;;  %12880 = vst [vmem:[#allocation21_spill] sm:$0xff] %v10268_v42  ;;  %v708_v13 = vmul.f32 %v660_v40, %v10263_v41  ;;  %v707_v56 = vmul.f32 %v660_v40, %v10268_v42 }
 0x35a   :  { %732 = vadd.xlane.f32.xlu1 %v731_v57  ;;  %729 = vadd.xlane.f32.xlu0 %v728_v60  ;;  %v803_v57 = vsel %vm709_vm5, %v708_v13, 0.0  ;;  %v800_v60 = vsel %vm709_vm5, %v707_v56, 0.0 }
 0x35e   :  { %744 = vadd.xlane.f32.xlu1 %v743_v16  ;;  %741 = vadd.xlane.f32.xlu0 %v740_v17 }
 0x362   :  { %750 = vadd.xlane.f32.xlu1 %v749_v30  ;;  %747 = vadd.xlane.f32.xlu0 %v746_v31 }
 0x366   :  { %756 = vadd.xlane.f32.xlu1 %v755_v45  ;;  %753 = vadd.xlane.f32.xlu0 %v752_v46 }
 0x36a   :  { %804 = vadd.xlane.f32.xlu1 %v803_v57  ;;  %801 = vadd.xlane.f32.xlu0 %v800_v60 }
 0x393   :  { %v10276_v2 = vpop.f32.mrb[6].mxu1 }
 0x394   :  { %v10278_v4 = vpop.f32.mrb[7].mxu1 }
 0x3bb   :  { %v763_v8 = vpop.xlane.xlu1 %762  ;;  %v760_v14 = vpop.xlane.xlu0 %759 }
 0x3bf   :  { %v715_v16 = vpop.xlane.xlu0 %714  ;;  %v712_v17 = vpop.xlane.xlu1 %711 }
 0x3c0   :  { %v852_v28 = vrot.slane %v715_v16, %v10306_v3  ;;  %v847_v6 = vrot.slane %v712_v17, %v10303_v1  ;;  %v925_v17 = vrot.slane %v763_v8, %v10306_v3 }
 0x3c3   :  { %v766_v51 = vpop.xlane.xlu0 %765  ;;  %v769_v19 = vpop.xlane.xlu1 %768 }
 0x3c4   :  { %v930_v7 = vrot.slane %v766_v51, %v10303_v1  ;;  %v934_v52 = vrot.slane %v769_v19, %v10306_v3  ;;  %v921_v51 = vrot.slane %v760_v14, %v10303_v1 }
 0x3c7   :  { %v10280_v30 = vpop.xlane.xlu0 %771  ;;  %v10282_v31 = vpop.xlane.xlu1 %774 }
 0x3cb   :  { %v10284_v36 = vpop.xlane.xlu0 %783  ;;  %v10286_v47 = vpop.xlane.xlu1 %786 }
 0x3cf   :  { %v721_v40 = vpop.xlane.xlu1 %720  ;;  %v718_v45 = vpop.xlane.xlu0 %717 }
 0x3d0   :  { %v862_v61 = vrot.slane %v721_v40, %v10306_v3  ;;  %v858_v20 = vrot.slane %v718_v45, %v10303_v1  ;;  %v854_v45 = vsel %vm853_vm6, %v852_v28, %v847_v6 }
 0x3d3   :  { %v727_v46 = vpop.xlane.xlu1 %726  ;;  %v724_v13 = vpop.xlane.xlu0 %723 }
 0x3d4   :  { %v871_v34 = vrot.slane %v727_v46, %v10306_v3  ;;  %v867_v9 = vrot.slane %v724_v13, %v10303_v1  ;;  %v935_v46 = vsel %vm853_vm6, %v934_v52, %v930_v7  ;;  %v863_v13 = vsel %vm853_vm6, %v862_v61, %v858_v20 }
 0x3d5   :  { %v926_v20 = vsel %vm853_vm6, %v925_v17, %v921_v51  ;;  %v991_v7 = vsel %vm990_vm7, %v863_v13, %v854_v45  ;;  %v957_v17 = vrot.slane %v10284_v36, %v10303_v1 }
 0x3d6   :  { %v872_v8 = vsel %vm853_vm6, %v871_v34, %v867_v9 }
 0x3d7   :  { %v10288_v56 = vpop.xlane.xlu1 %738  ;;  %v10290_v57 = vpop.xlane.xlu0 %735  ;;  %v993_v34 = vsel %vm992_vm8, %v872_v8, %v991_v7 }
 0x3d8   :  { %v889_v28 = vrot.slane %v10288_v56, %v10306_v3  ;;  %v961_v56 = vrot.slane %v10286_v47, %v10306_v3 }
 0x3db   :  { %v781_v60 = vpop.xlane.xlu1 %780  ;;  %v778_v44 = vpop.xlane.xlu0 %777 }
 0x3dc   :  { %v952_v14 = vrot.slane %v781_v60, %v10306_v3  ;;  %v948_v54 = vrot.slane %v778_v44, %v10303_v1  ;;  %v1004_v44 = vsel %vm990_vm7, %v935_v46, %v926_v20 }
 0x3de   :  { %v953_v51 = vsel %vm853_vm6, %v952_v14, %v948_v54 }
 0x3df   :  { %v10292_v43 = vpop.xlane.xlu1 %792  ;;  %v10294_v41 = vpop.xlane.xlu0 %789 }
 0x3e3   :  { %v10297_v42 = vpop.xlane.xlu1 %798  ;;  %v10299_v27 = vpop.xlane.xlu0 %795 }
 0x3e4   :  { %v979_v36 = vrot.slane %v10297_v42, %v10306_v3  ;;  %v975_v47 = vrot.slane %v10299_v27, %v10303_v1 }
 0x3e6   :  { %v980_v20 = vsel %vm853_vm6, %v979_v36, %v975_v47 }
 0x3e7   :  { %v733_v39 = vpop.xlane.xlu1 %732  ;;  %v730_v62 = vpop.xlane.xlu0 %729 }
 0x3e8   :  { %v880_v18 = vrot.slane %v733_v39, %v10306_v3  ;;  %v876_v16 = vrot.slane %v730_v62, %v10303_v1  ;;  %v939_v39 = vrot.slane %v10280_v30, %v10303_v1  ;;  %v943_v62 = vrot.slane %v10282_v31, %v10306_v3 }
 0x3e9   :  { %v885_v30 = vrot.slane %v10290_v57, %v10303_v1 }
 0x3ea   :  { %v881_v6 = vsel %vm853_vm6, %v880_v18, %v876_v16  ;;  %v944_v16 = vsel %vm853_vm6, %v943_v62, %v939_v39 }
 0x3eb   :  { %v745_v19 = vpop.xlane.xlu1 %744  ;;  %v742_v40 = vpop.xlane.xlu0 %741  ;;  %v995_v57 = vsel %vm994_vm9, %v881_v6, %v993_v34  ;;  %v890_v46 = vsel %vm853_vm6, %v889_v28, %v885_v30  ;;  %v1005_v62 = vsel %vm992_vm8, %v944_v16, %v1004_v44  ;;  %v10375_v30 = vld [vmem:[%s12881_s27] sm:$0xff] }
 0x3ec   :  { %v898_v52 = vrot.slane %v745_v19, %v10306_v3  ;;  %v894_v61 = vrot.slane %v742_v40, %v10303_v1  ;;  %v970_v19 = vrot.slane %v10292_v43, %v10306_v3  ;;  %v966_v40 = vrot.slane %v10294_v41, %v10303_v1 }
 0x3ed   :  { %v997_v43 = vsel %vm996_vm10, %v890_v46, %v995_v57  ;;  %v1006_v14 = vsel %vm994_vm9, %v953_v51, %v1005_v62  ;;  %v10389_v57 = vld [vmem:[%s12881_s27 + $0x8] sm:$0xff] }
 0x3ee   :  { %v899_v45 = vsel %vm853_vm6, %v898_v52, %v894_v61  ;;  %v971_v42 = vsel %vm853_vm6, %v970_v19, %v966_v40  ;;  %v962_v61 = vsel %vm853_vm6, %v961_v56, %v957_v17 }
 0x3ef   :  { %v751_v31 = vpop.xlane.xlu1 %750  ;;  %v748_v60 = vpop.xlane.xlu0 %747  ;;  %v999_v6 = vsel %vm998_vm11, %v899_v45, %v997_v43 }
 0x3f0   :  { %v907_v9 = vrot.slane %v751_v31, %v10306_v3  ;;  %v903_v18 = vrot.slane %v748_v60, %v10303_v1  ;;  %v1007_v60 = vsel %vm996_vm10, %v962_v61, %v1006_v14 }
 0x3f2   :  { %v908_v13 = vsel %vm853_vm6, %v907_v9, %v903_v18  ;;  %v1008_v18 = vsel %vm998_vm11, %v971_v42, %v1007_v60 }
 0x3f3   :  { %v757_v39 = vpop.xlane.xlu1 %756  ;;  %v754_v54 = vpop.xlane.xlu0 %753  ;;  %v1001_v52 = vsel %vm1000_vm13, %v908_v13, %v999_v6  ;;  %v1009_v56 = vsel %vm1000_vm13, %v980_v20, %v1008_v18 }
 0x3f4   :  { %v916_v41 = vrot.slane %v757_v39, %v10306_v3  ;;  %v912_v8 = vrot.slane %v754_v54, %v10303_v1 }
 0x3f6   :  { %v917_v27 = vsel %vm853_vm6, %v916_v41, %v912_v8 }
 0x3f7   :  { %v805_v7 = vpop.xlane.xlu1 %804  ;;  %v802_v28 = vpop.xlane.xlu0 %801  ;;  %v1003_v31 = vsel %vm1002_vm12, %v917_v27, %v1001_v52 }
 0x3f8   :  { %v988_v44 = vrot.slane %v805_v7, %v10306_v3  ;;  %v984_v34 = vrot.slane %v802_v28, %v10303_v1  ;;  %v1090_v9 = vadd.f32 %v10278_v4, %v1003_v31 }
 0x3fa   :  { %v989_v16 = vsel %vm853_vm6, %v988_v44, %v984_v34  ;;  %v1098_v17 = vadd.f32 %v1090_v9, %v10375_v30 }
 0x3fb   :  { %v1010_v51 = vsel %vm1002_vm12, %v989_v16, %v1009_v56 }
 0x3fc   :  { %v1100_v19 = vsel %vm709_vm5, %v1098_v17, -inf  ;;  %v1095_v40 = vadd.f32 %v10276_v2, %v1010_v51 }
 0x3fd   :  { %1101 = vmax.xlane.f32.xlu0 %v1100_v19 }
 0x3fe   :  { %v1099_v4 = vadd.f32 %v1095_v40, %v10389_v57 }
 0x400   :  { %v1103_v45 = vsel %vm709_vm5, %v1099_v4, -inf }
 0x401   :  { %1104 = vmax.xlane.f32.xlu1 %v1103_v45 }
 0x412   :  { %1209 = vrot.lane.b32.xlu1 %v9948_v55, %s9715_s26 }
 0x413   :  { %9391 = vrot.lane.b32.xlu0 %v9958_v59, %s9715_s26 }
 0x416   :  { %1211 = vrot.lane.b32.xlu1 %v9964_v63, %s9715_s26 }
 0x48a   :  { %v1102_v46 = vpop.xlane.xlu0 %1101 }
 0x48b   :  { %v1106_v36 = vsub.f32 %v1098_v17, %v1102_v46 }
 0x48d   :  { %v1108_v47 = vmul.f32 1.442695, %v1106_v36 }
 0x48e   :  { %v1105_v2 = vpop.xlane.xlu1 %1104  ;;  %v9392_v13 = vpop.permute.xlu0 %9391 }
 0x48f   :  { %9495 = vpow2.f32 %v1108_v47  ;;  %v1107_v39 = vsub.f32 %v1099_v4, %v1105_v2  ;;  %v9394_v54 = vunpack.i.h.bf16 %v9392_v13  ;;  %v9393_v62 = vunpack.i.l.bf16 %v9392_v13 }
 0x491   :  { %v1110_v43 = vmul.f32 1.442695, %v1107_v39  ;;  %v9169_v41 = vpack.c.bf16 %v9394_v54, %v9393_v62 }
 0x492   :  { %v1210_v8 = vpop.permute.xlu1 %1209 }
 0x493   :  { %9497 = vpow2.f32 %v1110_v43  ;;  %9171 = vmatprep.subr.msk.bf16.mxu1 %vm9954_vm4, %v9169_v41  ;;  %8822 = vmatprep.mubr.msk.f32.mxu1 %vm409_vm3, %v1210_v8 }
 0x494   :  { %9174 = vmatpush3.bf16.xpose.msk.msra.mxu1 %vm9954_vm4, %v9169_v41 }
 0x496   :  { %v1212_v6 = vpop.permute.xlu1 %1211 }
 0x499   :  { %v9496_v14 = vpop.eup %9495 }
 0x49a   :  { %v1112_v42 = vsel %vm709_vm5, %v9496_v14, 0.0 }
 0x49b   :  { %1113 = vadd.xlane.f32.xlu0 %v1112_v42  ;;  %8823 = vmatmul.mubr.msk.f32.vlgmr.msra.gmra.mrb[8].mxu1 %vm409_vm3, %v1212_v6 }
 0x49d   :  { %v9498_v27 = vpop.eup %9497 }
 0x49e   :  { %v1115_v52 = vsel %vm709_vm5, %v9498_v27, 0.0 }
 0x49f   :  { %1116 = vadd.xlane.f32.xlu1 %v1115_v52 }
 0x4b0   :  { %9401 = vrot.lane.b32.xlu1 %v9944_v53, %s9716_s0 }
 0x4b1   :  { %9396 = vrot.lane.b32.xlu0 %v9944_v53, %s12812_s4  ;;  %s12996_s4 = smov 104  }
 0x4b4   :  { %1610 = vrot.lane.b32.xlu1 %v9976_v5, %s9715_s26 }
 0x4b5   :  { %1608 = vrot.lane.b32.xlu0 %v9966_v0, %s9715_s26 }
 0x528   :  { %v1114_v61 = vpop.xlane.xlu0 %1113 }
 0x529   :  { %9499 = vrcp.f32 %v1114_v61 }
 0x52c   :  { %v1117_v20 = vpop.xlane.xlu1 %1116  ;;  %v9397_v7 = vpop.permute.xlu0 %9396 }
 0x52d   :  { %9501 = vrcp.f32 %v1117_v20  ;;  %v9399_v28 = vunpack.i.h.bf16 %v9397_v7  ;;  %v9398_v31 = vunpack.i.l.bf16 %v9397_v7 }
 0x52f   :  { %v9165_v60 = vpack.c.bf16 %v9399_v28, %v9398_v31 }
 0x530   :  { %v9402_v44 = vpop.permute.xlu1 %9401  ;;  %v1609_v19 = vpop.permute.xlu0 %1608 }
 0x531   :  { %v9404_v34 = vunpack.i.h.bf16 %v9402_v44  ;;  %v9403_v9 = vunpack.i.l.bf16 %v9402_v44  ;;  %9166 = vmatprep.subr.bf16.mxu0 %v9165_v60 }
 0x532   :  { %9168 = vmatpush3.bf16.msra.mxu0 %v9165_v60 }
 0x533   :  { %v9500_v18 = vpop.eup %9499  ;;  %v9175_v16 = vpack.c.bf16 %v9404_v34, %v9403_v9 }
 0x534   :  { %v1120_v17 = vmul.f32 %v9500_v18, %v9496_v14  ;;  %v1611_v40 = vpop.permute.xlu1 %1610 }
 0x535   :  { %9177 = vmatprep.subr.msk.bf16.mxu0 %vm9954_vm4, %v9175_v16 }
 0x536   :  { %8815 = vmatprep.mubr.msk.f32.mxu0 %vm709_vm5, %v1120_v17 }
 0x537   :  { %v9502_v56 = vpop.eup %9501 }
 0x538   :  { %v1121_v51 = vmul.f32 %v9502_v56, %v9498_v27 }
 0x53a   :  { %8816 = vmatmul.mubr.msk.f32.vlgmr.msra.gmra.mrb[2].mxu0 %vm709_vm5, %v1121_v51 }
 0x53b   :  { %9180 = vmatpush3.bf16.xpose.msk.msra.mxu0 %vm9954_vm4, %v9175_v16  ;;  %8829 = vmatprep.mubr.msk.f32.mxu0 %vm409_vm3, %v1609_v19 }
 0x542   :  { %8830 = vmatmul.mubr.msk.f32.vlgmr.msra.gmra.mrb[4].mxu0 %vm409_vm3, %v1611_v40 }
 0x56e   :  { %v8824_v4 = vpop.f32.mrb[8].mxu1 }
 0x56f   :  { %v1291_v45 = vpop.f32.mrb[9].mxu1  ;;  %v1358_v46 = vrot.slane %v8824_v4, %v9984_v10 }
 0x570   :  { %v1309_v36 = vrot.slane %v1291_v45, %v9984_v10  ;;  %v1302_v28 = vcombine.high %v1291_v45, %v1291_v45  ;;  %v1351_v45 = vcombine.high %v8824_v4, %v8824_v4 }
 0x571   :  { %v1366_v13 = vcombine.high %v1358_v46, %v1358_v46  ;;  %v1374_v39 = vrot.slane %v1358_v46, %v9984_v10 }
 0x572   :  { %v1317_v47 = vcombine.high %v1309_v36, %v1309_v36  ;;  %v1325_v2 = vrot.slane %v1309_v36, %v9984_v10 }
 0x573   :  { %v1388_v42 = vrot.slane %v1366_v13, %v9984_v10  ;;  %v1435_v27 = vrot.slane %v1374_v39, %v9989_v15  ;;  %v1396_v9 = vcombine.high %v1374_v39, %v1374_v39 }
 0x574   :  { %v1339_v54 = vrot.slane %v1317_v47, %v9984_v10  ;;  %v1347_v62 = vcombine.high %v1325_v2, %v1325_v2  ;;  %v1403_v43 = vrot.slane %v1325_v2, %v9989_v15 }
 0x575   :  { %v1439_v31 = vrot.slane %v1388_v42, %v9989_v15  ;;  %v1496_v44 = vmul.f32 %v1435_v27, %v10004_v22  ;;  %v1398_v39 = vcombine.high %v1388_v42, %v1388_v42 }
 0x576   :  { %v1411_v41 = vrot.slane %v1347_v62, %v9989_v15  ;;  %v1407_v8 = vrot.slane %v1339_v54, %v9989_v15  ;;  %v1481_v14 = vmul.f32 %v1403_v43, %v10011_v25  ;;  %v1480_v6 = vmul.f32 %v1403_v43, %v10016_v26 }
 0x577   :  { %v1349_v25 = vcombine.high %v1339_v54, %v1339_v54  ;;  %v1560_v18 = vsel %vm709_vm5, %v1496_v44, 0.0  ;;  %v1499_v46 = vmul.f32 %v1439_v31, %v10037_v38  ;;  %v1447_v62 = vrot.slane %v1398_v39, %v9989_v15 }
 0x578   :  { %v1515_v52 = vsel %vm709_vm5, %v1481_v14, 0.0  ;;  %v1512_v61 = vsel %vm709_vm5, %v1480_v6, 0.0  ;;  %v1484_v20 = vmul.f32 %v1411_v41, %v10113_v24  ;;  %v1482_v7 = vmul.f32 %v1407_v8, %v10094_v12 }
 0x579   :  { %1516 = vadd.xlane.f32.xlu1 %v1515_v52  ;;  %1513 = vadd.xlane.f32.xlu0 %v1512_v61  ;;  %v1483_v34 = vmul.f32 %v1407_v8, %v10089_v11  ;;  %v1316_v24 = vrot.slane %v1302_v28, %v9984_v10  ;;  %v1498_v12 = vmul.f32 %v1439_v31, %v10032_v37  ;;  %v12882_v61 = vld [vmem:[#allocation15_spill] sm:$0xff]  ;;  %v12883_v28 = vld [vmem:[#allocation9_spill] sm:$0xff] }
 0x57a   :  { %v1524_v26 = vsel %vm709_vm5, %v1484_v20, 0.0  ;;  %v1518_v60 = vsel %vm709_vm5, %v1482_v7, 0.0  ;;  %v1485_v17 = vmul.f32 %v1411_v41, %v10108_v23  ;;  %v1415_v56 = vrot.slane %v1349_v25, %v9989_v15 }
 0x57b   :  { %v1521_v16 = vsel %vm709_vm5, %v1483_v34, 0.0  ;;  %v1332_v22 = vrot.slane %v1316_v24, %v9984_v10  ;;  %v1443_v11 = vrot.slane %v1396_v9, %v9989_v15  ;;  %v1566_v51 = vsel %vm709_vm5, %v1498_v12, 0.0  ;;  %v12885_v12 = vld [vmem:[#allocation14_spill] sm:$0xff] }
 0x57c   :  { %v1527_v19 = vsel %vm709_vm5, %v1485_v17, 0.0  ;;  %v1497_v37 = vmul.f32 %v1435_v27, %v9999_v21  ;;  %v1486_v40 = vmul.f32 %v1415_v56, %v10204_v33  ;;  %v1318_v23 = vcombine.high %v1316_v24, %v1316_v24 }
 0x57d   :  { %1525 = vadd.xlane.f32.xlu1 %v1524_v26  ;;  %1519 = vadd.xlane.f32.xlu0 %v1518_v60  ;;  %v1419_v36 = vrot.slane %v1332_v22, %v9989_v15  ;;  %v1500_v13 = vmul.f32 %v1443_v11, %v10051_v48  ;;  %v1365_v21 = vrot.slane %v1351_v45, %v9984_v10  ;;  %v1569_v33 = vsel %vm709_vm5, %v1499_v46, 0.0  ;;  %v12884_v26 = vld [vmem:[#allocation7_spill] sm:$0xff] }
 0x57e   :  { %v1563_v47 = vsel %vm709_vm5, %v1497_v37, 0.0  ;;  %v1530_v2 = vsel %vm709_vm5, %v1486_v40, 0.0  ;;  %v1487_v38 = vmul.f32 %v1415_v56, %v10199_v32  ;;  %v1346_v43 = vrot.slane %v1318_v23, %v9984_v10  ;;  %v12888_v40 = vld [vmem:[#allocation11_spill] sm:$0xff] }
 0x57f   :  { %v1488_v4 = vmul.f32 %v1419_v36, %v10131_v29  ;;  %v1572_v54 = vsel %vm709_vm5, %v1500_v13, 0.0  ;;  %v1381_v48 = vrot.slane %v1365_v21, %v9984_v10  ;;  %v1501_v41 = vmul.f32 %v1443_v11, %v10056_v49  ;;  %v12890_v13 = vld [vmem:[#allocation19_spill] sm:$0xff] }
 0x580   :  { %v1533_v8 = vsel %vm709_vm5, %v1487_v38, 0.0  ;;  %v1502_v29 = vmul.f32 %v1447_v62, %v10151_v50  ;;  %v1423_v6 = vrot.slane %v1346_v43, %v9989_v15  ;;  %v1367_v32 = vcombine.high %v1365_v21, %v1365_v21  ;;  %v12891_v38 = vld [vmem:[#allocation10_spill] sm:$0xff] }
 0x581   :  { %1561 = vadd.xlane.f32.xlu1 %v1560_v18  ;;  %1522 = vadd.xlane.f32.xlu0 %v1521_v16  ;;  %v1536_v14 = vsel %vm709_vm5, %v1488_v4, 0.0  ;;  %v1575_v42 = vsel %vm709_vm5, %v1501_v41, 0.0  ;;  %v1489_v27 = vmul.f32 %v1419_v36, %v10126_v35  ;;  %v1451_v49 = vrot.slane %v1381_v48, %v9989_v15  ;;  %v12886_v16 = vld [vmem:[#allocation17_spill] sm:$0xff]  ;;  %v12889_v36 = vld [vmem:[#allocation16_spill] sm:$0xff] }
 0x582   :  { %v1578_v52 = vsel %vm709_vm5, %v1502_v29, 0.0  ;;  %v1490_v20 = vmul.f32 %v1423_v6, %v12882_v61  ;;  %v1348_v7 = vcombine.high %v1332_v22, %v1332_v22  ;;  %v1503_v31 = vmul.f32 %v1447_v62, %v12883_v28  ;;  %v12887_v22 = vld [vmem:[#allocation8_spill] sm:$0xff]  ;;  %v12893_v29 = vld [vmem:[#allocation18_spill] sm:$0xff] }
 0x583   :  { %v1539_v50 = vsel %vm709_vm5, %v1489_v27, 0.0  ;;  %v1504_v60 = vmul.f32 %v1451_v49, %v12884_v26  ;;  %v1395_v35 = vrot.slane %v1367_v32, %v9984_v10  ;;  %v1350_v9 = vcombine.high %v1346_v43, %v1346_v43  ;;  %v12892_v43 = vld [vmem:[#allocation13_spill] sm:$0xff]  ;;  %v12895_v61 = vld [vmem:[#allocation12_spill] sm:$0xff] }
 0x584   :  { %v1542_v25 = vsel %vm709_vm5, %v1490_v20, 0.0  ;;  %v1427_v44 = vrot.slane %v1348_v7, %v9989_v15  ;;  %v1581_v34 = vsel %vm709_vm5, %v1503_v31, 0.0  ;;  %v1491_v18 = vmul.f32 %v1423_v6, %v12885_v12  ;;  %v12894_v32 = vld [vmem:[#allocation21_spill] sm:$0xff]  ;;  %v12896_v7 = vld [vmem:[#allocation20_spill] sm:$0xff] }
 0x585   :  { %1567 = vadd.xlane.f32.xlu1 %v1566_v51  ;;  %1528 = vadd.xlane.f32.xlu0 %v1527_v19  ;;  %v1584_v24 = vsel %vm709_vm5, %v1504_v60, 0.0  ;;  %v1455_v56 = vrot.slane %v1395_v35, %v9989_v15  ;;  %v1505_v11 = vmul.f32 %v1451_v49, %v12887_v22  ;;  %v1431_v51 = vrot.slane %v1350_v9, %v9989_v15 }
 0x586   :  { %v1492_v17 = vmul.f32 %v1427_v44, %v12886_v16  ;;  %v1545_v19 = vsel %vm709_vm5, %v1491_v18, 0.0  ;;  %v1397_v23 = vcombine.high %v1381_v48, %v1381_v48 }
 0x587   :  { %v1506_v45 = vmul.f32 %v1455_v56, %v12888_v40  ;;  %v1587_v46 = vsel %vm709_vm5, %v1505_v11, 0.0  ;;  %v1494_v39 = vmul.f32 %v1431_v51, %v12890_v13  ;;  %v1507_v62 = vmul.f32 %v1455_v56, %v12891_v38 }
 0x588   :  { %v1548_v37 = vsel %vm709_vm5, %v1492_v17, 0.0  ;;  %v1459_v21 = vrot.slane %v1397_v23, %v9989_v15  ;;  %v1495_v6 = vmul.f32 %v1431_v51, %v12893_v29 }
 0x589   :  { %1564 = vadd.xlane.f32.xlu0 %v1563_v47  ;;  %1531 = vadd.xlane.f32.xlu1 %v1530_v2  ;;  %v1493_v47 = vmul.f32 %v1427_v44, %v12889_v36  ;;  %v1590_v2 = vsel %vm709_vm5, %v1506_v45, 0.0 }
 0x58a   :  { %v1508_v48 = vmul.f32 %v1459_v21, %v12892_v43  ;;  %v1557_v27 = vsel %vm709_vm5, %v1495_v6, 0.0  ;;  %v1509_v20 = vmul.f32 %v1459_v21, %v12895_v61 }
 0x58b   :  { %v1551_v4 = vsel %vm709_vm5, %v1493_v47, 0.0 }
 0x58c   :  { %v1599_v49 = vsel %vm709_vm5, %v1509_v20, 0.0 }
 0x58d   :  { %1570 = vadd.xlane.f32.xlu0 %v1569_v33  ;;  %1573 = vadd.xlane.f32.xlu1 %v1572_v54  ;;  %v1399_v33 = vcombine.high %v1395_v35, %v1395_v35  ;;  %v1554_v54 = vsel %vm709_vm5, %v1494_v39, 0.0 }
 0x58f   :  { %v1463_v41 = vrot.slane %v1399_v33, %v9989_v15 }
 0x591   :  { %1534 = vadd.xlane.f32.xlu0 %v1533_v8  ;;  %1537 = vadd.xlane.f32.xlu1 %v1536_v14  ;;  %v1593_v8 = vsel %vm709_vm5, %v1507_v62, 0.0  ;;  %v1596_v14 = vsel %vm709_vm5, %v1508_v48, 0.0 }
 0x595   :  { %1576 = vadd.xlane.f32.xlu0 %v1575_v42  ;;  %1579 = vadd.xlane.f32.xlu1 %v1578_v52  ;;  %v1510_v42 = vmul.f32 %v1463_v41, %v12894_v32 }
 0x597   :  { %v1602_v52 = vsel %vm709_vm5, %v1510_v42, 0.0 }
 0x599   :  { %1540 = vadd.xlane.f32.xlu0 %v1539_v50  ;;  %1543 = vadd.xlane.f32.xlu1 %v1542_v25  ;;  %v1511_v50 = vmul.f32 %v1463_v41, %v12896_v7 }
 0x59b   :  { %v1605_v28 = vsel %vm709_vm5, %v1511_v50, 0.0 }
 0x59d   :  { %1582 = vadd.xlane.f32.xlu0 %v1581_v34  ;;  %1585 = vadd.xlane.f32.xlu1 %v1584_v24 }
 0x5a1   :  { %1546 = vadd.xlane.f32.xlu0 %v1545_v19  ;;  %1549 = vadd.xlane.f32.xlu1 %v1548_v37 }
 0x5a5   :  { %1588 = vadd.xlane.f32.xlu0 %v1587_v46  ;;  %1591 = vadd.xlane.f32.xlu1 %v1590_v2 }
 0x5a9   :  { %1552 = vadd.xlane.f32.xlu0 %v1551_v4  ;;  %1555 = vadd.xlane.f32.xlu1 %v1554_v54 }
 0x5ad   :  { %1594 = vadd.xlane.f32.xlu0 %v1593_v8  ;;  %1597 = vadd.xlane.f32.xlu1 %v1596_v14 }
 0x5b1   :  { %1558 = vadd.xlane.f32.xlu0 %v1557_v27  ;;  %1603 = vadd.xlane.f32.xlu1 %v1602_v52 }
 0x5b5   :  { %1600 = vadd.xlane.f32.xlu0 %v1599_v49 }
 0x5b9   :  { %1606 = vadd.xlane.f32.xlu0 %v1605_v28 }
 0x606   :  { %v1517_v31 = vpop.xlane.xlu1 %1516  ;;  %v1514_v25 = vpop.xlane.xlu0 %1513 }
 0x607   :  { %v1655_v54 = vrot.slane %v1517_v31, %v10306_v3  ;;  %v1651_v38 = vrot.slane %v1514_v25, %v10303_v1 }
 0x609   :  { %v1656_v61 = vsel %vm853_vm6, %v1655_v54, %v1651_v38 }
 0x60a   :  { %v1526_v26 = vpop.xlane.xlu1 %1525  ;;  %v1520_v60 = vpop.xlane.xlu0 %1519 }
 0x60b   :  { %v1660_v62 = vrot.slane %v1520_v60, %v10303_v1  ;;  %v1669_v48 = vrot.slane %v1526_v26, %v10303_v1 }
 0x60d   :  { %v10518_v44 = vpop.f32.mrb[2].mxu0 }
 0x60e   :  { %v10520_v35 = vpop.f32.mrb[3].mxu0  ;;  %v10522_v34 = vpop.xlane.xlu1 %1561 }
 0x60f   :  { %v1523_v9 = vpop.xlane.xlu0 %1522  ;;  %v1723_v25 = vrot.slane %v10522_v34, %v10303_v1 }
 0x610   :  { %v1664_v21 = vrot.slane %v1523_v9, %v10306_v3 }
 0x612   :  { %v1568_v24 = vpop.xlane.xlu1 %1567  ;;  %v1665_v14 = vsel %vm853_vm6, %v1664_v21, %v1660_v62 }
 0x613   :  { %v1529_v12 = vpop.xlane.xlu0 %1528  ;;  %v1792_v7 = vsel %vm990_vm7, %v1665_v14, %v1656_v61  ;;  %v1732_v26 = vrot.slane %v1568_v24, %v10303_v1 }
 0x614   :  { %v1673_v33 = vrot.slane %v1529_v12, %v10306_v3 }
 0x615   :  { %v10524_v18 = vpop.f32.mrb[4].mxu0 }
 0x616   :  { %v10526_v16 = vpop.f32.mrb[5].mxu0  ;;  %v1532_v56 = vpop.xlane.xlu1 %1531  ;;  %v1674_v32 = vsel %vm853_vm6, %v1673_v33, %v1669_v48 }
 0x617   :  { %v10528_v17 = vpop.xlane.xlu0 %1564  ;;  %v1678_v29 = vrot.slane %v1532_v56, %v10303_v1  ;;  %v1793_v60 = vsel %vm992_vm8, %v1674_v32, %v1792_v7 }
 0x618   :  { %v1727_v12 = vrot.slane %v10528_v17, %v10306_v3 }
 0x61a   :  { %v1574_v11 = vpop.xlane.xlu1 %1573  ;;  %v1728_v38 = vsel %vm853_vm6, %v1727_v12, %v1723_v25 }
 0x61b   :  { %v1571_v22 = vpop.xlane.xlu0 %1570  ;;  %v1741_v17 = vrot.slane %v1574_v11, %v10303_v1 }
 0x61c   :  { %v1736_v50 = vrot.slane %v1571_v22, %v10306_v3 }
 0x61e   :  { %v1538_v19 = vpop.xlane.xlu1 %1537 }
 0x61f   :  { %v1535_v51 = vpop.xlane.xlu0 %1534  ;;  %v1687_v42 = vrot.slane %v1538_v19, %v10303_v1 }
 0x620   :  { %v1682_v43 = vrot.slane %v1535_v51, %v10306_v3 }
 0x622   :  { %v1580_v40 = vpop.xlane.xlu1 %1579  ;;  %v1683_v20 = vsel %vm853_vm6, %v1682_v43, %v1678_v29 }
 0x623   :  { %v1577_v37 = vpop.xlane.xlu0 %1576  ;;  %v1794_v56 = vsel %vm994_vm9, %v1683_v20, %v1793_v60  ;;  %v1750_v33 = vrot.slane %v1580_v40, %v10303_v1 }
 0x624   :  { %v1745_v22 = vrot.slane %v1577_v37, %v10306_v3 }
 0x626   :  { %v1544_v23 = vpop.xlane.xlu1 %1543  ;;  %v1746_v62 = vsel %vm853_vm6, %v1745_v22, %v1741_v17 }
 0x627   :  { %v1541_v45 = vpop.xlane.xlu0 %1540  ;;  %v1696_v49 = vrot.slane %v1544_v23, %v10303_v1 }
 0x628   :  { %v1691_v41 = vrot.slane %v1541_v45, %v10306_v3 }
 0x62a   :  { %v10530_v36 = vpop.xlane.xlu1 %1585  ;;  %v1692_v28 = vsel %vm853_vm6, %v1691_v41, %v1687_v42 }
 0x62b   :  { %v1583_v46 = vpop.xlane.xlu0 %1582  ;;  %v1795_v23 = vsel %vm996_vm10, %v1692_v28, %v1794_v56  ;;  %v1759_v43 = vrot.slane %v10530_v36, %v10303_v1 }
 0x62c   :  { %v1754_v34 = vrot.slane %v1583_v46, %v10306_v3 }
 0x62e   :  { %v1550_v2 = vpop.xlane.xlu1 %1549 }
 0x62f   :  { %v1547_v47 = vpop.xlane.xlu0 %1546  ;;  %v1705_v31 = vrot.slane %v1550_v2, %v10303_v1  ;;  %v1737_v2 = vsel %vm853_vm6, %v1736_v50, %v1732_v26 }
 0x630   :  { %v1700_v6 = vrot.slane %v1547_v47, %v10306_v3  ;;  %v1799_v14 = vsel %vm990_vm7, %v1737_v2, %v1728_v38 }
 0x631   :  { %v1800_v36 = vsel %vm992_vm8, %v1746_v62, %v1799_v14 }
 0x632   :  { %v10532_v39 = vpop.xlane.xlu1 %1591  ;;  %v1701_v9 = vsel %vm853_vm6, %v1700_v6, %v1696_v49 }
 0x633   :  { %v1589_v13 = vpop.xlane.xlu0 %1588  ;;  %v1796_v21 = vsel %vm998_vm11, %v1701_v9, %v1795_v23  ;;  %v1768_v40 = vrot.slane %v10532_v39, %v10303_v1 }
 0x634   :  { %v1763_v37 = vrot.slane %v1589_v13, %v10306_v3  ;;  %v1755_v13 = vsel %vm853_vm6, %v1754_v34, %v1750_v33 }
 0x636   :  { %v1556_v8 = vpop.xlane.xlu1 %1555  ;;  %v1764_v29 = vsel %vm853_vm6, %v1763_v37, %v1759_v43 }
 0x637   :  { %v1553_v4 = vpop.xlane.xlu0 %1552  ;;  %v1714_v24 = vrot.slane %v1556_v8, %v10303_v1 }
 0x638   :  { %v1709_v27 = vrot.slane %v1553_v4, %v10306_v3 }
 0x63a   :  { %v1710_v51 = vsel %vm853_vm6, %v1709_v27, %v1705_v31  ;;  %v1598_v19 = vpop.xlane.xlu1 %1597 }
 0x63b   :  { %v1595_v52 = vpop.xlane.xlu0 %1594  ;;  %v1797_v46 = vsel %vm1000_vm13, %v1710_v51, %v1796_v21  ;;  %v1777_v6 = vrot.slane %v1598_v19, %v10303_v1 }
 0x63c   :  { %v1772_v4 = vrot.slane %v1595_v52, %v10306_v3  ;;  %v1801_v52 = vsel %vm994_vm9, %v1755_v13, %v1800_v36 }
 0x63e   :  { %v1604_v32 = vpop.xlane.xlu1 %1603  ;;  %v1773_v42 = vsel %vm853_vm6, %v1772_v4, %v1768_v40  ;;  %v405_v40 = vld [vmem:[%s12748_s8] sm:$0xff] }
 0x63f   :  { %v1559_v45 = vpop.xlane.xlu0 %1558  ;;  %v1786_v20 = vrot.slane %v1604_v32, %v10303_v1 }
 0x640   :  { %v1718_v47 = vrot.slane %v1559_v45, %v10306_v3 }
 0x642   :  { %v1719_v54 = vsel %vm853_vm6, %v1718_v47, %v1714_v24 }
 0x643   :  { %v1601_v11 = vpop.xlane.xlu0 %1600  ;;  %v1798_v48 = vsel %vm1002_vm12, %v1719_v54, %v1797_v46 }
 0x644   :  { %v1781_v41 = vrot.slane %v1601_v11, %v10306_v3  ;;  %v1883_v8 = vadd.f32 %v10526_v16, %v1798_v48  ;;  %v1802_v16 = vsel %vm996_vm10, %v1764_v29, %v1801_v52 }
 0x645   :  { %v1803_v50 = vsel %vm998_vm11, %v1773_v42, %v1802_v16 }
 0x646   :  { %v1891_v27 = vadd.f32 %v1883_v8, %v10375_v30  ;;  %v1782_v39 = vsel %vm853_vm6, %v1781_v41, %v1777_v6 }
 0x647   :  { %v1607_v61 = vpop.xlane.xlu0 %1606  ;;  %v1804_v30 = vsel %vm1000_vm13, %v1782_v39, %v1803_v50 }
 0x648   :  { %v1790_v49 = vrot.slane %v1607_v61, %v10306_v3  ;;  %v1893_v7 = vsel %vm709_vm5, %v1891_v27, -inf }
 0x649   :  { %1894 = vmax.xlane.f32.xlu1 %v1893_v7 }
 0x64a   :  { %v1791_v28 = vsel %vm853_vm6, %v1790_v49, %v1786_v20 }
 0x64b   :  { %v1805_v31 = vsel %vm1002_vm12, %v1791_v28, %v1804_v30  ;;  %v10659_v28 = vld [vmem:[%s12865_s3 + $0x88] sm:$0xff]  ;;  %v10665_v30 = vld [vmem:[%s12865_s3 + $0x80] sm:$0xff] }
 0x64c   :  { %v1888_v25 = vadd.f32 %v10524_v18, %v1805_v31 }
 0x64e   :  { %v1892_v26 = vadd.f32 %v1888_v25, %v10389_v57  ;;  %v406_v57 = vld [vmem:[%s12748_s8 + $0x8] sm:$0xff] }
 0x64f   :  { %8839 = vmatprep.subr.mxu0 %v406_v57 }
 0x650   :  { %v1896_v60 = vsel %vm709_vm5, %v1892_v26, -inf  ;;  %8840 = vmatpush3.msra.mxu0 %v406_v57 }
 0x651   :  { %1897 = vmax.xlane.f32.xlu0 %v1896_v60  ;;  %8844 = vmatprep.subr.mxu0 %v405_v40 }
 0x6d6   :  { %v1895_v9 = vpop.xlane.xlu1 %1894 }
 0x6d7   :  { %v1899_v12 = vsub.f32 %v1891_v27, %v1895_v9 }
 0x6d9   :  { %v1901_v56 = vmul.f32 1.442695, %v1899_v12 }
 0x6db   :  { %9503 = vpow2.f32 %v1901_v56 }
 0x6de   :  { %v1898_v22 = vpop.xlane.xlu0 %1897 }
 0x6df   :  { %v1900_v51 = vsub.f32 %v1892_v26, %v1898_v22  ;;  %v10679_v22 = vld [vmem:[%s12865_s3 + $0x8] sm:$0xff] }
 0x6e1   :  { %v1903_v19 = vmul.f32 1.442695, %v1900_v51 }
 0x6e3   :  { %9505 = vpow2.f32 %v1903_v19  ;;  %v10685_v19 = vld [vmem:[%s12865_s3] sm:$0xff] }
 0x6e5   :  { %v9504_v45 = vpop.eup %9503 }
 0x6e6   :  { %v1905_v23 = vsel %vm709_vm5, %v9504_v45, 0.0 }
 0x6e7   :  { %1906 = vadd.xlane.f32.xlu1 %v1905_v23 }
 0x6ed   :  { %v9506_v34 = vpop.eup %9505 }
 0x6ee   :  { %v1908_v18 = vsel %vm709_vm5, %v9506_v34, 0.0 }
 0x6ef   :  { %1909 = vadd.xlane.f32.xlu0 %v1908_v18 }
 0x6f8   :  { %9406 = vrot.lane.b32.xlu1 %v9944_v53, %s12811_s5 }
 0x6fc   :  { %2164 = vrot.lane.b32.xlu1 %v9948_v55, %s12809_s22 }
 0x700   :  { %2166 = vrot.lane.b32.xlu1 %v9964_v63, %s12809_s22 }
 0x704   :  { %2563 = vrot.lane.b32.xlu1 %v9966_v0, %s12809_s22 }
 0x705   :  { %9411 = vrot.lane.b32.xlu0 %v9958_v59, %s12809_s22 }
 0x709   :  { %9416 = vrot.lane.b32.xlu0 %v9944_v53, %s12808_s23 }
 0x70d   :  { %2565 = vrot.lane.b32.xlu0 %v9976_v5, %s12809_s22 }
 0x774   :  { %v1907_v24 = vpop.xlane.xlu1 %1906 }
 0x775   :  { %9507 = vrcp.f32 %v1907_v24 }
 0x778   :  { %v9407_v47 = vpop.permute.xlu1 %9406 }
 0x779   :  { %v9409_v2 = vunpack.i.h.bf16 %v9407_v47  ;;  %v9408_v17 = vunpack.i.l.bf16 %v9407_v47  ;;  %v10698_v47 = vld [vmem:[%s12865_s3 + $0x90] sm:$0xff] }
 0x77b   :  { %v9181_v21 = vpack.c.bf16 %v9409_v2, %v9408_v17  ;;  %v10704_v17 = vld [vmem:[%s12865_s3 + $0x98] sm:$0xff] }
 0x77c   :  { %v1910_v37 = vpop.xlane.xlu0 %1909  ;;  %v2165_v48 = vpop.permute.xlu1 %2164 }
 0x77d   :  { %9509 = vrcp.f32 %v1910_v37  ;;  %9182 = vmatprep.subr.bf16.mxu1 %v9181_v21 }
 0x77e   :  { %9184 = vmatpush3.bf16.msra.mxu1 %v9181_v21 }
 0x77f   :  { %v9508_v33 = vpop.eup %9507 }
 0x780   :  { %v9412_v4 = vpop.permute.xlu0 %9411  ;;  %v1913_v54 = vmul.f32 %v9508_v33, %v9504_v45  ;;  %v2167_v13 = vpop.permute.xlu1 %2166 }
 0x781   :  { %v9414_v46 = vunpack.i.h.bf16 %v9412_v4  ;;  %v9413_v38 = vunpack.i.l.bf16 %v9412_v4 }
 0x782   :  { %8836 = vmatprep.mubr.msk.f32.mxu1 %vm709_vm5, %v1913_v54 }
 0x783   :  { %v9185_v62 = vpack.c.bf16 %v9414_v46, %v9413_v38  ;;  %v10717_v38 = vld [vmem:[%s12865_s3 + $0xa0] sm:$0xff] }
 0x784   :  { %v9417_v41 = vpop.permute.xlu0 %9416  ;;  %v2564_v39 = vpop.permute.xlu1 %2563 }
 0x785   :  { %9187 = vmatprep.subr.msk.bf16.mxu1 %vm9954_vm4, %v9185_v62  ;;  %v9419_v8 = vunpack.i.h.bf16 %v9417_v41  ;;  %v9418_v14 = vunpack.i.l.bf16 %v9417_v41 }
 0x787   :  { %v9510_v43 = vpop.eup %9509  ;;  %v9191_v32 = vpack.c.bf16 %v9419_v8, %v9418_v14  ;;  %v10736_v14 = vld [vmem:[%s12865_s3 + $0xc0] sm:$0xff] }
 0x788   :  { %v1914_v11 = vmul.f32 %v9510_v43, %v9506_v34  ;;  %v2566_v25 = vpop.permute.xlu0 %2565  ;;  %v10723_v43 = vld [vmem:[%s12865_s3 + $0xa8] sm:$0xff] }
 0x78a   :  { %8837 = vmatmul.mubr.msk.f32.vlgmr.msra.gmra.mrb[10].mxu1 %vm709_vm5, %v1914_v11 }
 0x78b   :  { %9190 = vmatpush3.bf16.xpose.msk.msra.mxu1 %vm9954_vm4, %v9185_v62  ;;  %8853 = vmatprep.mubr.msk.f32.mxu1 %vm409_vm3, %v2165_v48 }
 0x792   :  { %8854 = vmatmul.mubr.msk.f32.vlgmr.msra.gmra.mrb[12].mxu1 %vm409_vm3, %v2167_v13 }
 0x85d   :  { %v8838_v29 = vpop.f32.mrb[10].mxu1 }
 0x85e   :  { %v1993_v6 = vpop.f32.mrb[11].mxu1 }
 0x85f   :  { %8841 = vmatprep.mubr.msk.f32.mxu0 %vm409_vm3, %v1993_v6  ;;  %v10742_v6 = vld [vmem:[%s12865_s3 + $0xc8] sm:$0xff] }
 0x860   :  { %8842 = vmatmul.mubr.msk.f32.vlgmr.msra.gmra.mrb[6].mxu0 %vm409_vm3, %v8838_v29 }
 0x861   :  { %8845 = vmatpush3.msra.mxu0 %v405_v40  ;;  %8846 = vmatprep.mubr.msk.f32.mxu0 %vm409_vm3, %v10520_v35 }
 0x862   :  { %9193 = vmatprep.subr.msk.bf16.mxu0 %vm9954_vm4, %v9191_v32 }
 0x865   :  { %v8855_v36 = vpop.f32.mrb[12].mxu1 }
 0x866   :  { %v2313_v42 = vrot.slane %v8855_v36, %v9984_v10  ;;  %v2246_v27 = vpop.f32.mrb[13].mxu1  ;;  %v2306_v35 = vcombine.high %v8855_v36, %v8855_v36 }
 0x867   :  { %v2264_v52 = vrot.slane %v2246_v27, %v9984_v10  ;;  %v2257_v37 = vcombine.high %v2246_v27, %v2246_v27 }
 0x868   :  { %v2321_v61 = vcombine.high %v2313_v42, %v2313_v42  ;;  %v2329_v16 = vrot.slane %v2313_v42, %v9984_v10  ;;  %8847 = vmatmul.mubr.msk.f32.vlgmr.msra.gmra.mrb[6].mxu0 %vm409_vm3, %v10518_v44  ;;  %v10669_v26 = vrot.slane %v2306_v35, %v9984_v10 }
 0x869   :  { %v2280_v20 = vrot.slane %v2264_v52, %v9984_v10  ;;  %9196 = vmatpush3.bf16.xpose.msk.msra.mxu0 %vm9954_vm4, %v9191_v32  ;;  %8860 = vmatprep.mubr.msk.f32.mxu0 %vm409_vm3, %v2564_v39  ;;  %v2272_v34 = vcombine.high %v2264_v52, %v2264_v52  ;;  %v10727_v48 = vrot.slane %v2257_v37, %v9984_v10  ;;  %v10755_v39 = vld [vmem:[%s12865_s3 + $0x18] sm:$0xff] }
 0x86a   :  { %v10652_v49 = vrot.slane %v2321_v61, %v9984_v10  ;;  %v2390_v7 = vrot.slane %v2329_v16, %v9989_v15  ;;  %v2351_v60 = vcombine.high %v2329_v16, %v2329_v16  ;;  %v10690_v23 = vrot.slane %v10669_v26, %v9984_v10  ;;  %v10761_v16 = vld [vmem:[%s12865_s3 + $0x10] sm:$0xff]  ;;  %v10809_v37 = vld [vmem:[%s12865_s3 + $0xb8] sm:$0xff] }
 0x86b   :  { %v2358_v50 = vrot.slane %v2280_v20, %v9989_v15  ;;  %v10708_v33 = vrot.slane %v2272_v34, %v9984_v10  ;;  %v2302_v13 = vcombine.high %v2280_v20, %v2280_v20  ;;  %v10747_v36 = vrot.slane %v10727_v48, %v9984_v10  ;;  %12899 = vst [vmem:[#allocation7_spill] sm:$0xff] %v10809_v37 }
 0x86c   :  { %v2452_v44 = vmul.f32 %v10659_v28, %v2390_v7  ;;  %v2451_v31 = vmul.f32 %v10665_v30, %v2390_v7  ;;  %v2394_v9 = vrot.slane %v10652_v49, %v9989_v15  ;;  %v2398_v18 = vrot.slane %v2351_v60, %v9989_v15  ;;  %v10769_v7 = vld [vmem:[%s12865_s3 + $0x28] sm:$0xff]  ;;  %v10779_v60 = vld [vmem:[%s12865_s3 + $0x20] sm:$0xff] }
 0x86d   :  { %v2436_v51 = vmul.f32 %v10679_v22, %v2358_v50  ;;  %v2435_v45 = vmul.f32 %v10685_v19, %v2358_v50  ;;  %v2406_v4 = vrot.slane %v10690_v23, %v9989_v15  ;;  %v2362_v40 = vrot.slane %v10708_v33, %v9989_v15  ;;  %12897 = vst [vmem:[#allocation15_spill] sm:$0xff] %v10769_v7 }
 0x86e   :  { %v2518_v12 = vsel %vm709_vm5, %v2452_v44, 0.0  ;;  %v2515_v56 = vsel %vm709_vm5, %v2451_v31, 0.0  ;;  %v2453_v2 = vmul.f32 %v10698_v47, %v2394_v9  ;;  %v2454_v21 = vmul.f32 %v10704_v17, %v2394_v9 }
 0x86f   :  { %2519 = vadd.xlane.f32.xlu1 %v2518_v12  ;;  %2516 = vadd.xlane.f32.xlu0 %v2515_v56  ;;  %v2470_v57 = vsel %vm709_vm5, %v2436_v51, 0.0  ;;  %v2467_v24 = vsel %vm709_vm5, %v2435_v45, 0.0  ;;  %v2455_v62 = vmul.f32 %v10717_v38, %v2398_v18  ;;  %v2456_v11 = vmul.f32 %v10723_v43, %v2398_v18  ;;  %v10787_v12 = vld [vmem:[%s12865_s3 + $0x48] sm:$0xff]  ;;  %v10793_v51 = vld [vmem:[%s12865_s3 + $0x40] sm:$0xff] }
 0x870   :  { %8861 = vmatmul.mubr.msk.f32.vlgmr.msra.gmra.mrb[8].mxu0 %vm409_vm3, %v2566_v25  ;;  %v2521_v54 = vsel %vm709_vm5, %v2453_v2, 0.0  ;;  %v2524_v46 = vsel %vm709_vm5, %v2454_v21, 0.0  ;;  %v2459_v29 = vmul.f32 %v10736_v14, %v2406_v4  ;;  %v2460_v32 = vmul.f32 %v10742_v6, %v2406_v4  ;;  %12898 = vst [vmem:[#allocation9_spill] sm:$0xff] %v10787_v12 }
 0x871   :  { %v2527_v41 = vsel %vm709_vm5, %v2455_v62, 0.0  ;;  %v2530_v8 = vsel %vm709_vm5, %v2456_v11, 0.0  ;;  %v2366_v42 = vrot.slane %v2302_v13, %v9989_v15  ;;  %v2438_v61 = vmul.f32 %v10755_v39, %v2362_v40 }
 0x872   :  { %v2539_v27 = vsel %vm709_vm5, %v2459_v29, 0.0  ;;  %v2542_v52 = vsel %vm709_vm5, %v2460_v32, 0.0  ;;  %v2437_v20 = vmul.f32 %v10761_v16, %v2362_v40  ;;  %v2322_v35 = vcombine.high %v10669_v26, %v10669_v26 }
 0x873   :  { %2471 = vadd.xlane.f32.xlu0 %v2470_v57  ;;  %2468 = vadd.xlane.f32.xlu1 %v2467_v24  ;;  %v2440_v50 = vmul.f32 %v10769_v7, %v2366_v42  ;;  %v2374_v44 = vrot.slane %v10747_v36, %v9989_v15  ;;  %v2476_v31 = vsel %vm709_vm5, %v2438_v61, 0.0  ;;  %v2439_v26 = vmul.f32 %v10779_v60, %v2366_v42  ;;  %v10846_v61 = vld [vmem:[%s12865_s3 + $0xe8] sm:$0xff] }
 0x874   :  { %v2473_v25 = vsel %vm709_vm5, %v2437_v20, 0.0  ;;  %v2353_v9 = vcombine.high %v10652_v49, %v10652_v49  ;;  %v10800_v57 = vrot.slane %v2322_v35, %v9984_v10  ;;  %v2352_v2 = vcombine.high %v10690_v23, %v10690_v23  ;;  %12903 = vst [vmem:[#allocation11_spill] sm:$0xff] %v10846_v61  ;;  %v10852_v35 = vld [vmem:[%s12865_s3 + $0xe0] sm:$0xff] }
 0x875   :  { %v2444_v56 = vmul.f32 %v10787_v12, %v2374_v44  ;;  %v2443_v45 = vmul.f32 %v10793_v51, %v2374_v44  ;;  %v2482_v34 = vsel %vm709_vm5, %v2440_v50, 0.0  ;;  %v2479_v49 = vsel %vm709_vm5, %v2439_v26, 0.0  ;;  %12904 = vst [vmem:[#allocation16_spill] sm:$0xff] %v10852_v35 }
 0x876   :  { %v2402_v18 = vrot.slane %v2353_v9, %v9989_v15  ;;  %v2410_v62 = vrot.slane %v10800_v57, %v9989_v15  ;;  %v2273_v23 = vcombine.high %v10727_v48, %v10727_v48  ;;  %v2414_v11 = vrot.slane %v2352_v2, %v9989_v15  ;;  %v10836_v48 = vld [vmem:[%s12865_s3 + $0xd0] sm:$0xff]  ;;  %v10863_v9 = vld [vmem:[%s12865_s3 + $0x38] sm:$0xff] }
 0x877   :  { %2522 = vadd.xlane.f32.xlu0 %v2521_v54  ;;  %2525 = vadd.xlane.f32.xlu1 %v2524_v46  ;;  %v2494_v24 = vsel %vm709_vm5, %v2444_v56, 0.0  ;;  %v2491_v21 = vsel %vm709_vm5, %v2443_v45, 0.0  ;;  %v10815_v54 = vld [vmem:[%s12865_s3 + $0xb0] sm:$0xff]  ;;  %v2304_v13 = vcombine.high %v10708_v33, %v10708_v33  ;;  %12902 = vst [vmem:[#allocation8_spill] sm:$0xff] %v10836_v48  ;;  %12905 = vst [vmem:[#allocation19_spill] sm:$0xff] %v10863_v9  ;;  %v10878_v2 = vld [vmem:[%s12865_s3 + $0x58] sm:$0xff] }
 0x878   :  { %v2458_v4 = vmul.f32 %v10809_v37, %v2402_v18  ;;  %12900 = vst [vmem:[#allocation14_spill] sm:$0xff] %v10815_v54  ;;  %v2457_v46 = vmul.f32 %v10815_v54, %v2402_v18  ;;  %v2461_v32 = vmul.f32 %v10836_v48, %v2410_v62  ;;  %v2301_v42 = vrot.slane %v2273_v23, %v9984_v10  ;;  %v10869_v45 = vld [vmem:[%s12865_s3 + $0x30] sm:$0xff] }
 0x879   :  { %v2370_v33 = vrot.slane %v2304_v13, %v9989_v15  ;;  %v2464_v20 = vmul.f32 %v10846_v61, %v2414_v11  ;;  %v2463_v50 = vmul.f32 %v10852_v35, %v2414_v11  ;;  %12906 = vst [vmem:[#allocation10_spill] sm:$0xff] %v10869_v45  ;;  %12907 = vst [vmem:[#allocation13_spill] sm:$0xff] %v10878_v2  ;;  %v10896_v11 = vld [vmem:[%s12865_s3 + $0x60] sm:$0xff] }
 0x87a   :  { %v2536_v40 = vsel %vm709_vm5, %v2458_v4, 0.0  ;;  %v2378_v44 = vrot.slane %v2301_v42, %v9989_v15  ;;  %v10884_v4 = vld [vmem:[%s12865_s3 + $0x50] sm:$0xff]  ;;  %12910 = vst [vmem:[#allocation12_spill] sm:$0xff] %v10896_v11 }
 0x87b   :  { %2528 = vadd.xlane.f32.xlu0 %v2527_v41  ;;  %2531 = vadd.xlane.f32.xlu1 %v2530_v8  ;;  %v2533_v41 = vsel %vm709_vm5, %v2457_v46, 0.0  ;;  %v10830_v8 = vld [vmem:[%s12865_s3 + $0xd8] sm:$0xff]  ;;  %v2551_v26 = vsel %vm709_vm5, %v2463_v50, 0.0  ;;  %v2442_v56 = vmul.f32 %v10863_v9, %v2370_v33  ;;  %12908 = vst [vmem:[#allocation18_spill] sm:$0xff] %v10884_v4 }
 0x87c   :  { %12901 = vst [vmem:[#allocation17_spill] sm:$0xff] %v10830_v8  ;;  %v2462_v29 = vmul.f32 %v10830_v8, %v2410_v62  ;;  %v2445_v46 = vmul.f32 %v10884_v4, %v2378_v44  ;;  %v10890_v62 = vld [vmem:[%s12865_s3 + $0x68] sm:$0xff] }
 0x87d   :  { %v2488_v18 = vsel %vm709_vm5, %v2442_v56, 0.0  ;;  %12909 = vst [vmem:[#allocation21_spill] sm:$0xff] %v10890_v62  ;;  %v10930_v56 = vld [vmem:[%s12865_s3 + $0xf0] sm:$0xff] }
 0x87e   :  { %12914 = vst [vmem:[#allocation24_spill] sm:$0xff] %v10930_v56 }
 0x87f   :  { %2540 = vadd.xlane.f32.xlu0 %v2539_v27  ;;  %2543 = vadd.xlane.f32.xlu1 %v2542_v52  ;;  %v2548_v27 = vsel %vm709_vm5, %v2462_v29, 0.0  ;;  %v2545_v52 = vsel %vm709_vm5, %v2461_v32, 0.0  ;;  %v2354_v32 = vcombine.high %v10800_v57, %v10800_v57 }
 0x881   :  { %v2418_v50 = vrot.slane %v2354_v32, %v9989_v15 }
 0x883   :  { %2477 = vadd.xlane.f32.xlu1 %v2476_v31  ;;  %2474 = vadd.xlane.f32.xlu0 %v2473_v25  ;;  %v2303_v31 = vcombine.high %v10747_v36, %v10747_v36  ;;  %v2554_v25 = vsel %vm709_vm5, %v2464_v20, 0.0  ;;  %v10915_v20 = vld [vmem:[%s12865_s3 + $0x70] sm:$0xff] }
 0x884   :  { %12912 = vst [vmem:[#allocation22_spill] sm:$0xff] %v10915_v20 }
 0x885   :  { %v2382_v36 = vrot.slane %v2303_v31, %v9989_v15 }
 0x887   :  { %2483 = vadd.xlane.f32.xlu1 %v2482_v34  ;;  %2480 = vadd.xlane.f32.xlu0 %v2479_v49  ;;  %v2441_v34 = vmul.f32 %v10869_v45, %v2370_v33  ;;  %v2305_v49 = vcombine.high %v2301_v42, %v2301_v42  ;;  %v2448_v23 = vmul.f32 %v10890_v62, %v2382_v36 }
 0x888   :  { %v2447_v13 = vmul.f32 %v10896_v11, %v2382_v36 }
 0x889   :  { %v2386_v29 = vrot.slane %v2305_v49, %v9989_v15  ;;  %v2506_v33 = vsel %vm709_vm5, %v2448_v23, 0.0 }
 0x88a   :  { %v2503_v42 = vsel %vm709_vm5, %v2447_v13, 0.0 }
 0x88b   :  { %2495 = vadd.xlane.f32.xlu1 %v2494_v24  ;;  %2492 = vadd.xlane.f32.xlu0 %v2491_v21  ;;  %v2485_v24 = vsel %vm709_vm5, %v2441_v34, 0.0  ;;  %v2446_v21 = vmul.f32 %v10878_v2, %v2378_v44  ;;  %v2449_v57 = vmul.f32 %v10915_v20, %v2386_v29  ;;  %v2465_v34 = vmul.f32 %v10930_v56, %v2418_v50 }
 0x88d   :  { %v2509_v31 = vsel %vm709_vm5, %v2449_v57, 0.0  ;;  %v2557_v49 = vsel %vm709_vm5, %v2465_v34, 0.0 }
 0x88f   :  { %2537 = vadd.xlane.f32.xlu1 %v2536_v40  ;;  %2534 = vadd.xlane.f32.xlu0 %v2533_v41  ;;  %v2500_v40 = vsel %vm709_vm5, %v2446_v21, 0.0  ;;  %v2497_v41 = vsel %vm709_vm5, %v2445_v46, 0.0 }
 0x893   :  { %2549 = vadd.xlane.f32.xlu1 %v2548_v27  ;;  %2546 = vadd.xlane.f32.xlu0 %v2545_v52  ;;  %v10909_v27 = vld [vmem:[%s12865_s3 + $0x78] sm:$0xff] }
 0x894   :  { %12911 = vst [vmem:[#allocation20_spill] sm:$0xff] %v10909_v27  ;;  %v2450_v52 = vmul.f32 %v10909_v27, %v2386_v29 }
 0x896   :  { %v2512_v44 = vsel %vm709_vm5, %v2450_v52, 0.0 }
 0x897   :  { %2555 = vadd.xlane.f32.xlu1 %v2554_v25  ;;  %2552 = vadd.xlane.f32.xlu0 %v2551_v26  ;;  %v10924_v25 = vld [vmem:[%s12865_s3 + $0xf8] sm:$0xff] }
 0x898   :  { %12913 = vst [vmem:[#allocation23_spill] sm:$0xff] %v10924_v25  ;;  %v2466_v26 = vmul.f32 %v10924_v25, %v2418_v50 }
 0x89a   :  { %v2560_v36 = vsel %vm709_vm5, %v2466_v26, 0.0 }
 0x89b   :  { %2489 = vadd.xlane.f32.xlu1 %v2488_v18  ;;  %2486 = vadd.xlane.f32.xlu0 %v2485_v24 }
 0x89f   :  { %2501 = vadd.xlane.f32.xlu1 %v2500_v40  ;;  %2498 = vadd.xlane.f32.xlu0 %v2497_v41 }
 0x8a3   :  { %2507 = vadd.xlane.f32.xlu1 %v2506_v33  ;;  %2504 = vadd.xlane.f32.xlu0 %v2503_v42 }
 0x8a7   :  { %2513 = vadd.xlane.f32.xlu1 %v2512_v44  ;;  %2510 = vadd.xlane.f32.xlu0 %v2509_v31 }
 0x8ab   :  { %2561 = vadd.xlane.f32.xlu1 %v2560_v36  ;;  %2558 = vadd.xlane.f32.xlu0 %v2557_v49 }
 0x8fc   :  { %v2520_v18 = vpop.xlane.xlu1 %2519  ;;  %v2517_v24 = vpop.xlane.xlu0 %2516 }
 0x8fd   :  { %v2682_v61 = vrot.slane %v2520_v18, %v10306_v3  ;;  %v2678_v45 = vrot.slane %v2517_v24, %v10303_v1 }
 0x8ff   :  { %v2683_v24 = vsel %vm853_vm6, %v2682_v61, %v2678_v45 }
 0x900   :  { %v2472_v21 = vpop.xlane.xlu0 %2471  ;;  %v2469_v46 = vpop.xlane.xlu1 %2468 }
 0x901   :  { %v2610_v12 = vrot.slane %v2472_v21, %v10306_v3 }
 0x904   :  { %v2523_v23 = vpop.xlane.xlu0 %2522  ;;  %v2526_v13 = vpop.xlane.xlu1 %2525 }
 0x905   :  { %v2687_v2 = vrot.slane %v2523_v23, %v10303_v1  ;;  %v2691_v11 = vrot.slane %v2526_v13, %v10306_v3  ;;  %v2606_v23 = vrot.slane %v2469_v46, %v10303_v1 }
 0x907   :  { %v2692_v13 = vsel %vm853_vm6, %v2691_v11, %v2687_v2 }
 0x908   :  { %v2529_v40 = vpop.xlane.xlu0 %2528  ;;  %v2532_v41 = vpop.xlane.xlu1 %2531  ;;  %v2754_v46 = vsel %vm990_vm7, %v2692_v13, %v2683_v24 }
 0x909   :  { %v2696_v9 = vrot.slane %v2529_v40, %v10303_v1  ;;  %v2700_v4 = vrot.slane %v2532_v41, %v10306_v3 }
 0x90b   :  { %v2701_v40 = vsel %vm853_vm6, %v2700_v4, %v2696_v9  ;;  %v2611_v4 = vsel %vm853_vm6, %v2610_v12, %v2606_v23 }
 0x90c   :  { %v10935_v29 = vpop.xlane.xlu0 %2540  ;;  %v10937_v32 = vpop.xlane.xlu1 %2543  ;;  %v2755_v11 = vsel %vm992_vm8, %v2701_v40, %v2754_v46 }
 0x90d   :  { %v2714_v61 = vrot.slane %v10935_v29, %v10303_v1 }
 0x910   :  { %v2478_v33 = vpop.xlane.xlu1 %2477  ;;  %v2475_v42 = vpop.xlane.xlu0 %2474 }
 0x911   :  { %v2619_v8 = vrot.slane %v2478_v33, %v10306_v3  ;;  %v2615_v35 = vrot.slane %v2475_v42, %v10303_v1 }
 0x913   :  { %v2620_v33 = vsel %vm853_vm6, %v2619_v8, %v2615_v35  ;;  %v2718_v8 = vrot.slane %v10937_v32, %v10306_v3 }
 0x914   :  { %v2484_v52 = vpop.xlane.xlu1 %2483  ;;  %v2481_v57 = vpop.xlane.xlu0 %2480  ;;  %v2747_v35 = vsel %vm990_vm7, %v2620_v33, %v2611_v4 }
 0x915   :  { %v2628_v41 = vrot.slane %v2484_v52, %v10306_v3  ;;  %v2624_v18 = vrot.slane %v2481_v57, %v10303_v1 }
 0x917   :  { %v2629_v45 = vsel %vm853_vm6, %v2628_v41, %v2624_v18 }
 0x918   :  { %v10939_v50 = vpop.xlane.xlu1 %2495  ;;  %v10941_v44 = vpop.xlane.xlu0 %2492 }
 0x919   :  { %v2646_v52 = vrot.slane %v10939_v50, %v10306_v3 }
 0x91c   :  { %v2538_v31 = vpop.xlane.xlu1 %2537  ;;  %v2535_v26 = vpop.xlane.xlu0 %2534 }
 0x91d   :  { %v2709_v42 = vrot.slane %v2538_v31, %v10306_v3  ;;  %v2705_v54 = vrot.slane %v2535_v26, %v10303_v1 }
 0x91f   :  { %v2710_v12 = vsel %vm853_vm6, %v2709_v42, %v2705_v54 }
 0x920   :  { %v2550_v34 = vpop.xlane.xlu1 %2549  ;;  %v2547_v36 = vpop.xlane.xlu0 %2546  ;;  %v2756_v40 = vsel %vm994_vm9, %v2710_v12, %v2755_v11  ;;  %v11015_v12 = vld [vmem:[%s12881_s27 + $0x8] sm:$0xff] }
 0x921   :  { %v2723_v57 = vrot.slane %v2547_v36, %v10303_v1 }
 0x924   :  { %v10943_v49 = vpop.xlane.xlu1 %2555  ;;  %v2553_v25 = vpop.xlane.xlu0 %2552 }
 0x925   :  { %v2736_v29 = vrot.slane %v10943_v49, %v10306_v3  ;;  %v2732_v26 = vrot.slane %v2553_v25, %v10303_v1  ;;  %v2748_v49 = vsel %vm992_vm8, %v2629_v45, %v2747_v35 }
 0x927   :  { %v2737_v18 = vsel %vm853_vm6, %v2736_v29, %v2732_v26 }
 0x928   :  { %v2490_v27 = vpop.xlane.xlu1 %2489  ;;  %v2487_v56 = vpop.xlane.xlu0 %2486 }
 0x929   :  { %v2637_v2 = vrot.slane %v2490_v27, %v10306_v3  ;;  %v2633_v9 = vrot.slane %v2487_v56, %v10303_v1  ;;  %v2642_v27 = vrot.slane %v10941_v44, %v10303_v1  ;;  %v2727_v56 = vrot.slane %v2550_v34, %v10306_v3 }
 0x92b   :  { %v2638_v23 = vsel %vm853_vm6, %v2637_v2, %v2633_v9  ;;  %v2647_v24 = vsel %vm853_vm6, %v2646_v52, %v2642_v27 }
 0x92c   :  { %v2502_v62 = vpop.xlane.xlu1 %2501  ;;  %v2499_v20 = vpop.xlane.xlu0 %2498 }
 0x92d   :  { %v2655_v50 = vrot.slane %v2502_v62, %v10306_v3  ;;  %v2651_v13 = vrot.slane %v2499_v20, %v10303_v1  ;;  %v2728_v62 = vsel %vm853_vm6, %v2727_v56, %v2723_v57  ;;  %v2749_v20 = vsel %vm994_vm9, %v2638_v23, %v2748_v49  ;;  %v11021_v57 = vld [vmem:[%s12881_s27] sm:$0xff] }
 0x92e   :  { %v2750_v2 = vsel %vm996_vm10, %v2647_v24, %v2749_v20 }
 0x930   :  { %v2508_v37 = vpop.xlane.xlu1 %2507  ;;  %v2505_v48 = vpop.xlane.xlu0 %2504 }
 0x931   :  { %v2664_v44 = vrot.slane %v2508_v37, %v10306_v3  ;;  %v2660_v54 = vrot.slane %v2505_v48, %v10303_v1  ;;  %v2719_v37 = vsel %vm853_vm6, %v2718_v8, %v2714_v61  ;;  %v2656_v48 = vsel %vm853_vm6, %v2655_v50, %v2651_v13 }
 0x932   :  { %v2757_v42 = vsel %vm996_vm10, %v2719_v37, %v2756_v40  ;;  %v2751_v4 = vsel %vm998_vm11, %v2656_v48, %v2750_v2 }
 0x934   :  { %v2514_v7 = vpop.xlane.xlu1 %2513  ;;  %v2511_v21 = vpop.xlane.xlu0 %2510 }
 0x935   :  { %v2673_v25 = vrot.slane %v2514_v7, %v10306_v3  ;;  %v2669_v41 = vrot.slane %v2511_v21, %v10303_v1  ;;  %v2665_v7 = vsel %vm853_vm6, %v2664_v44, %v2660_v54  ;;  %v2758_v21 = vsel %vm998_vm11, %v2728_v62, %v2757_v42 }
 0x936   :  { %v2759_v9 = vsel %vm1000_vm13, %v2737_v18, %v2758_v21  ;;  %v2752_v8 = vsel %vm1000_vm13, %v2665_v7, %v2751_v4 }
 0x937   :  { %v2674_v46 = vsel %vm853_vm6, %v2673_v25, %v2669_v41  ;;  %v407_v25 = vld [vmem:[%s12748_s8 + $0x10] sm:$0xff] }
 0x938   :  { %v2562_v32 = vpop.xlane.xlu1 %2561  ;;  %v2559_v31 = vpop.xlane.xlu0 %2558  ;;  %v2753_v45 = vsel %vm1002_vm12, %v2674_v46, %v2752_v8  ;;  %8870 = vmatprep.subr.mxu0 %v407_v25 }
 0x939   :  { %v2745_v34 = vrot.slane %v2562_v32, %v10306_v3  ;;  %v2741_v36 = vrot.slane %v2559_v31, %v10303_v1  ;;  %8871 = vmatpush3.msra.mxu0 %v407_v25 }
 0x93b   :  { %v2746_v33 = vsel %vm853_vm6, %v2745_v34, %v2741_v36 }
 0x93c   :  { %v2760_v11 = vsel %vm1002_vm12, %v2746_v33, %v2759_v9 }
 0x943   :  { %v8862_v61 = vpop.f32.mrb[8].mxu0 }
 0x944   :  { %v2843_v35 = vadd.f32 %v8862_v61, %v2760_v11  ;;  %v2837_v52 = vpop.f32.mrb[9].mxu0 }
 0x945   :  { %v2838_v27 = vadd.f32 %v2837_v52, %v2753_v45 }
 0x946   :  { %v2847_v56 = vadd.f32 %v11015_v12, %v2843_v35 }
 0x947   :  { %v2846_v29 = vadd.f32 %v11021_v57, %v2838_v27 }
 0x948   :  { %v2851_v32 = vsel %vm709_vm5, %v2847_v56, -inf }
 0x949   :  { %2852 = vmax.xlane.f32.xlu1 %v2851_v32  ;;  %v2848_v31 = vsel %vm709_vm5, %v2846_v29, -inf }
 0x94a   :  { %2849 = vmax.xlane.f32.xlu0 %v2848_v31 }
 0x9d6   :  { %v2853_v26 = vpop.xlane.xlu1 %2852 }
 0x9d7   :  { %v2855_v23 = vsub.f32 %v2847_v56, %v2853_v26  ;;  %v2850_v50 = vpop.xlane.xlu0 %2849 }
 0x9d8   :  { %v2854_v13 = vsub.f32 %v2846_v29, %v2850_v50 }
 0x9d9   :  { %v2858_v44 = vmul.f32 1.442695, %v2855_v23 }
 0x9da   :  { %v2856_v54 = vmul.f32 1.442695, %v2854_v13 }
 0x9db   :  { %9511 = vpow2.f32 %v2858_v44 }
 0x9dc   :  { %9513 = vpow2.f32 %v2856_v54 }
 0x9e5   :  { %v9512_v34 = vpop.eup %9511 }
 0x9e6   :  { %v9514_v36 = vpop.eup %9513  ;;  %v2863_v49 = vsel %vm709_vm5, %v9512_v34, 0.0 }
 0x9e7   :  { %2864 = vadd.xlane.f32.xlu1 %v2863_v49  ;;  %v2860_v40 = vsel %vm709_vm5, %v9514_v36, 0.0 }
 0x9e8   :  { %2861 = vadd.xlane.f32.xlu0 %v2860_v40 }
 0x9f8   :  { %9426 = vrot.lane.b32.xlu1 %v9958_v59, %s12805_s1 }
 0x9fc   :  { %3040 = vrot.lane.b32.xlu1 %v9948_v55, %s12805_s1 }
 0x9fe   :  { %9421 = vrot.lane.b32.xlu0 %v9944_v53, %s12807_s24 }
 0xa00   :  { %9431 = vrot.lane.b32.xlu1 %v9944_v53, %s12804_s16  ;;  %s12935_s16 = sld [smem:[#allocation31_spill]] }
 0xa02   :  { %3042 = vrot.lane.b32.xlu0 %v9964_v63, %s12805_s1 }
 0xa04   :  { %3441 = vrot.lane.b32.xlu1 %v9976_v5, %s12805_s1 }
 0xa06   :  { %3439 = vrot.lane.b32.xlu0 %v9966_v0, %s12805_s1 }
 0xa74   :  { %v2865_v55 = vpop.xlane.xlu1 %2864 }
 0xa75   :  { %9515 = vrcp.f32 %v2865_v55  ;;  %v2862_v59 = vpop.xlane.xlu0 %2861 }
 0xa76   :  { %9517 = vrcp.f32 %v2862_v59 }
 0xa78   :  { %v9427_v41 = vpop.permute.xlu1 %9426 }
 0xa79   :  { %v9422_v62 = vpop.permute.xlu0 %9421  ;;  %v9429_v20 = vunpack.i.h.bf16 %v9427_v41  ;;  %v9428_v63 = vunpack.i.l.bf16 %v9427_v41 }
 0xa7a   :  { %v9424_v37 = vunpack.i.h.bf16 %v9422_v62  ;;  %v9423_v48 = vunpack.i.l.bf16 %v9422_v62 }
 0xa7b   :  { %v9201_v33 = vpack.c.bf16 %v9429_v20, %v9428_v63 }
 0xa7c   :  { %v3041_v18 = vpop.permute.xlu1 %3040  ;;  %v9197_v24 = vpack.c.bf16 %v9424_v37, %v9423_v48 }
 0xa7d   :  { %v3043_v4 = vpop.permute.xlu0 %3042 }
 0xa7e   :  { %9198 = vmatprep.subr.bf16.mxu1 %v9197_v24 }
 0xa7f   :  { %v9516_v5 = vpop.eup %9515  ;;  %9200 = vmatpush3.bf16.msra.mxu1 %v9197_v24 }
 0xa80   :  { %v9518_v42 = vpop.eup %9517  ;;  %v9432_v7 = vpop.permute.xlu1 %9431  ;;  %9203 = vmatprep.subr.msk.bf16.mxu1 %vm9954_vm4, %v9201_v33  ;;  %v2869_v2 = vmul.f32 %v9516_v5, %v9512_v34 }
 0xa81   :  { %v9434_v0 = vunpack.i.h.bf16 %v9432_v7  ;;  %v9433_v21 = vunpack.i.l.bf16 %v9432_v7  ;;  %v2868_v46 = vmul.f32 %v9518_v42, %v9514_v36  ;;  %v3440_v8 = vpop.permute.xlu0 %3439 }
 0xa83   :  { %v9207_v9 = vpack.c.bf16 %v9434_v0, %v9433_v21  ;;  %8867 = vmatprep.mubr.msk.f32.mxu1 %vm709_vm5, %v2868_v46 }
 0xa84   :  { %8868 = vmatmul.mubr.msk.f32.vlgmr.msra.gmra.mrb[14].mxu1 %vm709_vm5, %v2869_v2  ;;  %v3442_v35 = vpop.permute.xlu1 %3441 }
 0xa85   :  { %8879 = vmatprep.mubr.msk.f32.mxu1 %vm409_vm3, %v3041_v18  ;;  %9209 = vmatprep.subr.msk.bf16.mxu0 %vm9954_vm4, %v9207_v9 }
 0xa88   :  { %9206 = vmatpush3.bf16.xpose.msk.msra.mxu1 %vm9954_vm4, %v9201_v33 }
 0xa8f   :  { %8880 = vmatmul.mubr.msk.f32.vlgmr.msra.gmra.mrb[16].mxu1 %vm409_vm3, %v3043_v4 }
 0xb57   :  { %v8869_v11 = vpop.f32.mrb[14].mxu1 }
 0xb58   :  { %v2948_v61 = vpop.f32.mrb[15].mxu1 }
 0xb59   :  { %8872 = vmatprep.mubr.msk.f32.mxu0 %vm409_vm3, %v2948_v61 }
 0xb5a   :  { %8873 = vmatmul.mubr.msk.f32.vlgmr.msra.gmra.mrb[6].mxu0 %vm409_vm3, %v8869_v11 }
 0xb5b   :  { %9212 = vmatpush3.bf16.xpose.msk.msra.mxu0 %vm9954_vm4, %v9207_v9  ;;  %8886 = vmatprep.mubr.msk.f32.mxu0 %vm409_vm3, %v3440_v8 }
 0xb62   :  { %8887 = vmatmul.mubr.msk.f32.vlgmr.msra.gmra.mrb[10].mxu0 %vm409_vm3, %v3442_v35  ;;  %v8881_v45 = vpop.f32.mrb[16].mxu1 }
 0xb63   :  { %v3189_v52 = vrot.slane %v8881_v45, %v9984_v10  ;;  %v3122_v27 = vpop.f32.mrb[17].mxu1  ;;  %v3182_v26 = vcombine.high %v8881_v45, %v8881_v45 }
 0xb64   :  { %v3140_v56 = vrot.slane %v3122_v27, %v9984_v10 }
 0xb65   :  { %v3197_v29 = vcombine.high %v3189_v52, %v3189_v52  ;;  %v3205_v32 = vrot.slane %v3189_v52, %v9984_v10  ;;  %v3196_v34 = vrot.slane %v3182_v26, %v9984_v10 }
 0xb66   :  { %v3156_v31 = vrot.slane %v3140_v56, %v9984_v10  ;;  %v3148_v62 = vcombine.high %v3140_v56, %v3140_v56 }
 0xb67   :  { %v3219_v23 = vrot.slane %v3197_v29, %v9984_v10  ;;  %v3266_v50 = vrot.slane %v3205_v32, %v9989_v15  ;;  %v3227_v36 = vcombine.high %v3205_v32, %v3205_v32  ;;  %v3212_v41 = vrot.slane %v3196_v34, %v9984_v10 }
 0xb68   :  { %v3234_v13 = vrot.slane %v3156_v31, %v9989_v15  ;;  %v3178_v18 = vcombine.high %v3156_v31, %v3156_v31  ;;  %v12916_v31 = vld [vmem:[#allocation14_spill] sm:$0xff] }
 0xb69   :  { %v3328_v44 = vmul.f32 %v10659_v28, %v3266_v50  ;;  %v3327_v54 = vmul.f32 %v10665_v30, %v3266_v50  ;;  %v3270_v49 = vrot.slane %v3219_v23, %v9989_v15  ;;  %v3133_v28 = vcombine.high %v3122_v27, %v3122_v27 }
 0xb6a   :  { %v3312_v55 = vmul.f32 %v10679_v22, %v3234_v13  ;;  %v3311_v59 = vmul.f32 %v10685_v19, %v3234_v13  ;;  %v3274_v30 = vrot.slane %v3227_v36, %v9989_v15  ;;  %v3170_v19 = vrot.slane %v3148_v62, %v9984_v10  ;;  %v12917_v13 = vld [vmem:[#allocation9_spill] sm:$0xff]  ;;  %v12920_v62 = vld [vmem:[#allocation16_spill] sm:$0xff] }
 0xb6b   :  { %v3394_v40 = vsel %vm709_vm5, %v3328_v44, 0.0  ;;  %v3391_v25 = vsel %vm709_vm5, %v3327_v54, 0.0  ;;  %v3329_v37 = vmul.f32 %v10698_v47, %v3270_v49  ;;  %v3330_v48 = vmul.f32 %v10704_v17, %v3270_v49 }
 0xb6c   :  { %3395 = vadd.xlane.f32.xlu0 %v3394_v40  ;;  %3392 = vadd.xlane.f32.xlu1 %v3391_v25  ;;  %v3346_v20 = vsel %vm709_vm5, %v3312_v55, 0.0  ;;  %v3343_v63 = vsel %vm709_vm5, %v3311_v59, 0.0  ;;  %v3147_v22 = vrot.slane %v3133_v28, %v9984_v10  ;;  %v3282_v24 = vrot.slane %v3212_v41, %v9989_v15  ;;  %v12919_v25 = vld [vmem:[#allocation7_spill] sm:$0xff] }
 0xb6d   :  { %v3397_v33 = vsel %vm709_vm5, %v3329_v37, 0.0  ;;  %v3400_v5 = vsel %vm709_vm5, %v3330_v48, 0.0  ;;  %v3331_v42 = vmul.f32 %v10717_v38, %v3274_v30  ;;  %v3332_v7 = vmul.f32 %v10723_v43, %v3274_v30 }
 0xb6e   :  { %v3163_v47 = vrot.slane %v3147_v22, %v9984_v10  ;;  %v3242_v17 = vrot.slane %v3178_v18, %v9989_v15  ;;  %v3238_v0 = vrot.slane %v3170_v19, %v9989_v15  ;;  %v3335_v2 = vmul.f32 %v10736_v14, %v3282_v24  ;;  %v12922_v18 = vld [vmem:[#allocation10_spill] sm:$0xff] }
 0xb6f   :  { %v3403_v21 = vsel %vm709_vm5, %v3331_v42, 0.0  ;;  %v3406_v46 = vsel %vm709_vm5, %v3332_v7, 0.0  ;;  %v3336_v9 = vmul.f32 %v10742_v6, %v3282_v24  ;;  %v3198_v38 = vcombine.high %v3196_v34, %v3196_v34  ;;  %v12918_v34 = vld [vmem:[#allocation8_spill] sm:$0xff] }
 0xb70   :  { %3347 = vadd.xlane.f32.xlu1 %v3346_v20  ;;  %3344 = vadd.xlane.f32.xlu0 %v3343_v63  ;;  %v3315_v43 = vmul.f32 %v10779_v60, %v3242_v17  ;;  %v3250_v4 = vrot.slane %v3163_v47, %v9989_v15  ;;  %v3415_v11 = vsel %vm709_vm5, %v3335_v2, 0.0  ;;  %v3313_v8 = vmul.f32 %v10761_v16, %v3238_v0  ;;  %v12915_v16 = vld [vmem:[#allocation15_spill] sm:$0xff] }
 0xb71   :  { %v3418_v61 = vsel %vm709_vm5, %v3336_v9, 0.0  ;;  %v3229_v35 = vcombine.high %v3219_v23, %v3219_v23  ;;  %v3314_v14 = vmul.f32 %v10755_v39, %v3238_v0  ;;  %v3226_v27 = vrot.slane %v3198_v38, %v9984_v10  ;;  %v12925_v2 = vld [vmem:[#allocation19_spill] sm:$0xff]  ;;  %v12926_v38 = vld [vmem:[#allocation12_spill] sm:$0xff] }
 0xb72   :  { %v3319_v6 = vmul.f32 %v10793_v51, %v3250_v4  ;;  %v3355_v45 = vsel %vm709_vm5, %v3315_v43, 0.0  ;;  %v3349_v52 = vsel %vm709_vm5, %v3313_v8, 0.0  ;;  %v3316_v29 = vmul.f32 %v12915_v16, %v3242_v17 }
 0xb73   :  { %v3278_v60 = vrot.slane %v3229_v35, %v9989_v15  ;;  %v3352_v56 = vsel %vm709_vm5, %v3314_v14, 0.0  ;;  %v3286_v51 = vrot.slane %v3226_v27, %v9989_v15  ;;  %v3228_v26 = vcombine.high %v3212_v41, %v3212_v41 }
 0xb74   :  { %3398 = vadd.xlane.f32.xlu1 %v3397_v33  ;;  %3401 = vadd.xlane.f32.xlu0 %v3400_v5  ;;  %v3367_v32 = vsel %vm709_vm5, %v3319_v6, 0.0  ;;  %v3149_v23 = vcombine.high %v3147_v22, %v3147_v22  ;;  %v3358_v50 = vsel %vm709_vm5, %v3316_v29, 0.0  ;;  %v3320_v44 = vmul.f32 %v12917_v13, %v3250_v4  ;;  %v12921_v22 = vld [vmem:[#allocation17_spill] sm:$0xff]  ;;  %v12923_v5 = vld [vmem:[#allocation11_spill] sm:$0xff] }
 0xb75   :  { %v3333_v39 = vmul.f32 %v12916_v31, %v3278_v60  ;;  %v3337_v36 = vmul.f32 %v12918_v34, %v3286_v51  ;;  %v3290_v49 = vrot.slane %v3228_v26, %v9989_v15  ;;  %v3180_v40 = vcombine.high %v3170_v19, %v3170_v19  ;;  %v12927_v6 = vld [vmem:[#allocation13_spill] sm:$0xff]  ;;  %v12930_v31 = vld [vmem:[#allocation24_spill] sm:$0xff] }
 0xb76   :  { %v3334_v55 = vmul.f32 %v12919_v25, %v3278_v60  ;;  %v3177_v59 = vrot.slane %v3149_v23, %v9984_v10  ;;  %v3370_v41 = vsel %vm709_vm5, %v3320_v44, 0.0  ;;  %v3179_v37 = vcombine.high %v3163_v47, %v3163_v47  ;;  %v12931_v23 = vld [vmem:[#allocation20_spill] sm:$0xff]  ;;  %v12932_v44 = vld [vmem:[#allocation23_spill] sm:$0xff] }
 0xb77   :  { %v3409_v54 = vsel %vm709_vm5, %v3333_v39, 0.0  ;;  %v3421_v28 = vsel %vm709_vm5, %v3337_v36, 0.0  ;;  %v3339_v30 = vmul.f32 %v12920_v62, %v3290_v49  ;;  %v3246_v20 = vrot.slane %v3180_v40, %v9989_v15 }
 0xb78   :  { %3404 = vadd.xlane.f32.xlu1 %v3403_v21  ;;  %3407 = vadd.xlane.f32.xlu0 %v3406_v46  ;;  %v3412_v63 = vsel %vm709_vm5, %v3334_v55, 0.0  ;;  %v3338_v19 = vmul.f32 %v12921_v22, %v3286_v51  ;;  %v3254_v33 = vrot.slane %v3177_v59, %v9989_v15  ;;  %v3340_v42 = vmul.f32 %v12923_v5, %v3290_v49  ;;  %v12924_v21 = vld [vmem:[#allocation18_spill] sm:$0xff] }
 0xb79   :  { %v3427_v48 = vsel %vm709_vm5, %v3339_v30, 0.0  ;;  %v3317_v24 = vmul.f32 %v12922_v18, %v3246_v20  ;;  %v3258_v7 = vrot.slane %v3179_v37, %v9989_v15  ;;  %v3181_v46 = vcombine.high %v3177_v59, %v3177_v59 }
 0xb7a   :  { %v3424_v17 = vsel %vm709_vm5, %v3338_v19, 0.0  ;;  %v3321_v47 = vmul.f32 %v12924_v21, %v3254_v33  ;;  %v3318_v9 = vmul.f32 %v12925_v2, %v3246_v20  ;;  %v3430_v4 = vsel %vm709_vm5, %v3340_v42, 0.0 }
 0xb7b   :  { %v3361_v0 = vsel %vm709_vm5, %v3317_v24, 0.0  ;;  %v3323_v43 = vmul.f32 %v12926_v38, %v3258_v7  ;;  %v3230_v8 = vcombine.high %v3226_v27, %v3226_v27 }
 0xb7c   :  { %3416 = vadd.xlane.f32.xlu1 %v3415_v11  ;;  %3419 = vadd.xlane.f32.xlu0 %v3418_v61  ;;  %v3373_v11 = vsel %vm709_vm5, %v3321_v47, 0.0  ;;  %v3262_v61 = vrot.slane %v3181_v46, %v9989_v15  ;;  %v3364_v35 = vsel %vm709_vm5, %v3318_v9, 0.0 }
 0xb7d   :  { %v3379_v14 = vsel %vm709_vm5, %v3323_v43, 0.0 }
 0xb80   :  { %3356 = vadd.xlane.f32.xlu1 %v3355_v45  ;;  %3350 = vadd.xlane.f32.xlu0 %v3349_v52  ;;  %v3322_v45 = vmul.f32 %v12927_v6, %v3254_v33  ;;  %v12928_v52 = vld [vmem:[#allocation22_spill] sm:$0xff] }
 0xb81   :  { %v3325_v60 = vmul.f32 %v12928_v52, %v3262_v61 }
 0xb82   :  { %v3376_v16 = vsel %vm709_vm5, %v3322_v45, 0.0 }
 0xb83   :  { %v3385_v29 = vsel %vm709_vm5, %v3325_v60, 0.0 }
 0xb84   :  { %3353 = vadd.xlane.f32.xlu0 %v3352_v56  ;;  %3368 = vadd.xlane.f32.xlu1 %v3367_v32  ;;  %v3294_v56 = vrot.slane %v3230_v8, %v9989_v15  ;;  %v12929_v32 = vld [vmem:[#allocation21_spill] sm:$0xff] }
 0xb85   :  { %v3324_v27 = vmul.f32 %v12929_v32, %v3258_v7 }
 0xb86   :  { %v3341_v39 = vmul.f32 %v12930_v31, %v3294_v56 }
 0xb87   :  { %v3382_v51 = vsel %vm709_vm5, %v3324_v27, 0.0 }
 0xb88   :  { %3359 = vadd.xlane.f32.xlu0 %v3358_v50  ;;  %3410 = vadd.xlane.f32.xlu1 %v3409_v54  ;;  %v3433_v26 = vsel %vm709_vm5, %v3341_v39, 0.0  ;;  %v3326_v50 = vmul.f32 %v12931_v23, %v3262_v61  ;;  %v3342_v54 = vmul.f32 %v12932_v44, %v3294_v56 }
 0xb8a   :  { %v3388_v13 = vsel %vm709_vm5, %v3326_v50, 0.0  ;;  %v3436_v34 = vsel %vm709_vm5, %v3342_v54, 0.0 }
 0xb8c   :  { %3371 = vadd.xlane.f32.xlu0 %v3370_v41  ;;  %3422 = vadd.xlane.f32.xlu1 %v3421_v28 }
 0xb90   :  { %3413 = vadd.xlane.f32.xlu0 %v3412_v63  ;;  %3428 = vadd.xlane.f32.xlu1 %v3427_v48 }
 0xb94   :  { %3425 = vadd.xlane.f32.xlu0 %v3424_v17  ;;  %3362 = vadd.xlane.f32.xlu1 %v3361_v0 }
 0xb98   :  { %3431 = vadd.xlane.f32.xlu0 %v3430_v4  ;;  %3374 = vadd.xlane.f32.xlu1 %v3373_v11 }
 0xb9c   :  { %3365 = vadd.xlane.f32.xlu0 %v3364_v35  ;;  %3380 = vadd.xlane.f32.xlu1 %v3379_v14 }
 0xba0   :  { %3377 = vadd.xlane.f32.xlu0 %v3376_v16  ;;  %3386 = vadd.xlane.f32.xlu1 %v3385_v29 }
 0xba4   :  { %3383 = vadd.xlane.f32.xlu0 %v3382_v51  ;;  %3434 = vadd.xlane.f32.xlu1 %v3433_v26 }
 0xba8   :  { %3389 = vadd.xlane.f32.xlu0 %v3388_v13 }
 0xbac   :  { %3437 = vadd.xlane.f32.xlu0 %v3436_v34 }
 0xbf9   :  { %v3396_v36 = vpop.xlane.xlu0 %3395  ;;  %v3393_v49 = vpop.xlane.xlu1 %3392 }
 0xbfa   :  { %v3558_v47 = vrot.slane %v3396_v36, %v10306_v3  ;;  %v3554_v38 = vrot.slane %v3393_v49, %v10303_v1 }
 0xbfc   :  { %v3559_v29 = vsel %vm853_vm6, %v3558_v47, %v3554_v38 }
 0xbfd   :  { %v3348_v40 = vpop.xlane.xlu1 %3347  ;;  %v3345_v25 = vpop.xlane.xlu0 %3344 }
 0xbfe   :  { %v3486_v43 = vrot.slane %v3348_v40, %v10306_v3  ;;  %v3482_v4 = vrot.slane %v3345_v25, %v10303_v1 }
 0xc00   :  { %v3487_v32 = vsel %vm853_vm6, %v3486_v43, %v3482_v4 }
 0xc01   :  { %v3399_v55 = vpop.xlane.xlu1 %3398  ;;  %v3402_v59 = vpop.xlane.xlu0 %3401 }
 0xc02   :  { %v3563_v46 = vrot.slane %v3399_v55, %v10303_v1  ;;  %v3567_v2 = vrot.slane %v3402_v59, %v10306_v3 }
 0xc04   :  { %v3568_v60 = vsel %vm853_vm6, %v3567_v2, %v3563_v46 }
 0xc05   :  { %v3405_v41 = vpop.xlane.xlu1 %3404  ;;  %v3408_v28 = vpop.xlane.xlu0 %3407  ;;  %v3630_v23 = vsel %vm990_vm7, %v3568_v60, %v3559_v29 }
 0xc06   :  { %v3572_v8 = vrot.slane %v3405_v41, %v10303_v1  ;;  %v3576_v35 = vrot.slane %v3408_v28, %v10306_v3 }
 0xc08   :  { %v3577_v31 = vsel %vm853_vm6, %v3576_v35, %v3572_v8 }
 0xc09   :  { %v11153_v62 = vpop.xlane.xlu1 %3416  ;;  %v11155_v30 = vpop.xlane.xlu0 %3419  ;;  %v3631_v25 = vsel %vm992_vm8, %v3577_v31, %v3630_v23 }
 0xc0d   :  { %v3357_v20 = vpop.xlane.xlu1 %3356  ;;  %v3351_v63 = vpop.xlane.xlu0 %3350 }
 0xc0e   :  { %v3491_v14 = vrot.slane %v3351_v63, %v10303_v1  ;;  %v3500_v45 = vrot.slane %v3357_v20, %v10303_v1  ;;  %v3590_v20 = vrot.slane %v11153_v62, %v10303_v1 }
 0xc11   :  { %v3354_v37 = vpop.xlane.xlu0 %3353  ;;  %v3369_v48 = vpop.xlane.xlu1 %3368 }
 0xc12   :  { %v3495_v9 = vrot.slane %v3354_v37, %v10306_v3  ;;  %v3518_v55 = vrot.slane %v3369_v48, %v10303_v1 }
 0xc14   :  { %v3496_v56 = vsel %vm853_vm6, %v3495_v9, %v3491_v14 }
 0xc15   :  { %v3360_v22 = vpop.xlane.xlu0 %3359  ;;  %v3411_v19 = vpop.xlane.xlu1 %3410  ;;  %v3623_v50 = vsel %vm990_vm7, %v3496_v56, %v3487_v32 }
 0xc16   :  { %v3504_v11 = vrot.slane %v3360_v22, %v10306_v3  ;;  %v3581_v36 = vrot.slane %v3411_v19, %v10303_v1 }
 0xc18   :  { %v3505_v27 = vsel %vm853_vm6, %v3504_v11, %v3500_v45 }
 0xc19   :  { %v3372_v18 = vpop.xlane.xlu0 %3371  ;;  %v11157_v24 = vpop.xlane.xlu1 %3422  ;;  %v3624_v34 = vsel %vm992_vm8, %v3505_v27, %v3623_v50 }
 0xc1a   :  { %v3522_v13 = vrot.slane %v3372_v18, %v10306_v3  ;;  %v3594_v18 = vrot.slane %v11155_v30, %v10306_v3  ;;  %v3599_v62 = vrot.slane %v11157_v24, %v10303_v1 }
 0xc1c   :  { %v3523_v48 = vsel %vm853_vm6, %v3522_v13, %v3518_v55  ;;  %v3595_v43 = vsel %vm853_vm6, %v3594_v18, %v3590_v20 }
 0xc1d   :  { %v3414_v33 = vpop.xlane.xlu0 %3413  ;;  %v11159_v5 = vpop.xlane.xlu1 %3428 }
 0xc1e   :  { %v3585_v39 = vrot.slane %v3414_v33, %v10306_v3  ;;  %v3608_v30 = vrot.slane %v11159_v5, %v10303_v1 }
 0xc20   :  { %v3586_v63 = vsel %vm853_vm6, %v3585_v39, %v3581_v36 }
 0xc21   :  { %v11161_v42 = vpop.xlane.xlu0 %3425  ;;  %v3363_v7 = vpop.xlane.xlu1 %3362  ;;  %v3632_v46 = vsel %vm994_vm9, %v3586_v63, %v3631_v25 }
 0xc22   :  { %v3509_v16 = vrot.slane %v3363_v7, %v10303_v1  ;;  %v3603_v37 = vrot.slane %v11161_v42, %v10306_v3  ;;  %v3633_v8 = vsel %vm996_vm10, %v3595_v43, %v3632_v46  ;;  %v3964_v43 = vld [vmem:[%s12753_s13 + $0x8] sm:$0xff] }
 0xc24   :  { %v3604_v9 = vsel %vm853_vm6, %v3603_v37, %v3599_v62 }
 0xc25   :  { %v11163_v17 = vpop.xlane.xlu0 %3431  ;;  %v3375_v0 = vpop.xlane.xlu1 %3374 }
 0xc26   :  { %v3527_v49 = vrot.slane %v3375_v0, %v10303_v1  ;;  %v3612_v33 = vrot.slane %v11163_v17, %v10306_v3 }
 0xc28   :  { %v3613_v4 = vsel %vm853_vm6, %v3612_v33, %v3608_v30 }
 0xc29   :  { %v3366_v21 = vpop.xlane.xlu0 %3365  ;;  %v3381_v61 = vpop.xlane.xlu1 %3380 }
 0xc2a   :  { %v3513_v6 = vrot.slane %v3366_v21, %v10306_v3  ;;  %v3536_v41 = vrot.slane %v3381_v61, %v10303_v1 }
 0xc2c   :  { %v3514_v51 = vsel %vm853_vm6, %v3513_v6, %v3509_v16  ;;  %v3634_v6 = vsel %vm998_vm11, %v3604_v9, %v3633_v8 }
 0xc2d   :  { %v3378_v52 = vpop.xlane.xlu0 %3377  ;;  %v3387_v44 = vpop.xlane.xlu1 %3386  ;;  %v3625_v59 = vsel %vm994_vm9, %v3514_v51, %v3624_v34  ;;  %v3635_v45 = vsel %vm1000_vm13, %v3613_v4, %v3634_v6  ;;  %v3965_v4 = vld [vmem:[%s12753_s13 + $0x10] sm:$0xff] }
 0xc2e   :  { %v3531_v26 = vrot.slane %v3378_v52, %v10306_v3  ;;  %v3545_v21 = vrot.slane %v3387_v44, %v10303_v1  ;;  %v3626_v47 = vsel %vm996_vm10, %v3523_v48, %v3625_v59  ;;  %v12934_v48 = vld [vmem:[#allocation6_spill] sm:$0xff] }
 0xc30   :  { %v3532_v22 = vsel %vm853_vm6, %v3531_v26, %v3527_v49 }
 0xc31   :  { %v3384_v54 = vpop.xlane.xlu0 %3383  ;;  %v3435_v2 = vpop.xlane.xlu1 %3434  ;;  %v3627_v17 = vsel %vm998_vm11, %v3532_v22, %v3626_v47  ;;  %v12933_v22 = vld [vmem:[#allocation5_spill] sm:$0xff] }
 0xc32   :  { %v3540_v40 = vrot.slane %v3384_v54, %v10306_v3  ;;  %v3617_v5 = vrot.slane %v3435_v2, %v10303_v1 }
 0xc34   :  { %v3541_v0 = vsel %vm853_vm6, %v3540_v40, %v3536_v41 }
 0xc35   :  { %v8888_v28 = vpop.f32.mrb[10].mxu0  ;;  %v3390_v7 = vpop.xlane.xlu0 %3389  ;;  %v3628_v24 = vsel %vm1000_vm13, %v3541_v0, %v3627_v17 }
 0xc36   :  { %v3713_v19 = vpop.f32.mrb[11].mxu0  ;;  %v3549_v42 = vrot.slane %v3390_v7, %v10306_v3 }
 0xc38   :  { %v3550_v38 = vsel %vm853_vm6, %v3549_v42, %v3545_v21 }
 0xc39   :  { %v3629_v11 = vsel %vm1002_vm12, %v3550_v38, %v3628_v24  ;;  %v3438_v61 = vpop.xlane.xlu0 %3437  ;;  %v3963_v24 = vld [vmem:[%s12753_s13] sm:$0xff] }
 0xc3a   :  { %v3714_v35 = vadd.f32 %v3713_v19, %v3629_v11  ;;  %v3621_v14 = vrot.slane %v3438_v61, %v10306_v3  ;;  %v9217_v11 = vpack.c.bf16 %v3964_v43, %v3963_v24  ;;  %v3966_v61 = vld [vmem:[%s12753_s13 + $0x18] sm:$0xff] }
 0xc3b   :  { %v9221_v8 = vpack.c.bf16 %v3966_v61, %v3965_v4 }
 0xc3c   :  { %v3722_v52 = vadd.f32 %v11021_v57, %v3714_v35  ;;  %v3622_v60 = vsel %vm853_vm6, %v3621_v14, %v3617_v5 }
 0xc3d   :  { %v3636_v56 = vsel %vm1002_vm12, %v3622_v60, %v3635_v45 }
 0xc3e   :  { %v3724_v16 = vsel %vm709_vm5, %v3722_v52, -inf  ;;  %v3719_v29 = vadd.f32 %v8888_v28, %v3636_v56  ;;  %v8429_v56 = vld [vmem:[%s12751_s11] ss:$0 sm:$0xff] }
 0xc3f   :  { %3725 = vmax.xlane.f32.xlu1 %v3724_v16 }
 0xc40   :  { %v3723_v32 = vadd.f32 %v11015_v12, %v3719_v29  ;;  %v408_v12 = vld [vmem:[%s12748_s8 + $0x18] sm:$0xff]  ;;  %v8430_v29 = vld [vmem:[%s12752_s12] ss:$0 sm:$0xff] }
 0xc41   :  { %8896 = vmatprep.subr.mxu0 %v408_v12 }
 0xc42   :  { %v3727_v27 = vsel %vm709_vm5, %v3723_v32, -inf  ;;  %8897 = vmatpush3.msra.mxu0 %v408_v12  ;;  %v4069_v12 = vld [vmem:[%s12755_s15 + $0x20] sm:$0xff] }
 0xc43   :  { %3728 = vmax.xlane.f32.xlu0 %v3727_v27 }
 0xccc   :  { %v3726_v31 = vpop.xlane.xlu1 %3725 }
 0xccd   :  { %v3730_v39 = vsub.f32 %v3722_v52, %v3726_v31 }
 0xccf   :  { %v3732_v51 = vmul.f32 1.442695, %v3730_v39 }
 0xcd0   :  { %v3729_v26 = vpop.xlane.xlu0 %3728 }
 0xcd1   :  { %9519 = vpow2.f32 %v3732_v51  ;;  %v3731_v23 = vsub.f32 %v3723_v32, %v3729_v26 }
 0xcd3   :  { %v3734_v57 = vmul.f32 1.442695, %v3731_v23  ;;  %v4065_v23 = vld [vmem:[%s12755_s15] sm:$0xff] }
 0xcd5   :  { %9521 = vpow2.f32 %v3734_v57  ;;  %v4066_v57 = vld [vmem:[%s12755_s15 + $0x8] sm:$0xff] }
 0xcdb   :  { %v9520_v50 = vpop.eup %9519 }
 0xcdc   :  { %v3736_v13 = vsel %vm709_vm5, %v9520_v50, 0.0 }
 0xcdd   :  { %3737 = vadd.xlane.f32.xlu1 %v3736_v13  ;;  %v4067_v13 = vld [vmem:[%s12755_s15 + $0x10] sm:$0xff] }
 0xcdf   :  { %v9522_v44 = vpop.eup %9521 }
 0xce0   :  { %v3739_v54 = vsel %vm709_vm5, %v9522_v44, 0.0 }
 0xce1   :  { %3740 = vadd.xlane.f32.xlu0 %v3739_v54 }
 0xcee   :  { %9436 = vrot.lane.b32.xlu1 %v9944_v53, %s12803_s29 }
 0xd6a   :  { %v3738_v34 = vpop.xlane.xlu1 %3737 }
 0xd6b   :  { %9523 = vrcp.f32 %v3738_v34  ;;  %v4070_v34 = vld [vmem:[%s12755_s15 + $0x28] sm:$0xff] }
 0xd6e   :  { %v3741_v36 = vpop.xlane.xlu0 %3740  ;;  %v9437_v49 = vpop.permute.xlu1 %9436 }
 0xd6f   :  { %9525 = vrcp.f32 %v3741_v36  ;;  %v9439_v40 = vunpack.i.h.bf16 %v9437_v49  ;;  %v9438_v25 = vunpack.i.l.bf16 %v9437_v49  ;;  %v9233_v36 = vpack.c.bf16 %v4070_v34, %v4069_v12  ;;  %v4071_v49 = vld [vmem:[%s12755_s15 + $0x30] sm:$0xff] }
 0xd71   :  { %v9213_v55 = vpack.c.bf16 %v9439_v40, %v9438_v25  ;;  %v4072_v40 = vld [vmem:[%s12755_s15 + $0x38] sm:$0xff] }
 0xd72   :  { %v9237_v25 = vpack.c.bf16 %v4072_v40, %v4071_v49  ;;  %v8447_v40 = vld [vmem:[%s12747_s7 + $0x30] sm:$0xff] }
 0xd73   :  { %9214 = vmatprep.subr.bf16.mxu1 %v9213_v55 }
 0xd74   :  { %9216 = vmatpush3.bf16.msra.mxu1 %v9213_v55  ;;  %v8431_v55 = vld [vmem:[%s12754_s14] ss:$0 sm:$0xff] }
 0xd75   :  { %v9524_v59 = vpop.eup %9523  ;;  %9218 = vmatprep.subr.bf16.mxu1 %v9217_v11 }
 0xd76   :  { %v3744_v41 = vmul.f32 %v9524_v59, %v9520_v50  ;;  %v9225_v50 = vpack.c.bf16 %v4066_v57, %v4065_v23 }
 0xd78   :  { %8893 = vmatprep.mubr.msk.f32.mxu1 %vm709_vm5, %v3744_v41  ;;  %9226 = vmatprep.subr.bf16.mxu0 %v9225_v50 }
 0xd79   :  { %v9526_v53 = vpop.eup %9525 }
 0xd7a   :  { %v3745_v28 = vmul.f32 %v9526_v53, %v9522_v44  ;;  %v4068_v44 = vld [vmem:[%s12755_s15 + $0x18] sm:$0xff] }
 0xd7b   :  { %v9229_v54 = vpack.c.bf16 %v4068_v44, %v4067_v13  ;;  %v8437_v13 = vld [vmem:[%s12757_s17] ss:$0 sm:$0xff] }
 0xd7c   :  { %8894 = vmatmul.mubr.msk.f32.vlgmr.msra.gmra.mrb[18].mxu1 %vm709_vm5, %v3745_v28 }
 0xd7d   :  { %9220 = vmatpush3.bf16.msra.mxu1 %v9217_v11 }
 0xd7e   :  { %9222 = vmatprep.subr.bf16.mxu1 %v9221_v8 }
 0xd81   :  { %9224 = vmatpush3.bf16.msra.mxu1 %v9221_v8 }
 0xe4f   :  { %v8895_v20 = vpop.f32.mrb[18].mxu1 }
 0xe50   :  { %v3824_v63 = vpop.f32.mrb[19].mxu1 }
 0xe51   :  { %8898 = vmatprep.mubr.msk.f32.mxu0 %vm409_vm3, %v3824_v63 }
 0xe52   :  { %8899 = vmatmul.mubr.msk.f32.vlgmr.msra.gmra.mrb[6].mxu0 %vm409_vm3, %v8895_v20 }
 0xe53   :  { %9228 = vmatpush3.bf16.msra.mxu0 %v9225_v50 }
 0xe54   :  { %9230 = vmatprep.subr.bf16.mxu0 %v9229_v54 }
 0xe57   :  { %9232 = vmatpush3.bf16.msra.mxu0 %v9229_v54  ;;  %v8438_v54 = vld [vmem:[%s12758_s18] ss:$0 sm:$0xff] }
 0xe58   :  { %9234 = vmatprep.subr.bf16.mxu0 %v9233_v36 }
 0xe5b   :  { %9236 = vmatpush3.bf16.msra.mxu0 %v9233_v36 }
 0xe5c   :  { %9238 = vmatprep.subr.bf16.mxu0 %v9237_v25 }
 0xe5f   :  { %9240 = vmatpush3.bf16.msra.mxu0 %v9237_v25  ;;  %v8448_v25 = vld [vmem:[%s12747_s7 + $0x38] sm:$0xff] }
 0xf25   :  { %v8900_v37 = vpop.f32.mrb[6].mxu0 }
 0xf26   :  { %v3917_v19 = vadd.f32 %v8900_v37, %v12933_v22  ;;  %v3905_v18 = vpop.f32.mrb[7].mxu0 }
 0xf27   :  { %v3916_v33 = vadd.f32 %v3905_v18, %v12934_v48 }
 0xf28   :  { %v3923_v0 = vsel %vm216_vm2, %v3917_v19, 0.0 }
 0xf29   :  { %v3920_v7 = vsel %vm216_vm2, %v3916_v33, 0.0 }
 0xf2a   :  { %3921 = vadd.xlane.f32.xlu0 %v3920_v7 }
 0xf2e   :  { %3924 = vadd.xlane.f32.xlu0 %v3923_v0 }
 0xfb7   :  { %v3922_v62 = vpop.xlane.xlu0 %3921 }
 0xfb8   :  { %v3927_v21 = vmul.f32 0.03125, %v3922_v62  ;;  %v8434_v62 = vld [vmem:[%s12935_s16] ss:$0 sm:$0xff] }
 0xfba   :  { %v3929_v42 = vsub.f32 %v3916_v33, %v3927_v21 }
 0xfbb   :  { %v3925_v47 = vpop.xlane.xlu0 %3924 }
 0xfbc   :  { %v3928_v46 = vmul.f32 0.03125, %v3925_v47  ;;  %v3931_v30 = vmul.f32 %v3929_v42, %v3929_v42 }
 0xfbe   :  { %v3930_v2 = vsub.f32 %v3917_v19, %v3928_v46  ;;  %v3933_v17 = vsel %vm216_vm2, %v3931_v30, 0.0 }
 0xfbf   :  { %3934 = vadd.xlane.f32.xlu0 %v3933_v17 }
 0xfc0   :  { %v3932_v9 = vmul.f32 %v3930_v2, %v3930_v2 }
 0xfc2   :  { %v3936_v38 = vsel %vm216_vm2, %v3932_v9, 0.0 }
 0xfc3   :  { %3937 = vadd.xlane.f32.xlu0 %v3936_v38 }
0x104c   :  { %v3935_v5 = vpop.xlane.xlu0 %3934 }
0x104d   :  { %v3939_v35 = vmul.f32 0.03125, %v3935_v5 }
0x104f   :  { %v3941_v14 = vadd.f32 1e-12, %v3939_v35 }
0x1050   :  { %v3938_v6 = vpop.xlane.xlu0 %3937 }
0x1051   :  { %9527 = vrsqrt.f32 %v3941_v14  ;;  %v3940_v45 = vmul.f32 0.03125, %v3938_v6  ;;  %v8439_v6 = vld [vmem:[%s12746_s6 + $0x20] sm:$0xff] }
0x1053   :  { %v3942_v52 = vadd.f32 1e-12, %v3940_v45  ;;  %v8440_v45 = vld [vmem:[%s12746_s6 + $0x28] sm:$0xff] }
0x1055   :  { %9529 = vrsqrt.f32 %v3942_v52  ;;  %v8441_v52 = vld [vmem:[%s12746_s6 + $0x30] sm:$0xff] }
0x105b   :  { %v9528_v60 = vpop.eup %9527 }
0x105c   :  { %v3945_v16 = vmul.f32 %v9528_v60, %v3929_v42  ;;  %v9241_v60 = vpack.c.bf16 %v8440_v45, %v8439_v6 }
0x105e   :  { %v3953_v32 = vmul.f32 %v8429_v56, %v3945_v16  ;;  %9242 = vmatprep.subr.bf16.mxu1 %v9241_v60 }
0x105f   :  { %v9530_v27 = vpop.eup %9529 }
0x1060   :  { %v3946_v31 = vmul.f32 %v9530_v27, %v3930_v2  ;;  %v3961_v39 = vadd.f32 %v8430_v29, %v3953_v32  ;;  %v8446_v32 = vld [vmem:[%s12747_s7 + $0x28] sm:$0xff] }
0x1062   :  { %v3954_v51 = vmul.f32 %v8429_v56, %v3946_v31  ;;  %8909 = vmatprep.mubr.msk.f32.mxu1 %vm216_vm2, %v3961_v39  ;;  %v8442_v56 = vld [vmem:[%s12746_s6 + $0x38] sm:$0xff] }
0x1063   :  { %v9245_v16 = vpack.c.bf16 %v8442_v56, %v8441_v52 }
0x1064   :  { %v3962_v26 = vadd.f32 %v8430_v29, %v3954_v51  ;;  %v8445_v29 = vld [vmem:[%s12747_s7 + $0x20] sm:$0xff]  ;;  %s12977_s7 = smov 80  }
0x1065   :  { %v9249_v27 = vpack.c.bf16 %v8446_v32, %v8445_v29  ;;  %v11407_v32 = vld [vmem:[%s12865_s3 + $0x80] sm:$0xff] }
0x1066   :  { %8910 = vmatmul.mubr.msk.f32.vlgmr.msra.gmra.mrb[20].mxu1 %vm216_vm2, %v3962_v26 }
0x1067   :  { %9244 = vmatpush3.bf16.msra.mxu1 %v9241_v60 }
0x1068   :  { %9246 = vmatprep.subr.bf16.mxu1 %v9245_v16 }
0x106b   :  { %9248 = vmatpush3.bf16.msra.mxu1 %v9245_v16 }
0x106c   :  { %9250 = vmatprep.subr.bf16.mxu1 %v9249_v27 }
0x1139   :  { %v8911_v59 = vpop.f32.mrb[20].mxu1 }
0x113a   :  { %v4052_v41 = vadd.f32 %v8911_v59, %v8431_v55  ;;  %v4046_v53 = vpop.f32.mrb[21].mxu1 }
0x113b   :  { %v4047_v28 = vadd.f32 %v8431_v55, %v4046_v53  ;;  %v9617_v53 = vld [vmem:[%s12862_s30] sm:$0xff] }
0x113c   :  { %v4058_v20 = vmul.f32 0.70710677, %v4052_v41  ;;  %v4056_v33 = vmul.f32 0.5, %v4052_v41  ;;  %v9253_v41 = vpack.c.bf16 %v8448_v25, %v8447_v40 }
0x113d   :  { %v4057_v63 = vmul.f32 0.70710677, %v4047_v28  ;;  %v4055_v18 = vmul.f32 0.5, %v4047_v28  ;;  %v9618_v28 = vld [vmem:[%s12862_s30 + $0x8] sm:$0xff]  ;;  %s13015_s30 = smov 40  }
0x113e   :  { %9531 = verf.f32 %v4058_v20  ;;  %v8452_v20 = vld [vmem:[%s12749_s9 + $0x1] ss:$0 sm:$0xff] }
0x113f   :  { %9533 = verf.f32 %v4057_v63  ;;  %v8454_v63 = vld [vmem:[%s12750_s10 + $0x1] ss:$0 sm:$0xff]  ;;  %s12997_s10 = smov 72  }
0x1148   :  { %v9532_v37 = vpop.eup %9531 }
0x1149   :  { %v9534_v22 = vpop.eup %9533  ;;  %v4062_v19 = vadd.f32 1.0, %v9532_v37 }
0x114a   :  { %v4061_v48 = vadd.f32 1.0, %v9534_v22 }
0x114b   :  { %v4064_v0 = vmul.f32 %v4062_v19, %v4056_v33 }
0x114c   :  { %v4063_v7 = vmul.f32 %v4061_v48, %v4055_v18 }
0x114e   :  { %8928 = vmatprep.mubr.msk.f32.mxu0 %vm4080_vm14, %v4063_v7 }
0x114f   :  { %8929 = vmatmul.mubr.msk.f32.vlgmr.msra.gmra.mrb[12].mxu0 %vm4080_vm14, %v4064_v0 }
0x1222   :  { %v8930_v21 = vpop.f32.mrb[12].mxu0 }
0x1223   :  { %v4159_v42 = vadd.f32 %v8930_v21, %v8434_v62  ;;  %v4153_v47 = vpop.f32.mrb[13].mxu0 }
0x1224   :  { %v4154_v46 = vadd.f32 %v8434_v62, %v4153_v47 }
0x1225   :  { %v4163_v30 = vadd.f32 %v4159_v42, %v3962_v26 }
0x1226   :  { %v4162_v2 = vadd.f32 %v4154_v46, %v3961_v39 }
0x1227   :  { %v4169_v17 = vsel %vm216_vm2, %v4163_v30, 0.0 }
0x1228   :  { %4170 = vadd.xlane.f32.xlu0 %v4169_v17  ;;  %v4166_v9 = vsel %vm216_vm2, %v4162_v2, 0.0 }
0x1229   :  { %4167 = vadd.xlane.f32.xlu1 %v4166_v9 }
0x12b5   :  { %v4171_v38 = vpop.xlane.xlu0 %4170 }
0x12b6   :  { %v4173_v24 = vmul.f32 0.03125, %v4171_v38  ;;  %v4168_v43 = vpop.xlane.xlu1 %4167 }
0x12b7   :  { %v4172_v4 = vmul.f32 0.03125, %v4168_v43 }
0x12b8   :  { %v4175_v11 = vsub.f32 %v4163_v30, %v4173_v24 }
0x12b9   :  { %v4174_v61 = vsub.f32 %v4162_v2, %v4172_v4 }
0x12ba   :  { %v4177_v35 = vmul.f32 %v4175_v11, %v4175_v11 }
0x12bb   :  { %v4176_v8 = vmul.f32 %v4174_v61, %v4174_v61 }
0x12bc   :  { %v4181_v14 = vsel %vm216_vm2, %v4177_v35, 0.0 }
0x12bd   :  { %v4178_v5 = vsel %vm216_vm2, %v4176_v8, 0.0 }
0x12be   :  { %4179 = vadd.xlane.f32.xlu0 %v4178_v5 }
0x12c2   :  { %4182 = vadd.xlane.f32.xlu0 %v4181_v14 }
0x134b   :  { %v4180_v31 = vpop.xlane.xlu0 %4179 }
0x134c   :  { %v4184_v39 = vmul.f32 0.03125, %v4180_v31  ;;  %v11413_v31 = vld [vmem:[%s12865_s3] sm:$0xff] }
0x134e   :  { %v4186_v51 = vadd.f32 1e-12, %v4184_v39 }
0x134f   :  { %v4183_v26 = vpop.xlane.xlu0 %4182 }
0x1350   :  { %9535 = vrsqrt.f32 %v4186_v51  ;;  %v4185_v23 = vmul.f32 0.03125, %v4183_v26 }
0x1352   :  { %v4187_v57 = vadd.f32 1e-12, %v4185_v23 }
0x1354   :  { %9537 = vrsqrt.f32 %v4187_v57 }
0x135a   :  { %v9536_v50 = vpop.eup %9535 }
0x135b   :  { %v4190_v44 = vmul.f32 %v9536_v50, %v4174_v61 }
0x135d   :  { %v4198_v12 = vmul.f32 %v8437_v13, %v4190_v44 }
0x135e   :  { %v9538_v34 = vpop.eup %9537 }
0x135f   :  { %v4191_v36 = vmul.f32 %v9538_v34, %v4175_v11  ;;  %v11334_v49 = vadd.f32 %v8438_v54, %v4198_v12 }
0x1361   :  { %12936 = vst [vmem:[#allocation15_spill] sm:$0xff] %v11334_v49  ;;  %v4199_v55 = vmul.f32 %v8437_v13, %v4191_v36  ;;  %8939 = vmatprep.mubr.msk.f32.mxu1 %vm216_vm2, %v11334_v49  ;;  %v11428_v13 = vld [vmem:[%s12865_s3 + $0x88] sm:$0xff] }
0x1363   :  { %v11344_v59 = vadd.f32 %v8438_v54, %v4199_v55  ;;  %v11434_v54 = vld [vmem:[%s12865_s3 + $0x98] sm:$0xff]  ;;  %v11448_v55 = vld [vmem:[%s12865_s3 + $0x8] sm:$0xff] }
0x1365   :  { %12937 = vst [vmem:[#allocation14_spill] sm:$0xff] %v11344_v59  ;;  %8940 = vmatmul.mubr.msk.f32.vlgmr.msra.gmra.mrb[22].mxu1 %vm216_vm2, %v11344_v59 }
0x1366   :  { %9252 = vmatpush3.bf16.msra.mxu1 %v9249_v27  ;;  %8950 = vmatprep.mubr.msk.f32.mxu1 %vm216_vm2, %v9617_v53  ;;  %v11454_v53 = vld [vmem:[%s12865_s3 + $0xa8] sm:$0xff] }
0x1367   :  { %9254 = vmatprep.subr.bf16.mxu1 %v9253_v41 }
0x136a   :  { %9256 = vmatpush3.bf16.msra.mxu1 %v9253_v41 }
0x136d   :  { %8951 = vmatmul.mubr.msk.f32.vlgmr.msra.gmra.mrb[24].mxu1 %vm216_vm2, %v9618_v28 }
0x1438   :  { %v8941_v37 = vpop.f32.mrb[22].mxu1 }
0x1439   :  { %v4285_v22 = vpop.f32.mrb[23].mxu1  ;;  %v4383_v19 = vadd.f32 %v8941_v37, %v8452_v20  ;;  %v4395_v46 = vadd.f32 %v8941_v37, %v8454_v63 }
0x143a   :  { %v11362_v18 = vpack.i.bf16 %v8941_v37, %v4285_v22  ;;  %v4394_v48 = vadd.f32 %v8454_v63, %v4285_v22  ;;  %v4382_v33 = vadd.f32 %v8452_v20, %v4285_v22  ;;  %v11460_v37 = vld [vmem:[%s12865_s3 + $0x90] sm:$0xff] }
0x143b   :  { %v11380_v30 = vmul.f32 0.35355338, %v4395_v46  ;;  %v11388_v24 = vmul.f32 0.35355338, %v4383_v19  ;;  %v11466_v19 = vld [vmem:[%s12865_s3 + $0xc8] sm:$0xff] }
0x143c   :  { %9441 = vrot.lane.b32.xlu0 %v11362_v18, %s9713_s2  ;;  %v11366_v7 = vmul.f32 0.35355338, %v4394_v48  ;;  %v11368_v0 = vmul.f32 0.35355338, %v4382_v33  ;;  %12939 = vst [vmem:[#allocation8_spill] sm:$0xff] %v11466_v19  ;;  %s9728_s2 = smov [#allocation2]  }
0x143d   :  { %s8363_s22 = sshll.u32 %s9728_s2, 4  ;;  %s8364_s22 = int_to_ptr.vmem [resolvable:$true] %s8363_s22 }
0x143e   :  { %8957 = vmatprep.mubr.msk.f32.mxu0 %vm409_vm3, %v11366_v7  ;;  %8964 = vmatprep.mubr.msk.f32.mxu1 %vm409_vm3, %v11368_v0  ;;  %p9692_p1 = scmp.lt.s32.totalorder %s8364_s22, %s8364_s22 }
0x1440   :  { %v8952_v62 = vpop.f32.mrb[24].mxu1 }
0x1441   :  { %v4365_v21 = vpop.f32.mrb[25].mxu1 }
0x1442   :  { %v11374_v42 = vpack.i.bf16 %v8952_v62, %v4365_v21  ;;  %v9257_v47 = vpack.c.bf16 %v8952_v62, %v4365_v21 }
0x1444   :  { %12938 = vst [vmem:[#allocation9_spill] sm:$0xff] %v11374_v42  ;;  %9259 = vmatprep.subr.msk.bf16.mxu0 %vm9954_vm4, %v9257_v47 }
0x1445   :  { %9262 = vmatpush3.bf16.xpose.msk.msra.mxu0 %vm9954_vm4, %v9257_v47 }
0x144c   :  { %8958 = vmatmul.mubr.msk.f32.vlgmr.msra.gmra.mrb[14].mxu0 %vm409_vm3, %v11380_v30 }
0x14ae   :  { %v9442_v2 = vpop.permute.xlu0 %9441 }
0x14af   :  { %v9444_v17 = vunpack.i.h.bf16 %v9442_v2  ;;  %v9443_v9 = vunpack.i.l.bf16 %v9442_v2 }
0x14b1   :  { %v9263_v38 = vpack.c.bf16 %v9444_v17, %v9443_v9  ;;  %v11481_v9 = vld [vmem:[%s12865_s3 + $0xa0] sm:$0xff] }
0x14b3   :  { %9265 = vmatprep.subr.msk.bf16.mxu1 %vm9954_vm4, %v9263_v38 }
0x14b4   :  { %9268 = vmatpush3.bf16.xpose.msk.msra.mxu1 %vm9954_vm4, %v9263_v38 }
0x14bb   :  { %8965 = vmatmul.mubr.msk.f32.vlgmr.msra.gmra.mrb[26].mxu1 %vm409_vm3, %v11388_v24 }
0x151f   :  { %v8959_v43 = vpop.f32.mrb[14].mxu0 }
0x1520   :  { %v4548_v4 = vrot.slane %v8959_v43, %v9984_v10  ;;  %v4481_v11 = vpop.f32.mrb[15].mxu0  ;;  %v4541_v61 = vcombine.high %v8959_v43, %v8959_v43  ;;  %v11487_v43 = vld [vmem:[%s12865_s3 + $0x48] sm:$0xff] }
0x1521   :  { %v4499_v8 = vrot.slane %v4481_v11, %v9984_v10  ;;  %v4492_v60 = vcombine.high %v4481_v11, %v4481_v11 }
0x1522   :  { %v4556_v5 = vcombine.high %v4548_v4, %v4548_v4  ;;  %v4564_v35 = vrot.slane %v4548_v4, %v9984_v10  ;;  %v4555_v45 = vrot.slane %v4541_v61, %v9984_v10 }
0x1523   :  { %v11396_v14 = vrot.slane %v4499_v8, %v9984_v10  ;;  %v11420_v26 = vrot.slane %v4492_v60, %v9984_v10  ;;  %v4507_v63 = vcombine.high %v4499_v8, %v4499_v8  ;;  %v11500_v8 = vld [vmem:[%s12865_s3 + $0xc0] sm:$0xff]  ;;  %v11511_v60 = vld [vmem:[%s12865_s3 + $0xb8] sm:$0xff] }
0x1524   :  { %v4578_v6 = vrot.slane %v4556_v5, %v9984_v10  ;;  %v4586_v52 = vcombine.high %v4564_v35, %v4564_v35  ;;  %v4625_v56 = vrot.slane %v4564_v35, %v9989_v15  ;;  %v11417_v51 = vrot.slane %v4555_v45, %v9984_v10  ;;  %12940 = vst [vmem:[#allocation7_spill] sm:$0xff] %v11500_v8 }
0x1525   :  { %v4593_v16 = vrot.slane %v11396_v14, %v9989_v15  ;;  %v11439_v34 = vrot.slane %v11420_v26, %v9984_v10  ;;  %v4557_v20 = vcombine.high %v4555_v45, %v4555_v45  ;;  %v4529_v46 = vrot.slane %v4507_v63, %v9984_v10  ;;  %12941 = vst [vmem:[#allocation16_spill] sm:$0xff] %v11511_v60 }
0x1526   :  { %v4629_v29 = vrot.slane %v4578_v6, %v9989_v15  ;;  %v4686_v27 = vmul.f32 %v11407_v32, %v4625_v56  ;;  %v4633_v23 = vrot.slane %v4586_v52, %v9989_v15  ;;  %v4687_v44 = vmul.f32 %v11428_v13, %v4625_v56 }
0x1527   :  { %v4670_v39 = vmul.f32 %v11413_v31, %v4593_v16  ;;  %v4641_v36 = vrot.slane %v11417_v51, %v9989_v15  ;;  %v4671_v41 = vmul.f32 %v11448_v55, %v4593_v16  ;;  %v11473_v21 = vrot.slane %v11439_v34, %v9989_v15 }
0x1528   :  { %v4750_v57 = vsel %vm709_vm5, %v4686_v27, 0.0  ;;  %v4689_v12 = vmul.f32 %v11434_v54, %v4629_v29  ;;  %v4753_v40 = vsel %vm709_vm5, %v4687_v44, 0.0  ;;  %v4691_v28 = vmul.f32 %v11454_v53, %v4633_v23 }
0x1529   :  { %v4702_v50 = vsel %vm709_vm5, %v4670_v39, 0.0  ;;  %4751 = vadd.xlane.f32.xlu1 %v4750_v57  ;;  %v4688_v22 = vmul.f32 %v11460_v37, %v4629_v29  ;;  %v4695_v48 = vmul.f32 %v11466_v19, %v4641_v36  ;;  %v4705_v33 = vsel %vm709_vm5, %v4671_v41, 0.0 }
0x152a   :  { %4703 = vadd.xlane.f32.xlu0 %v4702_v50  ;;  %v4759_v25 = vsel %vm709_vm5, %v4689_v12, 0.0  ;;  %v4765_v62 = vsel %vm709_vm5, %v4691_v28, 0.0  ;;  %v4588_v47 = vcombine.high %v4578_v6, %v4578_v6  ;;  %v4690_v38 = vmul.f32 %v11481_v9, %v4633_v23  ;;  %v11534_v50 = vld [vmem:[%s12865_s3 + $0xd8] sm:$0xff]  ;;  %v11553_v28 = vld [vmem:[%s12865_s3 + $0xe8] sm:$0xff] }
0x152b   :  { %v4756_v2 = vsel %vm709_vm5, %v4688_v22, 0.0  ;;  %v4777_v17 = vsel %vm709_vm5, %v4695_v48, 0.0  ;;  %v4679_v4 = vmul.f32 %v11487_v43, %v11473_v21  ;;  %v11495_v61 = vrot.slane %v4557_v20, %v9984_v10  ;;  %12942 = vst [vmem:[#allocation17_spill] sm:$0xff] %v11534_v50  ;;  %12943 = vst [vmem:[#allocation10_spill] sm:$0xff] %v11553_v28 }
0x152c   :  { %v11492_v11 = vrot.slane %v4588_v47, %v9989_v15  ;;  %v4694_v5 = vmul.f32 %v11500_v8, %v4641_v36  ;;  %v4597_v35 = vrot.slane %v4529_v46, %v9989_v15  ;;  %v4587_v6 = vcombine.high %v11417_v51, %v11417_v51  ;;  %v11527_v51 = vld [vmem:[%s12865_s3 + $0x10] sm:$0xff]  ;;  %v11545_v36 = vld [vmem:[%s12865_s3 + $0x18] sm:$0xff]  ;;  %v11566_v47 = vld [vmem:[%s12865_s3 + $0x20] sm:$0xff] }
0x152d   :  { %4754 = vadd.xlane.f32.xlu1 %v4753_v40  ;;  %v4762_v45 = vsel %vm709_vm5, %v4690_v38, 0.0  ;;  %v4729_v52 = vsel %vm709_vm5, %v4679_v4, 0.0  ;;  %v11517_v16 = vrot.slane %v11495_v61, %v9989_v15  ;;  %v4508_v29 = vcombine.high %v11420_v26, %v11420_v26 }
0x152e   :  { %4760 = vadd.xlane.f32.xlu0 %v4759_v25  ;;  %v4693_v56 = vmul.f32 %v11511_v60, %v11492_v11  ;;  %v4537_v27 = vcombine.high %v11396_v14, %v11396_v14  ;;  %v4774_v39 = vsel %vm709_vm5, %v4694_v5, 0.0  ;;  %v4672_v23 = vmul.f32 %v11527_v51, %v4597_v35 }
0x152f   :  { %v4697_v26 = vmul.f32 %v11534_v50, %v11517_v16  ;;  %v11539_v14 = vrot.slane %v4587_v6, %v9989_v15  ;;  %v4539_v44 = vcombine.high %v4529_v46, %v4529_v46  ;;  %v4673_v40 = vmul.f32 %v11545_v36, %v4597_v35 }
0x1530   :  { %v4771_v57 = vsel %vm709_vm5, %v4693_v56, 0.0  ;;  %v4708_v12 = vsel %vm709_vm5, %v4672_v23, 0.0  ;;  %v4601_v25 = vrot.slane %v4537_v27, %v9989_v15  ;;  %v4536_v22 = vrot.slane %v4508_v29, %v9984_v10  ;;  %v11595_v27 = vld [vmem:[%s12865_s3 + $0x40] sm:$0xff] }
0x1531   :  { %4706 = vadd.xlane.f32.xlu1 %v4705_v33  ;;  %v4783_v41 = vsel %vm709_vm5, %v4697_v26, 0.0  ;;  %v4699_v20 = vmul.f32 %v11553_v28, %v11539_v14  ;;  %v4605_v63 = vrot.slane %v4539_v44, %v9989_v15  ;;  %v4711_v48 = vsel %vm709_vm5, %v4673_v40, 0.0  ;;  %12945 = vst [vmem:[#allocation18_spill] sm:$0xff] %v11595_v27 }
0x1532   :  { %4766 = vadd.xlane.f32.xlu0 %v4765_v62  ;;  %v4538_v33 = vcombine.high %v11439_v34, %v11439_v34  ;;  %v4674_v46 = vmul.f32 %v11566_v47, %v4601_v25  ;;  %v4613_v38 = vrot.slane %v4536_v22, %v9989_v15  ;;  %v11579_v34 = vld [vmem:[%s12865_s3 + $0x28] sm:$0xff]  ;;  %v4540_v56 = vcombine.high %v4536_v22, %v4536_v22 }
0x1533   :  { %v4789_v62 = vsel %vm709_vm5, %v4699_v20, 0.0  ;;  %v4675_v4 = vmul.f32 %v11579_v34, %v4601_v25  ;;  %v11614_v25 = vld [vmem:[%s12865_s3 + $0xb0] sm:$0xff]  ;;  %v11621_v20 = vld [vmem:[%s12865_s3 + $0x78] sm:$0xff] }
0x1534   :  { %v4617_v5 = vrot.slane %v4538_v33, %v9989_v15  ;;  %v4714_v35 = vsel %vm709_vm5, %v4674_v46, 0.0  ;;  %v4621_v44 = vrot.slane %v4540_v56, %v9989_v15  ;;  %12947 = vst [vmem:[#allocation12_spill] sm:$0xff] %v11614_v25  ;;  %12948 = vst [vmem:[#allocation13_spill] sm:$0xff] %v11621_v20  ;;  %v11637_v46 = vld [vmem:[%s12865_s3 + $0xf8] sm:$0xff]  ;;  %v11653_v56 = vld [vmem:[%s12865_s3 + $0x30] sm:$0xff] }
0x1535   :  { %4757 = vadd.xlane.f32.xlu1 %v4756_v2  ;;  %v11572_v2 = vld [vmem:[%s12865_s3 + $0x38] sm:$0xff]  ;;  %v4717_v29 = vsel %vm709_vm5, %v4675_v4, 0.0  ;;  %12950 = vst [vmem:[#allocation21_spill] sm:$0xff] %v11637_v46 }
0x1536   :  { %4778 = vadd.xlane.f32.xlu0 %v4777_v17  ;;  %v4677_v17 = vmul.f32 %v11572_v2, %v4605_v63 }
0x1538   :  { %v4723_v6 = vsel %vm709_vm5, %v4677_v17, 0.0 }
0x1539   :  { %4763 = vadd.xlane.f32.xlu1 %v4762_v45  ;;  %v11588_v45 = vld [vmem:[%s12865_s3 + $0x58] sm:$0xff] }
0x153a   :  { %4730 = vadd.xlane.f32.xlu0 %v4729_v52  ;;  %12944 = vst [vmem:[#allocation11_spill] sm:$0xff] %v11588_v45  ;;  %v4681_v52 = vmul.f32 %v11588_v45, %v4613_v38 }
0x153c   :  { %v4735_v23 = vsel %vm709_vm5, %v4681_v52, 0.0 }
0x153d   :  { %4775 = vadd.xlane.f32.xlu1 %v4774_v39  ;;  %v4678_v39 = vmul.f32 %v11595_v27, %v11473_v21 }
0x153e   :  { %4772 = vadd.xlane.f32.xlu0 %v4771_v57  ;;  %v11603_v57 = vld [vmem:[%s12865_s3 + $0x68] sm:$0xff] }
0x153f   :  { %12946 = vst [vmem:[#allocation19_spill] sm:$0xff] %v11603_v57  ;;  %v4683_v26 = vmul.f32 %v11603_v57, %v4617_v5  ;;  %v4726_v40 = vsel %vm709_vm5, %v4678_v39, 0.0 }
0x1541   :  { %4709 = vadd.xlane.f32.xlu1 %v4708_v12  ;;  %v4589_v12 = vcombine.high %v11495_v61, %v11495_v61  ;;  %v4741_v21 = vsel %vm709_vm5, %v4683_v26, 0.0  ;;  %v4685_v61 = vmul.f32 %v11621_v20, %v4621_v44 }
0x1542   :  { %4784 = vadd.xlane.f32.xlu0 %v4783_v41  ;;  %v4692_v41 = vmul.f32 %v11614_v25, %v11492_v11 }
0x1543   :  { %v4653_v22 = vrot.slane %v4589_v12, %v9989_v15  ;;  %v4747_v33 = vsel %vm709_vm5, %v4685_v61, 0.0  ;;  %v11667_v12 = vld [vmem:[%s12865_s3 + $0x60] sm:$0xff]  ;;  %v11681_v61 = vld [vmem:[%s12865_s3 + $0xf0] sm:$0xff] }
0x1544   :  { %12953 = vst [vmem:[#allocation23_spill] sm:$0xff] %v11667_v12  ;;  %12955 = vst [vmem:[#allocation6_spill] sm:$0xff] %v11681_v61 }
0x1545   :  { %4712 = vadd.xlane.f32.xlu1 %v4711_v48  ;;  %v4768_v48 = vsel %vm709_vm5, %v4692_v41, 0.0  ;;  %v4701_v17 = vmul.f32 %v11637_v46, %v4653_v22 }
0x1546   :  { %4790 = vadd.xlane.f32.xlu0 %v4789_v62  ;;  %v11630_v62 = vld [vmem:[%s12865_s3 + $0xd0] sm:$0xff] }
0x1547   :  { %12949 = vst [vmem:[#allocation22_spill] sm:$0xff] %v11630_v62  ;;  %v4696_v11 = vmul.f32 %v11630_v62, %v11517_v16 }
0x1549   :  { %4715 = vadd.xlane.f32.xlu1 %v4714_v35  ;;  %v4780_v4 = vsel %vm709_vm5, %v4696_v11, 0.0  ;;  %v4795_v35 = vsel %vm709_vm5, %v4701_v17, 0.0 }
0x154a   :  { %4724 = vadd.xlane.f32.xlu0 %v4723_v6  ;;  %v11645_v6 = vld [vmem:[%s12865_s3 + $0xe0] sm:$0xff] }
0x154b   :  { %12951 = vst [vmem:[#allocation24_spill] sm:$0xff] %v11645_v6  ;;  %v4698_v16 = vmul.f32 %v11645_v6, %v11539_v14 }
0x154d   :  { %4718 = vadd.xlane.f32.xlu1 %v4717_v29  ;;  %v4786_v52 = vsel %vm709_vm5, %v4698_v16, 0.0  ;;  %v4676_v29 = vmul.f32 %v11653_v56, %v4605_v63  ;;  %v4682_v63 = vmul.f32 %v11667_v12, %v4617_v5  ;;  %v4700_v5 = vmul.f32 %v11681_v61, %v4653_v22 }
0x154e   :  { %4736 = vadd.xlane.f32.xlu0 %v4735_v23  ;;  %v11660_v23 = vld [vmem:[%s12865_s3 + $0x50] sm:$0xff] }
0x154f   :  { %v4720_v39 = vsel %vm709_vm5, %v4676_v29, 0.0  ;;  %12952 = vst [vmem:[#allocation20_spill] sm:$0xff] %v11660_v23  ;;  %v4680_v14 = vmul.f32 %v11660_v23, %v4613_v38 }
0x1551   :  { %4727 = vadd.xlane.f32.xlu1 %v4726_v40  ;;  %v4732_v26 = vsel %vm709_vm5, %v4680_v14, 0.0  ;;  %v4738_v40 = vsel %vm709_vm5, %v4682_v63, 0.0 }
0x1552   :  { %4742 = vadd.xlane.f32.xlu0 %v4741_v21  ;;  %v11674_v21 = vld [vmem:[%s12865_s3 + $0x70] sm:$0xff] }
0x1553   :  { %12954 = vst [vmem:[#allocation5_spill] sm:$0xff] %v11674_v21  ;;  %v4684_v38 = vmul.f32 %v11674_v21, %v4621_v44 }
0x1555   :  { %4769 = vadd.xlane.f32.xlu1 %v4768_v48  ;;  %v4744_v41 = vsel %vm709_vm5, %v4684_v38, 0.0  ;;  %v4792_v48 = vsel %vm709_vm5, %v4700_v5, 0.0 }
0x1556   :  { %4748 = vadd.xlane.f32.xlu0 %v4747_v33 }
0x1559   :  { %4781 = vadd.xlane.f32.xlu1 %v4780_v4 }
0x155a   :  { %4796 = vadd.xlane.f32.xlu0 %v4795_v35 }
0x155d   :  { %4787 = vadd.xlane.f32.xlu1 %v4786_v52 }
0x1561   :  { %4721 = vadd.xlane.f32.xlu1 %v4720_v39 }
0x1565   :  { %4733 = vadd.xlane.f32.xlu1 %v4732_v26 }
0x1569   :  { %4739 = vadd.xlane.f32.xlu1 %v4738_v40 }
0x156d   :  { %4745 = vadd.xlane.f32.xlu1 %v4744_v41 }
0x1571   :  { %4793 = vadd.xlane.f32.xlu1 %v4792_v48 }
0x1582   :  { %9446 = vrot.lane.b32.xlu1 %v11374_v42, %s9715_s26 }
0x158e   :  { %v11687_v33 = vpop.f32.mrb[26].mxu1 }
0x158f   :  { %v11689_v44 = vpop.f32.mrb[27].mxu1 }
0x15b6   :  { %v4752_v11 = vpop.xlane.xlu1 %4751 }
0x15b7   :  { %v4704_v17 = vpop.xlane.xlu0 %4703 }
0x15b8   :  { %v4839_v23 = vrot.slane %v4704_v17, %v10303_v1 }
0x15ba   :  { %v4755_v4 = vpop.xlane.xlu1 %4754 }
0x15bb   :  { %v4761_v35 = vpop.xlane.xlu0 %4760  ;;  %v4915_v45 = vrot.slane %v4755_v4, %v10306_v3 }
0x15be   :  { %v4707_v16 = vpop.xlane.xlu1 %4706 }
0x15bf   :  { %v4767_v52 = vpop.xlane.xlu0 %4766  ;;  %v4843_v62 = vrot.slane %v4707_v16, %v10306_v3  ;;  %v4924_v16 = vrot.slane %v4761_v35, %v10306_v3 }
0x15c2   :  { %v4758_v29 = vpop.xlane.xlu1 %4757 }
0x15c3   :  { %v11691_v39 = vpop.xlane.xlu0 %4778  ;;  %v4920_v57 = vrot.slane %v4758_v29, %v10303_v1  ;;  %v4911_v29 = vrot.slane %v4752_v11, %v10303_v1 }
0x15c5   :  { %v4925_v4 = vsel %vm853_vm6, %v4924_v16, %v4920_v57 }
0x15c6   :  { %v4764_v22 = vpop.xlane.xlu1 %4763 }
0x15c7   :  { %v4731_v26 = vpop.xlane.xlu0 %4730  ;;  %v4929_v25 = vrot.slane %v4764_v22, %v10303_v1 }
0x15ca   :  { %v11693_v14 = vpop.xlane.xlu1 %4775 }
0x15cb   :  { %v4773_v40 = vpop.xlane.xlu0 %4772 }
0x15ce   :  { %v4710_v63 = vpop.xlane.xlu1 %4709 }
0x15cf   :  { %v11695_v5 = vpop.xlane.xlu0 %4784  ;;  %v4848_v8 = vrot.slane %v4710_v63, %v10303_v1  ;;  %v4844_v63 = vsel %vm853_vm6, %v4843_v62, %v4839_v23 }
0x15d2   :  { %v4713_v38 = vpop.xlane.xlu1 %4712 }
0x15d3   :  { %v11697_v59 = vpop.xlane.xlu0 %4790  ;;  %v4852_v20 = vrot.slane %v4713_v38, %v10306_v3 }
0x15d6   :  { %v4716_v41 = vpop.xlane.xlu1 %4715 }
0x15d7   :  { %v4725_v61 = vpop.xlane.xlu0 %4724  ;;  %v4857_v60 = vrot.slane %v4716_v41, %v10303_v1 }
0x15d8   :  { %v4870_v27 = vrot.slane %v4725_v61, %v10306_v3 }
0x15da   :  { %v4719_v48 = vpop.xlane.xlu1 %4718 }
0x15db   :  { %v4737_v6 = vpop.xlane.xlu0 %4736  ;;  %v4861_v50 = vrot.slane %v4719_v48, %v10306_v3  ;;  %v4853_v48 = vsel %vm853_vm6, %v4852_v20, %v4848_v8  ;;  %v4916_v8 = vsel %vm853_vm6, %v4915_v45, %v4911_v29  ;;  %v4879_v45 = vrot.slane %v4731_v26, %v10306_v3 }
0x15dc   :  { %v4980_v61 = vsel %vm990_vm7, %v4853_v48, %v4844_v63  ;;  %v4960_v29 = vrot.slane %v11695_v5, %v10306_v3 }
0x15dd   :  { %v4862_v17 = vsel %vm853_vm6, %v4861_v50, %v4857_v60  ;;  %v4942_v60 = vrot.slane %v4773_v40, %v10306_v3 }
0x15de   :  { %v4728_v49 = vpop.xlane.xlu1 %4727  ;;  %v4981_v50 = vsel %vm992_vm8, %v4862_v17, %v4980_v61  ;;  %v4969_v17 = vrot.slane %v11697_v59, %v10306_v3 }
0x15df   :  { %v4743_v12 = vpop.xlane.xlu0 %4742  ;;  %v4875_v62 = vrot.slane %v4728_v49, %v10303_v1 }
0x15e0   :  { %v4897_v57 = vrot.slane %v4743_v12, %v10306_v3 }
0x15e1   :  { %v4880_v16 = vsel %vm853_vm6, %v4879_v45, %v4875_v62 }
0x15e2   :  { %v4770_v42 = vpop.xlane.xlu1 %4769 }
0x15e3   :  { %v4938_v22 = vrot.slane %v4770_v42, %v10303_v1  ;;  %v4749_v23 = vpop.xlane.xlu0 %4748  ;;  %v4888_v42 = vrot.slane %v4737_v6, %v10306_v3  ;;  %v4947_v6 = vrot.slane %v11693_v14, %v10303_v1  ;;  %v4951_v14 = vrot.slane %v11691_v39, %v10306_v3 }
0x15e4   :  { %v4906_v63 = vrot.slane %v4749_v23, %v10306_v3 }
0x15e6   :  { %v4782_v46 = vpop.xlane.xlu1 %4781 }
0x15e7   :  { %v4956_v40 = vrot.slane %v4782_v46, %v10303_v1 }
0x15ea   :  { %v11699_v28 = vpop.xlane.xlu1 %4787 }
0x15eb   :  { %v4965_v26 = vrot.slane %v11699_v28, %v10303_v1 }
0x15ee   :  { %v4722_v21 = vpop.xlane.xlu1 %4721 }
0x15ef   :  { %v4866_v19 = vrot.slane %v4722_v21, %v10303_v1  ;;  %v4933_v21 = vrot.slane %v4767_v52, %v10306_v3  ;;  %v4943_v52 = vsel %vm853_vm6, %v4942_v60, %v4938_v22 }
0x15f1   :  { %v4871_v41 = vsel %vm853_vm6, %v4870_v27, %v4866_v19  ;;  %v4934_v20 = vsel %vm853_vm6, %v4933_v21, %v4929_v25  ;;  %v4987_v27 = vsel %vm990_vm7, %v4925_v4, %v4916_v8  ;;  %v4797_v4 = vpop.xlane.xlu0 %4796  ;;  %v4952_v8 = vsel %vm853_vm6, %v4951_v14, %v4947_v6 }
0x15f2   :  { %v4734_v38 = vpop.xlane.xlu1 %4733  ;;  %v4982_v25 = vsel %vm994_vm9, %v4871_v41, %v4981_v50  ;;  %v4988_v49 = vsel %vm992_vm8, %v4934_v20, %v4987_v27  ;;  %v4961_v41 = vsel %vm853_vm6, %v4960_v29, %v4956_v40  ;;  %v4970_v20 = vsel %vm853_vm6, %v4969_v17, %v4965_v26 }
0x15f3   :  { %v4884_v35 = vrot.slane %v4734_v38, %v10303_v1  ;;  %v4983_v46 = vsel %vm996_vm10, %v4880_v16, %v4982_v25  ;;  %v4989_v28 = vsel %vm994_vm9, %v4943_v52, %v4988_v49  ;;  %v4978_v62 = vrot.slane %v4797_v4, %v10306_v3 }
0x15f4   :  { %v4990_v59 = vsel %vm996_vm10, %v4952_v8, %v4989_v28 }
0x15f5   :  { %v4889_v38 = vsel %vm853_vm6, %v4888_v42, %v4884_v35  ;;  %v4991_v60 = vsel %vm998_vm11, %v4961_v41, %v4990_v59 }
0x15f6   :  { %v4740_v11 = vpop.xlane.xlu1 %4739  ;;  %v4984_v22 = vsel %vm998_vm11, %v4889_v38, %v4983_v46  ;;  %v4992_v50 = vsel %vm1000_vm13, %v4970_v20, %v4991_v60  ;;  %v11780_v38 = vld [vmem:[%s12881_s27 + $0x8] sm:$0xff] }
0x15f7   :  { %v4893_v19 = vrot.slane %v4740_v11, %v10303_v1 }
0x15f9   :  { %v4898_v12 = vsel %vm853_vm6, %v4897_v57, %v4893_v19  ;;  %v11771_v19 = vld [vmem:[%s12881_s27] sm:$0xff] }
0x15fa   :  { %v4746_v48 = vpop.xlane.xlu1 %4745  ;;  %v4985_v5 = vsel %vm1000_vm13, %v4898_v12, %v4984_v22 }
0x15fb   :  { %v4902_v21 = vrot.slane %v4746_v48, %v10303_v1 }
0x15fd   :  { %v4907_v35 = vsel %vm853_vm6, %v4906_v63, %v4902_v21 }
0x15fe   :  { %v4794_v61 = vpop.xlane.xlu1 %4793  ;;  %v4986_v39 = vsel %vm1002_vm12, %v4907_v35, %v4985_v5 }
0x15ff   :  { %v4974_v23 = vrot.slane %v4794_v61, %v10303_v1  ;;  %v5073_v11 = vadd.f32 %v11689_v44, %v4986_v39 }
0x1601   :  { %v4979_v42 = vsel %vm853_vm6, %v4978_v62, %v4974_v23  ;;  %v5081_v27 = vadd.f32 %v11771_v19, %v5073_v11 }
0x1602   :  { %v9447_v45 = vpop.permute.xlu1 %9446  ;;  %v4993_v57 = vsel %vm1002_vm12, %v4979_v42, %v4992_v50 }
0x1603   :  { %v9449_v25 = vunpack.i.h.bf16 %v9447_v45  ;;  %v9448_v49 = vunpack.i.l.bf16 %v9447_v45  ;;  %v5083_v44 = vsel %vm709_vm5, %v5081_v27, -inf  ;;  %v5078_v52 = vadd.f32 %v11687_v33, %v4993_v57 }
0x1604   :  { %5084 = vmax.xlane.f32.xlu1 %v5083_v44 }
0x1605   :  { %v9273_v40 = vpack.c.bf16 %v9449_v25, %v9448_v49  ;;  %v5082_v6 = vadd.f32 %v11780_v38, %v5078_v52 }
0x1607   :  { %9275 = vmatprep.subr.msk.bf16.mxu1 %vm9954_vm4, %v9273_v40  ;;  %v5086_v16 = vsel %vm709_vm5, %v5082_v6, -inf }
0x1608   :  { %5087 = vmax.xlane.f32.xlu0 %v5086_v16  ;;  %9278 = vmatpush3.bf16.xpose.msk.msra.mxu1 %vm9954_vm4, %v9273_v40 }
0x1615   :  { %5194 = vrot.lane.b32.xlu1 %v11380_v30, %s9715_s26 }
0x1619   :  { %9456 = vrot.lane.b32.xlu1 %v11362_v18, %s9716_s0  ;;  %s12956_s0 = smov 64  }
0x161e   :  { %5192 = vrot.lane.b32.xlu0 %v11366_v7, %s9715_s26 }
0x1691   :  { %v5085_v33 = vpop.xlane.xlu1 %5084 }
0x1692   :  { %v5089_v26 = vsub.f32 %v5081_v27, %v5085_v33 }
0x1694   :  { %v5091_v12 = vmul.f32 1.442695, %v5089_v26 }
0x1695   :  { %v5088_v48 = vpop.xlane.xlu0 %5087  ;;  %v5195_v21 = vpop.permute.xlu1 %5194 }
0x1696   :  { %9539 = vpow2.f32 %v5091_v12  ;;  %v5090_v29 = vsub.f32 %v5082_v6, %v5088_v48 }
0x1698   :  { %v5093_v63 = vmul.f32 1.442695, %v5090_v29 }
0x1699   :  { %v5193_v46 = vpop.permute.xlu0 %5192  ;;  %v9457_v22 = vpop.permute.xlu1 %9456 }
0x169a   :  { %9541 = vpow2.f32 %v5093_v63  ;;  %8978 = vmatprep.mubr.msk.f32.mxu1 %vm409_vm3, %v5193_v46  ;;  %v9459_v8 = vunpack.i.h.bf16 %v9457_v22  ;;  %v9458_v20 = vunpack.i.l.bf16 %v9457_v22 }
0x169b   :  { %8979 = vmatmul.mubr.msk.f32.vlgmr.msra.gmra.mrb[28].mxu1 %vm409_vm3, %v5195_v21 }
0x169c   :  { %v9279_v11 = vpack.c.bf16 %v9459_v8, %v9458_v20 }
0x16a0   :  { %v9540_v14 = vpop.eup %9539 }
0x16a1   :  { %v5095_v17 = vsel %vm709_vm5, %v9540_v14, 0.0 }
0x16a2   :  { %5096 = vadd.xlane.f32.xlu1 %v5095_v17 }
0x16a4   :  { %v9542_v28 = vpop.eup %9541 }
0x16a5   :  { %v5098_v4 = vsel %vm709_vm5, %v9542_v28, 0.0 }
0x16a6   :  { %5099 = vadd.xlane.f32.xlu0 %v5098_v4 }
0x16b3   :  { %5591 = vrot.lane.b32.xlu1 %v11368_v0, %s9715_s26 }
0x16bc   :  { %9451 = vrot.lane.b32.xlu0 %v11362_v18, %s12956_s0 }
0x16c0   :  { %5593 = vrot.lane.b32.xlu0 %v11388_v24, %s9715_s26  ;;  %s12974_s26 = smov 56  }
0x172f   :  { %v5097_v41 = vpop.xlane.xlu1 %5096 }
0x1730   :  { %9543 = vrcp.f32 %v5097_v41 }
0x1733   :  { %v5100_v5 = vpop.xlane.xlu0 %5099  ;;  %v5592_v42 = vpop.permute.xlu1 %5591 }
0x1734   :  { %9545 = vrcp.f32 %v5100_v5 }
0x1737   :  { %v9452_v35 = vpop.permute.xlu0 %9451 }
0x1738   :  { %v9454_v61 = vunpack.i.h.bf16 %v9452_v35  ;;  %v9453_v39 = vunpack.i.l.bf16 %v9452_v35 }
0x173a   :  { %v9544_v59 = vpop.eup %9543  ;;  %v9269_v62 = vpack.c.bf16 %v9454_v61, %v9453_v39 }
0x173b   :  { %v5103_v23 = vmul.f32 %v9544_v59, %v9540_v14  ;;  %v5594_v27 = vpop.permute.xlu0 %5593 }
0x173c   :  { %9270 = vmatprep.subr.bf16.mxu0 %v9269_v62 }
0x173d   :  { %9272 = vmatpush3.bf16.msra.mxu0 %v9269_v62  ;;  %8971 = vmatprep.mubr.msk.f32.mxu0 %vm709_vm5, %v5103_v23 }
0x173e   :  { %v9546_v60 = vpop.eup %9545  ;;  %9281 = vmatprep.subr.msk.bf16.mxu0 %vm9954_vm4, %v9279_v11 }
0x173f   :  { %v5104_v50 = vmul.f32 %v9546_v60, %v9542_v28 }
0x1741   :  { %8972 = vmatmul.mubr.msk.f32.vlgmr.msra.gmra.mrb[16].mxu0 %vm709_vm5, %v5104_v50 }
0x1742   :  { %8985 = vmatprep.mubr.msk.f32.mxu0 %vm409_vm3, %v5592_v42 }
0x1746   :  { %9284 = vmatpush3.bf16.xpose.msk.msra.mxu0 %vm9954_vm4, %v9279_v11 }
0x174d   :  { %8986 = vmatmul.mubr.msk.f32.vlgmr.msra.gmra.mrb[18].mxu0 %vm409_vm3, %v5594_v27 }
0x176e   :  { %v11812_v45 = vpop.f32.mrb[28].mxu1 }
0x176f   :  { %v5274_v57 = vpop.f32.mrb[29].mxu1  ;;  %v5341_v52 = vrot.slane %v11812_v45, %v9984_v10 }
0x1770   :  { %v5292_v25 = vrot.slane %v5274_v57, %v9984_v10  ;;  %v5285_v5 = vcombine.high %v5274_v57, %v5274_v57 }
0x1771   :  { %v5349_v48 = vcombine.high %v5341_v52, %v5341_v52  ;;  %v5357_v29 = vrot.slane %v5341_v52, %v9984_v10 }
0x1772   :  { %v5300_v49 = vcombine.high %v5292_v25, %v5292_v25  ;;  %v5308_v44 = vrot.slane %v5292_v25, %v9984_v10 }
0x1773   :  { %v5371_v28 = vrot.slane %v5349_v48, %v9984_v10  ;;  %v5379_v39 = vcombine.high %v5357_v29, %v5357_v29 }
0x1774   :  { %v5322_v40 = vrot.slane %v5300_v49, %v9984_v10  ;;  %v5330_v6 = vcombine.high %v5308_v44, %v5308_v44  ;;  %v5386_v16 = vrot.slane %v5308_v44, %v9989_v15 }
0x1775   :  { %v5426_v11 = vrot.slane %v5379_v39, %v9989_v15 }
0x1776   :  { %v5390_v33 = vrot.slane %v5322_v40, %v9989_v15  ;;  %v5464_v26 = vmul.f32 %v11448_v55, %v5386_v16  ;;  %v5463_v12 = vmul.f32 %v11413_v31, %v5386_v16  ;;  %v5394_v63 = vrot.slane %v5330_v6, %v9989_v15  ;;  %v12957_v6 = vld [vmem:[#allocation18_spill] sm:$0xff] }
0x1777   :  { %v5418_v55 = vrot.slane %v5357_v29, %v9989_v15  ;;  %v5332_v61 = vcombine.high %v5322_v40, %v5322_v40  ;;  %v5484_v57 = vmul.f32 %v11454_v53, %v5426_v11  ;;  %v5483_v52 = vmul.f32 %v11481_v9, %v5426_v11  ;;  %v12958_v29 = vld [vmem:[#allocation16_spill] sm:$0xff] }
0x1778   :  { %v5498_v46 = vsel %vm709_vm5, %v5464_v26, 0.0  ;;  %v5495_v21 = vsel %vm709_vm5, %v5463_v12, 0.0  ;;  %v5466_v14 = vmul.f32 %v11545_v36, %v5390_v33  ;;  %v5465_v17 = vmul.f32 %v11527_v51, %v5390_v33 }
0x1779   :  { %5499 = vadd.xlane.f32.xlu0 %v5498_v46  ;;  %5496 = vadd.xlane.f32.xlu1 %v5495_v21  ;;  %v5468_v22 = vmul.f32 %v11579_v34, %v5394_v63  ;;  %v5467_v41 = vmul.f32 %v11566_v47, %v5394_v63  ;;  %v5480_v36 = vmul.f32 %v11428_v13, %v5418_v55  ;;  %v5558_v16 = vsel %vm709_vm5, %v5484_v57, 0.0  ;;  %v12959_v63 = vld [vmem:[#allocation12_spill] sm:$0xff] }
0x177a   :  { %v5504_v31 = vsel %vm709_vm5, %v5466_v14, 0.0  ;;  %v5501_v4 = vsel %vm709_vm5, %v5465_v17, 0.0  ;;  %v5422_v51 = vrot.slane %v5371_v28, %v9989_v15  ;;  %v5479_v20 = vmul.f32 %v11407_v32, %v5418_v55 }
0x177b   :  { %v5510_v35 = vsel %vm709_vm5, %v5468_v22, 0.0  ;;  %v5507_v8 = vsel %vm709_vm5, %v5467_v41, 0.0  ;;  %v5299_v34 = vrot.slane %v5285_v5, %v9984_v10  ;;  %v5546_v47 = vsel %vm709_vm5, %v5480_v36, 0.0  ;;  %v12961_v41 = vld [vmem:[#allocation20_spill] sm:$0xff] }
0x177c   :  { %v5543_v59 = vsel %vm709_vm5, %v5479_v20, 0.0  ;;  %v5482_v13 = vmul.f32 %v11434_v54, %v5422_v51  ;;  %v5481_v62 = vmul.f32 %v11460_v37, %v5422_v51  ;;  %v5398_v23 = vrot.slane %v5332_v61, %v9989_v15  ;;  %v12962_v36 = vld [vmem:[#allocation8_spill] sm:$0xff]  ;;  %v12963_v61 = vld [vmem:[#allocation7_spill] sm:$0xff] }
0x177d   :  { %5505 = vadd.xlane.f32.xlu1 %v5504_v31  ;;  %5502 = vadd.xlane.f32.xlu0 %v5501_v4  ;;  %v5315_v32 = vrot.slane %v5299_v34, %v9984_v10  ;;  %v5334_v54 = vcombine.high %v11812_v45, %v11812_v45  ;;  %v5301_v37 = vcombine.high %v5299_v34, %v5299_v34  ;;  %v5555_v53 = vsel %vm709_vm5, %v5483_v52, 0.0  ;;  %v12960_v4 = vld [vmem:[#allocation11_spill] sm:$0xff] }
0x177e   :  { %v5552_v60 = vsel %vm709_vm5, %v5482_v13, 0.0  ;;  %v5549_v50 = vsel %vm709_vm5, %v5481_v62, 0.0  ;;  %v5470_v42 = vmul.f32 %v11572_v2, %v5398_v23  ;;  %v5469_v27 = vmul.f32 %v11653_v56, %v5398_v23  ;;  %v12964_v62 = vld [vmem:[#allocation19_spill] sm:$0xff] }
0x177f   :  { %v5402_v25 = vrot.slane %v5315_v32, %v9989_v15  ;;  %v5381_v40 = vcombine.high %v5371_v28, %v5371_v28  ;;  %v5348_v2 = vrot.slane %v5334_v54, %v9984_v10  ;;  %v5329_v26 = vrot.slane %v5301_v37, %v9984_v10  ;;  %v12966_v37 = vld [vmem:[#allocation17_spill] sm:$0xff] }
0x1780   :  { %v5516_v49 = vsel %vm709_vm5, %v5470_v42, 0.0  ;;  %v5513_v44 = vsel %vm709_vm5, %v5469_v27, 0.0  ;;  %v5331_v28 = vcombine.high %v5315_v32, %v5315_v32  ;;  %v12965_v32 = vld [vmem:[#allocation23_spill] sm:$0xff] }
0x1781   :  { %5511 = vadd.xlane.f32.xlu1 %v5510_v35  ;;  %5508 = vadd.xlane.f32.xlu0 %v5507_v8  ;;  %v5472_v56 = vmul.f32 %v11487_v43, %v5402_v25  ;;  %v5471_v45 = vmul.f32 %v12957_v6, %v5402_v25  ;;  %v5430_v33 = vrot.slane %v5381_v40, %v9989_v15  ;;  %v12967_v25 = vld [vmem:[#allocation22_spill] sm:$0xff] }
0x1782   :  { %v5364_v9 = vrot.slane %v5348_v2, %v9984_v10  ;;  %v5406_v21 = vrot.slane %v5329_v26, %v9989_v15  ;;  %v5350_v14 = vcombine.high %v5348_v2, %v5348_v2  ;;  %v5410_v34 = vrot.slane %v5331_v28, %v9989_v15 }
0x1783   :  { %v5522_v12 = vsel %vm709_vm5, %v5472_v56, 0.0  ;;  %v5519_v48 = vsel %vm709_vm5, %v5471_v45, 0.0  ;;  %v5486_v43 = vmul.f32 %v12958_v29, %v5430_v33  ;;  %v5485_v46 = vmul.f32 %v12959_v63, %v5430_v33  ;;  %v12968_v56 = vld [vmem:[#allocation13_spill] sm:$0xff] }
0x1784   :  { %v5434_v17 = vrot.slane %v5364_v9, %v9989_v15  ;;  %v5474_v22 = vmul.f32 %v12960_v4, %v5406_v21  ;;  %v5473_v5 = vmul.f32 %v12961_v41, %v5406_v21  ;;  %v5378_v35 = vrot.slane %v5350_v14, %v9984_v10  ;;  %v12969_v45 = vld [vmem:[#allocation5_spill] sm:$0xff]  ;;  %v12973_v14 = vld [vmem:[#allocation6_spill] sm:$0xff] }
0x1785   :  { %5547 = vadd.xlane.f32.xlu1 %v5546_v47  ;;  %5544 = vadd.xlane.f32.xlu0 %v5543_v59  ;;  %v5564_v55 = vsel %vm709_vm5, %v5486_v43, 0.0  ;;  %v5561_v31 = vsel %vm709_vm5, %v5485_v46, 0.0  ;;  %v5333_v59 = vcombine.high %v5329_v26, %v5329_v26  ;;  %v5476_v23 = vmul.f32 %v12964_v62, %v5410_v34  ;;  %v12972_v46 = vld [vmem:[#allocation21_spill] sm:$0xff] }
0x1786   :  { %v5488_v51 = vmul.f32 %v12962_v36, %v5434_v17  ;;  %v5528_v8 = vsel %vm709_vm5, %v5474_v22, 0.0  ;;  %v5525_v20 = vsel %vm709_vm5, %v5473_v5, 0.0  ;;  %v5487_v39 = vmul.f32 %v12963_v61, %v5434_v17 }
0x1787   :  { %v5475_v11 = vmul.f32 %v12965_v32, %v5410_v34  ;;  %v5380_v42 = vcombine.high %v5364_v9, %v5364_v9  ;;  %v5534_v27 = vsel %vm709_vm5, %v5476_v23, 0.0  ;;  %v5382_v52 = vcombine.high %v5378_v35, %v5378_v35 }
0x1788   :  { %v5570_v47 = vsel %vm709_vm5, %v5488_v51, 0.0  ;;  %v5567_v13 = vsel %vm709_vm5, %v5487_v39, 0.0 }
0x1789   :  { %5553 = vadd.xlane.f32.xlu1 %v5552_v60  ;;  %5550 = vadd.xlane.f32.xlu0 %v5549_v50  ;;  %v5438_v60 = vrot.slane %v5378_v35, %v9989_v15  ;;  %v5414_v50 = vrot.slane %v5333_v59, %v9989_v15  ;;  %v5531_v54 = vsel %vm709_vm5, %v5475_v11, 0.0  ;;  %v5446_v29 = vrot.slane %v5382_v52, %v9989_v15 }
0x178b   :  { %v5490_v57 = vmul.f32 %v12966_v37, %v5438_v60  ;;  %v5478_v6 = vmul.f32 %v12968_v56, %v5414_v50  ;;  %v5494_v21 = vmul.f32 %v12972_v46, %v5446_v29  ;;  %v5493_v17 = vmul.f32 %v12973_v14, %v5446_v29 }
0x178d   :  { %5517 = vadd.xlane.f32.xlu1 %v5516_v49  ;;  %5514 = vadd.xlane.f32.xlu0 %v5513_v44  ;;  %v5489_v49 = vmul.f32 %v12967_v25, %v5438_v60  ;;  %v5442_v44 = vrot.slane %v5380_v42, %v9989_v15  ;;  %v5576_v40 = vsel %vm709_vm5, %v5490_v57, 0.0  ;;  %v5540_v26 = vsel %vm709_vm5, %v5478_v6, 0.0 }
0x178e   :  { %v5588_v28 = vsel %vm709_vm5, %v5494_v21, 0.0 }
0x178f   :  { %v5573_v2 = vsel %vm709_vm5, %v5489_v49, 0.0 }
0x1791   :  { %5559 = vadd.xlane.f32.xlu1 %v5558_v16  ;;  %5556 = vadd.xlane.f32.xlu0 %v5555_v53  ;;  %v5477_v16 = vmul.f32 %v12969_v45, %v5414_v50  ;;  %v12970_v53 = vld [vmem:[#allocation10_spill] sm:$0xff] }
0x1792   :  { %v5492_v33 = vmul.f32 %v12970_v53, %v5442_v44 }
0x1793   :  { %v5537_v9 = vsel %vm709_vm5, %v5477_v16, 0.0 }
0x1794   :  { %v5582_v43 = vsel %vm709_vm5, %v5492_v33, 0.0 }
0x1795   :  { %5523 = vadd.xlane.f32.xlu1 %v5522_v12  ;;  %5520 = vadd.xlane.f32.xlu0 %v5519_v48  ;;  %v12971_v12 = vld [vmem:[#allocation24_spill] sm:$0xff] }
0x1796   :  { %v5491_v48 = vmul.f32 %v12971_v12, %v5442_v44 }
0x1798   :  { %v5579_v63 = vsel %vm709_vm5, %v5491_v48, 0.0 }
0x1799   :  { %5565 = vadd.xlane.f32.xlu1 %v5564_v55  ;;  %5562 = vadd.xlane.f32.xlu0 %v5561_v31  ;;  %v5585_v55 = vsel %vm709_vm5, %v5493_v17, 0.0 }
0x179d   :  { %5529 = vadd.xlane.f32.xlu1 %v5528_v8  ;;  %5526 = vadd.xlane.f32.xlu0 %v5525_v20 }
0x17a1   :  { %5571 = vadd.xlane.f32.xlu1 %v5570_v47  ;;  %5568 = vadd.xlane.f32.xlu0 %v5567_v13 }
0x17a5   :  { %5535 = vadd.xlane.f32.xlu1 %v5534_v27  ;;  %5532 = vadd.xlane.f32.xlu0 %v5531_v54 }
0x17a9   :  { %5577 = vadd.xlane.f32.xlu1 %v5576_v40  ;;  %5574 = vadd.xlane.f32.xlu0 %v5573_v2 }
0x17ad   :  { %5541 = vadd.xlane.f32.xlu1 %v5540_v26  ;;  %5538 = vadd.xlane.f32.xlu0 %v5537_v9 }
0x17b1   :  { %5583 = vadd.xlane.f32.xlu1 %v5582_v43  ;;  %5580 = vadd.xlane.f32.xlu0 %v5579_v63 }
0x17b5   :  { %5589 = vadd.xlane.f32.xlu1 %v5588_v28  ;;  %5586 = vadd.xlane.f32.xlu0 %v5585_v55 }
0x1806   :  { %v5500_v31 = vpop.xlane.xlu0 %5499  ;;  %v5497_v4 = vpop.xlane.xlu1 %5496 }
0x1807   :  { %v5638_v52 = vrot.slane %v5500_v31, %v10306_v3  ;;  %v5634_v40 = vrot.slane %v5497_v4, %v10303_v1 }
0x1809   :  { %v5639_v48 = vsel %vm853_vm6, %v5638_v52, %v5634_v40 }
0x180a   :  { %v5506_v22 = vpop.xlane.xlu1 %5505  ;;  %v5503_v41 = vpop.xlane.xlu0 %5502 }
0x180b   :  { %v5647_v57 = vrot.slane %v5506_v22, %v10306_v3  ;;  %v5643_v25 = vrot.slane %v5503_v41, %v10303_v1 }
0x180d   :  { %v5648_v33 = vsel %vm853_vm6, %v5647_v57, %v5643_v25 }
0x180e   :  { %v5512_v5 = vpop.xlane.xlu1 %5511  ;;  %v5509_v36 = vpop.xlane.xlu0 %5508  ;;  %v5775_v14 = vsel %vm990_vm7, %v5648_v33, %v5639_v48 }
0x180f   :  { %v5656_v49 = vrot.slane %v5512_v5, %v10306_v3  ;;  %v5652_v44 = vrot.slane %v5509_v36, %v10303_v1 }
0x1811   :  { %v5657_v26 = vsel %vm853_vm6, %v5656_v49, %v5652_v44 }
0x1812   :  { %v11909_v51 = vpop.xlane.xlu1 %5547  ;;  %v11911_v35 = vpop.xlane.xlu0 %5544  ;;  %v5776_v28 = vsel %vm992_vm8, %v5657_v26, %v5775_v14 }
0x1813   :  { %v5710_v4 = vrot.slane %v11909_v51, %v10306_v3  ;;  %v5706_v22 = vrot.slane %v11911_v35, %v10303_v1 }
0x1814   :  { %v11913_v8 = vpop.f32.mrb[16].mxu0 }
0x1815   :  { %v11915_v20 = vpop.f32.mrb[17].mxu0  ;;  %v5711_v44 = vsel %vm853_vm6, %v5710_v4, %v5706_v22 }
0x1816   :  { %v5554_v61 = vpop.xlane.xlu1 %5553  ;;  %v5551_v39 = vpop.xlane.xlu0 %5550 }
0x1817   :  { %v5719_v55 = vrot.slane %v5554_v61, %v10306_v3  ;;  %v5715_v31 = vrot.slane %v5551_v39, %v10303_v1 }
0x181a   :  { %v5518_v34 = vpop.xlane.xlu1 %5517  ;;  %v5515_v47 = vpop.xlane.xlu0 %5514 }
0x181b   :  { %v5665_v2 = vrot.slane %v5518_v34, %v10306_v3  ;;  %v5661_v56 = vrot.slane %v5515_v47, %v10303_v1 }
0x181d   :  { %v5666_v29 = vsel %vm853_vm6, %v5665_v2, %v5661_v56 }
0x181e   :  { %v11917_v59 = vpop.xlane.xlu1 %5559  ;;  %v11919_v13 = vpop.xlane.xlu0 %5556  ;;  %v5777_v41 = vsel %vm994_vm9, %v5666_v29, %v5776_v28 }
0x181f   :  { %v5728_v36 = vrot.slane %v11917_v59, %v10306_v3  ;;  %v5724_v34 = vrot.slane %v11919_v13, %v10303_v1 }
0x1820   :  { %v11921_v62 = vpop.f32.mrb[18].mxu0 }
0x1821   :  { %v11923_v23 = vpop.f32.mrb[19].mxu0  ;;  %v5729_v52 = vsel %vm853_vm6, %v5728_v36, %v5724_v34 }
0x1822   :  { %v5524_v32 = vpop.xlane.xlu1 %5523  ;;  %v5521_v11 = vpop.xlane.xlu0 %5520 }
0x1823   :  { %v5674_v16 = vrot.slane %v5524_v32, %v10306_v3  ;;  %v5670_v53 = vrot.slane %v5521_v11, %v10303_v1 }
0x1825   :  { %v5675_v17 = vsel %vm853_vm6, %v5674_v16, %v5670_v53 }
0x1826   :  { %v5566_v60 = vpop.xlane.xlu1 %5565  ;;  %v5563_v50 = vpop.xlane.xlu0 %5562  ;;  %v5778_v61 = vsel %vm996_vm10, %v5675_v17, %v5777_v41 }
0x1827   :  { %v5737_v51 = vrot.slane %v5566_v60, %v10306_v3  ;;  %v5733_v35 = vrot.slane %v5563_v50, %v10303_v1 }
0x182a   :  { %v5530_v42 = vpop.xlane.xlu1 %5529  ;;  %v5527_v27 = vpop.xlane.xlu0 %5526 }
0x182b   :  { %v5683_v9 = vrot.slane %v5530_v42, %v10306_v3  ;;  %v5679_v12 = vrot.slane %v5527_v27, %v10303_v1  ;;  %v5720_v27 = vsel %vm853_vm6, %v5719_v55, %v5715_v31 }
0x182c   :  { %v5782_v16 = vsel %vm990_vm7, %v5720_v27, %v5711_v44 }
0x182d   :  { %v5684_v5 = vsel %vm853_vm6, %v5683_v9, %v5679_v12  ;;  %v5783_v33 = vsel %vm992_vm8, %v5729_v52, %v5782_v16 }
0x182e   :  { %v11925_v54 = vpop.xlane.xlu1 %5571  ;;  %v5569_v37 = vpop.xlane.xlu0 %5568  ;;  %v5779_v59 = vsel %vm998_vm11, %v5684_v5, %v5778_v61 }
0x182f   :  { %v5746_v13 = vrot.slane %v11925_v54, %v10306_v3  ;;  %v5742_v57 = vrot.slane %v5569_v37, %v10303_v1  ;;  %v5738_v54 = vsel %vm853_vm6, %v5737_v51, %v5733_v35  ;;  %v8456_v51 = vld [vmem:[%s12748_s8 + $0x28] sm:$0xff] }
0x1830   :  { %v5784_v12 = vsel %vm994_vm9, %v5738_v54, %v5783_v33  ;;  %8995 = vmatprep.subr.mxu0 %v8456_v51  ;;  %v8455_v54 = vld [vmem:[%s12748_s8 + $0x20] sm:$0xff] }
0x1831   :  { %v5747_v53 = vsel %vm853_vm6, %v5746_v13, %v5742_v57  ;;  %8996 = vmatpush3.msra.mxu0 %v8456_v51 }
0x1832   :  { %v5536_v6 = vpop.xlane.xlu1 %5535  ;;  %v5533_v45 = vpop.xlane.xlu0 %5532  ;;  %9000 = vmatprep.subr.mxu0 %v8455_v54 }
0x1833   :  { %v5692_v43 = vrot.slane %v5536_v6, %v10306_v3  ;;  %v5688_v63 = vrot.slane %v5533_v45, %v10303_v1 }
0x1835   :  { %v5693_v39 = vsel %vm853_vm6, %v5692_v43, %v5688_v63  ;;  %v5785_v63 = vsel %vm996_vm10, %v5747_v53, %v5784_v12 }
0x1836   :  { %v5578_v46 = vpop.xlane.xlu1 %5577  ;;  %v5575_v21 = vpop.xlane.xlu0 %5574  ;;  %v5780_v25 = vsel %vm1000_vm13, %v5693_v39, %v5779_v59 }
0x1837   :  { %v5755_v49 = vrot.slane %v5578_v46, %v10306_v3  ;;  %v5751_v60 = vrot.slane %v5575_v21, %v10303_v1 }
0x1839   :  { %v5756_v26 = vsel %vm853_vm6, %v5755_v49, %v5751_v60 }
0x183a   :  { %v5542_v47 = vpop.xlane.xlu1 %5541  ;;  %v5539_v32 = vpop.xlane.xlu0 %5538  ;;  %v5786_v14 = vsel %vm998_vm11, %v5756_v26, %v5785_v63 }
0x183b   :  { %v5701_v11 = vrot.slane %v5542_v47, %v10306_v3  ;;  %v5697_v42 = vrot.slane %v5539_v32, %v10303_v1 }
0x183d   :  { %v5702_v50 = vsel %vm853_vm6, %v5701_v11, %v5697_v42 }
0x183e   :  { %v5584_v40 = vpop.xlane.xlu1 %5583  ;;  %v5581_v2 = vpop.xlane.xlu0 %5580  ;;  %v5781_v56 = vsel %vm1002_vm12, %v5702_v50, %v5780_v25 }
0x183f   :  { %v5764_v37 = vrot.slane %v5584_v40, %v10306_v3  ;;  %v5760_v6 = vrot.slane %v5581_v2, %v10303_v1  ;;  %v5866_v45 = vadd.f32 %v11923_v23, %v5781_v56 }
0x1841   :  { %v5874_v9 = vadd.f32 %v11771_v19, %v5866_v45  ;;  %v5765_v48 = vsel %vm853_vm6, %v5764_v37, %v5760_v6 }
0x1842   :  { %v5590_v29 = vpop.xlane.xlu1 %5589  ;;  %v5587_v43 = vpop.xlane.xlu0 %5586  ;;  %v5787_v17 = vsel %vm1000_vm13, %v5765_v48, %v5786_v14 }
0x1843   :  { %v5773_v23 = vrot.slane %v5590_v29, %v10306_v3  ;;  %v5769_v46 = vrot.slane %v5587_v43, %v10303_v1  ;;  %v5876_v21 = vsel %vm709_vm5, %v5874_v9, -inf }
0x1844   :  { %5877 = vmax.xlane.f32.xlu0 %v5876_v21 }
0x1845   :  { %v5774_v19 = vsel %vm853_vm6, %v5773_v23, %v5769_v46 }
0x1846   :  { %v5788_v28 = vsel %vm1002_vm12, %v5774_v19, %v5787_v17  ;;  %v12053_v17 = vld [vmem:[%s12865_s3 + $0x88] sm:$0xff]  ;;  %v12059_v19 = vld [vmem:[%s12865_s3 + $0x80] sm:$0xff] }
0x1847   :  { %v5871_v55 = vadd.f32 %v11921_v62, %v5788_v28 }
0x1849   :  { %v5875_v31 = vadd.f32 %v11780_v38, %v5871_v55  ;;  %v12976_v38 = vld [vmem:[#allocation9_spill] sm:$0xff] }
0x184b   :  { %v5879_v4 = vsel %vm709_vm5, %v5875_v31, -inf }
0x184c   :  { %5880 = vmax.xlane.f32.xlu1 %v5879_v4 }
0x18d1   :  { %v5878_v22 = vpop.xlane.xlu0 %5877 }
0x18d2   :  { %v5882_v41 = vsub.f32 %v5874_v9, %v5878_v22 }
0x18d4   :  { %v5884_v5 = vmul.f32 1.442695, %v5882_v41 }
0x18d6   :  { %9547 = vpow2.f32 %v5884_v5 }
0x18d9   :  { %v5881_v36 = vpop.xlane.xlu1 %5880 }
0x18da   :  { %v5883_v34 = vsub.f32 %v5875_v31, %v5881_v36  ;;  %v12073_v36 = vld [vmem:[%s12865_s3 + $0x8] sm:$0xff] }
0x18dc   :  { %v5886_v61 = vmul.f32 1.442695, %v5883_v34 }
0x18de   :  { %9549 = vpow2.f32 %v5886_v61  ;;  %v12079_v61 = vld [vmem:[%s12865_s3] sm:$0xff] }
0x18e0   :  { %v9548_v39 = vpop.eup %9547 }
0x18e1   :  { %v5888_v47 = vsel %vm709_vm5, %v9548_v39, 0.0 }
0x18e2   :  { %5889 = vadd.xlane.f32.xlu0 %v5888_v47 }
0x18e8   :  { %v9550_v32 = vpop.eup %9549 }
0x18e9   :  { %v5891_v62 = vsel %vm709_vm5, %v9550_v32, 0.0 }
0x18ea   :  { %5892 = vadd.xlane.f32.xlu1 %v5891_v62 }
0x18f8   :  { %9461 = vrot.lane.b32.xlu0 %v11362_v18, %s12974_s26 }
0x18fb   :  { %9466 = vrot.lane.b32.xlu1 %v12976_v38, %s12975_s28 }
0x18fc   :  { %6149 = vrot.lane.b32.xlu0 %v11380_v30, %s12975_s28 }
0x18ff   :  { %6147 = vrot.lane.b32.xlu1 %v11366_v7, %s12975_s28 }
0x1900   :  { %6546 = vrot.lane.b32.xlu0 %v11368_v0, %s12975_s28 }
0x1903   :  { %9471 = vrot.lane.b32.xlu1 %v11362_v18, %s12977_s7 }
0x1907   :  { %6548 = vrot.lane.b32.xlu1 %v11388_v24, %s12975_s28 }
0x196f   :  { %v5890_v35 = vpop.xlane.xlu0 %5889 }
0x1970   :  { %9551 = vrcp.f32 %v5890_v35 }
0x1973   :  { %v9462_v11 = vpop.permute.xlu0 %9461 }
0x1974   :  { %v9464_v42 = vunpack.i.h.bf16 %v9462_v11  ;;  %v9463_v27 = vunpack.i.l.bf16 %v9462_v11 }
0x1976   :  { %v9285_v59 = vpack.c.bf16 %v9464_v42, %v9463_v27  ;;  %v12092_v42 = vld [vmem:[%s12865_s3 + $0x90] sm:$0xff] }
0x1977   :  { %v5893_v13 = vpop.xlane.xlu1 %5892  ;;  %v6150_v56 = vpop.permute.xlu0 %6149 }
0x1978   :  { %9553 = vrcp.f32 %v5893_v13  ;;  %9286 = vmatprep.subr.bf16.mxu1 %v9285_v59 }
0x1979   :  { %9288 = vmatpush3.bf16.msra.mxu1 %v9285_v59  ;;  %v12098_v59 = vld [vmem:[%s12865_s3 + $0x98] sm:$0xff] }
0x197a   :  { %v9552_v57 = vpop.eup %9551 }
0x197b   :  { %v9467_v25 = vpop.permute.xlu1 %9466  ;;  %v5896_v49 = vmul.f32 %v9552_v57, %v9548_v39  ;;  %v6547_v29 = vpop.permute.xlu0 %6546 }
0x197c   :  { %v9469_v60 = vunpack.i.h.bf16 %v9467_v25  ;;  %v9468_v50 = vunpack.i.l.bf16 %v9467_v25 }
0x197d   :  { %8992 = vmatprep.mubr.msk.f32.mxu1 %vm709_vm5, %v5896_v49 }
0x197e   :  { %v9289_v44 = vpack.c.bf16 %v9469_v60, %v9468_v50 }
0x197f   :  { %v6148_v2 = vpop.permute.xlu1 %6147 }
0x1980   :  { %9291 = vmatprep.subr.msk.bf16.mxu1 %vm9954_vm4, %v9289_v44 }
0x1982   :  { %v9554_v52 = vpop.eup %9553 }
0x1983   :  { %v5897_v40 = vmul.f32 %v9554_v52, %v9550_v32  ;;  %v9472_v37 = vpop.permute.xlu1 %9471  ;;  %v12114_v52 = vld [vmem:[%s12865_s3 + $0xa0] sm:$0xff] }
0x1984   :  { %v9474_v6 = vunpack.i.h.bf16 %v9472_v37  ;;  %v9473_v45 = vunpack.i.l.bf16 %v9472_v37 }
0x1985   :  { %8993 = vmatmul.mubr.msk.f32.vlgmr.msra.gmra.mrb[30].mxu1 %vm709_vm5, %v5897_v40 }
0x1986   :  { %9294 = vmatpush3.bf16.xpose.msk.msra.mxu1 %vm9954_vm4, %v9289_v44  ;;  %9009 = vmatprep.mubr.msk.f32.mxu1 %vm409_vm3, %v6148_v2  ;;  %v9295_v33 = vpack.c.bf16 %v9474_v6, %v9473_v45  ;;  %v12120_v2 = vld [vmem:[%s12865_s3 + $0xa8] sm:$0xff] }
0x1987   :  { %v6549_v55 = vpop.permute.xlu1 %6548 }
0x198d   :  { %9010 = vmatmul.mubr.msk.f32.vlgmr.msra.gmra.mrb[32].mxu1 %vm409_vm3, %v6150_v56 }
0x1a58   :  { %v8994_v16 = vpop.f32.mrb[30].mxu1 }
0x1a59   :  { %v5976_v53 = vpop.f32.mrb[31].mxu1 }
0x1a5a   :  { %8997 = vmatprep.mubr.msk.f32.mxu0 %vm409_vm3, %v5976_v53  ;;  %v12135_v53 = vld [vmem:[%s12865_s3 + $0xc0] sm:$0xff] }
0x1a5b   :  { %8998 = vmatmul.mubr.msk.f32.vlgmr.msra.gmra.mrb[20].mxu0 %vm409_vm3, %v8994_v16 }
0x1a5c   :  { %9001 = vmatpush3.msra.mxu0 %v8455_v54  ;;  %9002 = vmatprep.mubr.msk.f32.mxu0 %vm409_vm3, %v11915_v20 }
0x1a5d   :  { %9297 = vmatprep.subr.msk.bf16.mxu0 %vm9954_vm4, %v9295_v33 }
0x1a60   :  { %v9011_v26 = vpop.f32.mrb[32].mxu1 }
0x1a61   :  { %v6296_v9 = vrot.slane %v9011_v26, %v9984_v10  ;;  %v6229_v12 = vpop.f32.mrb[33].mxu1  ;;  %v6289_v20 = vcombine.high %v9011_v26, %v9011_v26  ;;  %v12141_v26 = vld [vmem:[%s12865_s3 + $0xc8] sm:$0xff] }
0x1a62   :  { %v6247_v48 = vrot.slane %v6229_v12, %v9984_v10  ;;  %v6240_v32 = vcombine.high %v6229_v12, %v6229_v12 }
0x1a63   :  { %v6304_v43 = vcombine.high %v6296_v9, %v6296_v9  ;;  %v6312_v63 = vrot.slane %v6296_v9, %v9984_v10  ;;  %9003 = vmatmul.mubr.msk.f32.vlgmr.msra.gmra.mrb[20].mxu0 %vm409_vm3, %v11913_v8  ;;  %v12063_v31 = vrot.slane %v6289_v20, %v9984_v10  ;;  %v12159_v20 = vld [vmem:[%s12865_s3 + $0x10] sm:$0xff] }
0x1a64   :  { %v6263_v23 = vrot.slane %v6247_v48, %v9984_v10  ;;  %9300 = vmatpush3.bf16.xpose.msk.msra.mxu0 %vm9954_vm4, %v9295_v33  ;;  %9016 = vmatprep.mubr.msk.f32.mxu0 %vm409_vm3, %v6547_v29  ;;  %v6255_v62 = vcombine.high %v6247_v48, %v6247_v48  ;;  %v12102_v57 = vrot.slane %v6240_v32, %v9984_v10  ;;  %v12149_v48 = vld [vmem:[%s12865_s3 + $0x20] sm:$0xff] }
0x1a65   :  { %v12046_v46 = vrot.slane %v6304_v43, %v9984_v10  ;;  %v6373_v21 = vrot.slane %v6312_v63, %v9989_v15  ;;  %v6334_v4 = vcombine.high %v6312_v63, %v6312_v63  ;;  %v12084_v47 = vrot.slane %v12063_v31, %v9984_v10 }
0x1a66   :  { %v6341_v14 = vrot.slane %v6263_v23, %v9989_v15  ;;  %v12105_v25 = vrot.slane %v6255_v62, %v9984_v10  ;;  %v6285_v49 = vcombine.high %v6263_v23, %v6263_v23  ;;  %v12125_v54 = vrot.slane %v12102_v57, %v9984_v10  ;;  %v12193_v62 = vld [vmem:[%s12865_s3 + $0xb0] sm:$0xff] }
0x1a67   :  { %v6435_v8 = vmul.f32 %v12053_v17, %v6373_v21  ;;  %v6434_v28 = vmul.f32 %v12059_v19, %v6373_v21  ;;  %v6377_v22 = vrot.slane %v12046_v46, %v9989_v15  ;;  %v6381_v51 = vrot.slane %v6334_v4, %v9989_v15  ;;  %12979 = vst [vmem:[#allocation16_spill] sm:$0xff] %v12193_v62 }
0x1a68   :  { %v6419_v34 = vmul.f32 %v12073_v36, %v6341_v14  ;;  %v6418_v39 = vmul.f32 %v12079_v61, %v6341_v14  ;;  %v6389_v60 = vrot.slane %v12084_v47, %v9989_v15  ;;  %v6349_v37 = vrot.slane %v6285_v49, %v9989_v15  ;;  %v12206_v49 = vld [vmem:[%s12865_s3 + $0x48] sm:$0xff] }
0x1a69   :  { %v6501_v41 = vsel %vm709_vm5, %v6435_v8, 0.0  ;;  %v6498_v5 = vsel %vm709_vm5, %v6434_v28, 0.0  ;;  %v6436_v27 = vmul.f32 %v12092_v42, %v6377_v22  ;;  %v6437_v13 = vmul.f32 %v12098_v59, %v6377_v22  ;;  %v12167_v8 = vld [vmem:[%s12865_s3 + $0x18] sm:$0xff] }
0x1a6a   :  { %6502 = vadd.xlane.f32.xlu0 %v6501_v41  ;;  %6499 = vadd.xlane.f32.xlu1 %v6498_v5  ;;  %v6453_v35 = vsel %vm709_vm5, %v6419_v34, 0.0  ;;  %v6450_v11 = vsel %vm709_vm5, %v6418_v39, 0.0  ;;  %v6438_v40 = vmul.f32 %v12114_v52, %v6381_v51  ;;  %v6439_v56 = vmul.f32 %v12120_v2, %v6381_v51  ;;  %v12186_v34 = vld [vmem:[%s12865_s3 + $0x28] sm:$0xff] }
0x1a6b   :  { %9017 = vmatmul.mubr.msk.f32.vlgmr.msra.gmra.mrb[22].mxu0 %vm409_vm3, %v6549_v55  ;;  %v6504_v50 = vsel %vm709_vm5, %v6436_v27, 0.0  ;;  %v6507_v44 = vsel %vm709_vm5, %v6437_v13, 0.0  ;;  %v6345_v6 = vrot.slane %v12105_v25, %v9989_v15  ;;  %v6442_v33 = vmul.f32 %v12135_v53, %v6389_v60  ;;  %v12173_v55 = vld [vmem:[%s12865_s3 + $0x40] sm:$0xff] }
0x1a6c   :  { %v6510_v45 = vsel %vm709_vm5, %v6438_v40, 0.0  ;;  %v6513_v16 = vsel %vm709_vm5, %v6439_v56, 0.0  ;;  %v6443_v9 = vmul.f32 %v12141_v26, %v6389_v60  ;;  %v6305_v12 = vcombine.high %v12063_v31, %v12063_v31  ;;  %12978 = vst [vmem:[#allocation18_spill] sm:$0xff] %v12173_v55  ;;  %v12222_v56 = vld [vmem:[%s12865_s3 + $0xb8] sm:$0xff] }
0x1a6d   :  { %v6422_v29 = vmul.f32 %v12149_v48, %v6349_v37  ;;  %v6357_v43 = vrot.slane %v12125_v54, %v9989_v15  ;;  %v6522_v63 = vsel %vm709_vm5, %v6442_v33, 0.0  ;;  %v6420_v21 = vmul.f32 %v12159_v20, %v6345_v6  ;;  %12981 = vst [vmem:[#allocation11_spill] sm:$0xff] %v12222_v56  ;;  %v12231_v33 = vld [vmem:[%s12865_s3 + $0xe0] sm:$0xff] }
0x1a6e   :  { %6454 = vadd.xlane.f32.xlu1 %v6453_v35  ;;  %6451 = vadd.xlane.f32.xlu0 %v6450_v11  ;;  %v6525_v23 = vsel %vm709_vm5, %v6443_v9, 0.0  ;;  %v6336_v14 = vcombine.high %v12046_v46, %v12046_v46  ;;  %v6421_v28 = vmul.f32 %v12167_v8, %v6345_v6  ;;  %v12180_v41 = vrot.slane %v6305_v12, %v9984_v10 }
0x1a6f   :  { %v6426_v31 = vmul.f32 %v12173_v55, %v6357_v43  ;;  %v6462_v4 = vsel %vm709_vm5, %v6422_v29, 0.0  ;;  %v6456_v46 = vsel %vm709_vm5, %v6420_v21, 0.0  ;;  %v6423_v39 = vmul.f32 %v12186_v34, %v6349_v37  ;;  %12982 = vst [vmem:[#allocation20_spill] sm:$0xff] %v12231_v33  ;;  %v12248_v21 = vld [vmem:[%s12865_s3 + $0x30] sm:$0xff] }
0x1a70   :  { %v6385_v22 = vrot.slane %v6336_v14, %v9989_v15  ;;  %v6459_v5 = vsel %vm709_vm5, %v6421_v28, 0.0  ;;  %v6393_v35 = vrot.slane %v12180_v41, %v9989_v15  ;;  %v6335_v11 = vcombine.high %v12084_v47, %v12084_v47  ;;  %v12213_v47 = vld [vmem:[%s12865_s3 + $0xd0] sm:$0xff]  ;;  %12984 = vst [vmem:[#allocation7_spill] sm:$0xff] %v12248_v21 }
0x1a71   :  { %v6474_v32 = vsel %vm709_vm5, %v6426_v31, 0.0  ;;  %v6256_v27 = vcombine.high %v12102_v57, %v12102_v57  ;;  %v6465_v13 = vsel %vm709_vm5, %v6423_v39, 0.0  ;;  %v6427_v60 = vmul.f32 %v12206_v49, %v6357_v43  ;;  %12980 = vst [vmem:[#allocation12_spill] sm:$0xff] %v12213_v47 }
0x1a72   :  { %6505 = vadd.xlane.f32.xlu1 %v6504_v50  ;;  %6508 = vadd.xlane.f32.xlu0 %v6507_v44  ;;  %v6440_v51 = vmul.f32 %v12193_v62, %v6385_v22  ;;  %v6444_v44 = vmul.f32 %v12213_v47, %v6393_v35  ;;  %v6397_v57 = vrot.slane %v6335_v11, %v9989_v15  ;;  %v12276_v11 = vld [vmem:[%s12865_s3 + $0x60] sm:$0xff] }
0x1a73   :  { %v6287_v40 = vcombine.high %v12105_v25, %v12105_v25  ;;  %v6441_v37 = vmul.f32 %v12222_v56, %v6385_v22  ;;  %v6284_v6 = vrot.slane %v6256_v27, %v9984_v10  ;;  %v6286_v29 = vcombine.high %v12125_v54, %v12125_v54  ;;  %v12255_v54 = vld [vmem:[%s12865_s3 + $0xe8] sm:$0xff]  ;;  %12988 = vst [vmem:[#allocation22_spill] sm:$0xff] %v12276_v11 }
0x1a74   :  { %v6516_v50 = vsel %vm709_vm5, %v6440_v51, 0.0  ;;  %v6446_v25 = vmul.f32 %v12231_v33, %v6397_v57  ;;  %12985 = vst [vmem:[#allocation19_spill] sm:$0xff] %v12255_v54  ;;  %v6447_v31 = vmul.f32 %v12255_v54, %v6397_v57  ;;  %v12270_v51 = vld [vmem:[%s12865_s3 + $0x38] sm:$0xff] }
0x1a75   :  { %v6353_v9 = vrot.slane %v6287_v40, %v9989_v15  ;;  %v6519_v12 = vsel %vm709_vm5, %v6441_v37, 0.0  ;;  %v6361_v28 = vrot.slane %v6284_v6, %v9989_v15  ;;  %12987 = vst [vmem:[#allocation17_spill] sm:$0xff] %v12270_v51  ;;  %v12289_v37 = vld [vmem:[%s12865_s3 + $0x58] sm:$0xff] }
0x1a76   :  { %6511 = vadd.xlane.f32.xlu1 %v6510_v45  ;;  %6514 = vadd.xlane.f32.xlu0 %v6513_v16  ;;  %v6477_v45 = vsel %vm709_vm5, %v6427_v60, 0.0  ;;  %v6528_v16 = vsel %vm709_vm5, %v6444_v44, 0.0  ;;  %v6534_v43 = vsel %vm709_vm5, %v6446_v25, 0.0  ;;  %v6337_v44 = vcombine.high %v12180_v41, %v12180_v41  ;;  %12989 = vst [vmem:[#allocation13_spill] sm:$0xff] %v12289_v37 }
0x1a77   :  { %v6424_v14 = vmul.f32 %v12248_v21, %v6353_v9 }
0x1a79   :  { %v6468_v22 = vsel %vm709_vm5, %v6424_v14, 0.0 }
0x1a7a   :  { %6523 = vadd.xlane.f32.xlu1 %v6522_v63  ;;  %6526 = vadd.xlane.f32.xlu0 %v6525_v23  ;;  %v12242_v63 = vld [vmem:[%s12865_s3 + $0xd8] sm:$0xff] }
0x1a7b   :  { %12983 = vst [vmem:[#allocation8_spill] sm:$0xff] %v12242_v63  ;;  %v6445_v23 = vmul.f32 %v12242_v63, %v6393_v35  ;;  %v6425_v35 = vmul.f32 %v12270_v51, %v6353_v9 }
0x1a7d   :  { %v6471_v57 = vsel %vm709_vm5, %v6425_v35, 0.0 }
0x1a7e   :  { %6463 = vadd.xlane.f32.xlu1 %v6462_v4  ;;  %6457 = vadd.xlane.f32.xlu0 %v6456_v46  ;;  %v6365_v4 = vrot.slane %v6286_v29, %v9989_v15  ;;  %v6531_v46 = vsel %vm709_vm5, %v6445_v23, 0.0 }
0x1a80   :  { %v6430_v27 = vmul.f32 %v12276_v11, %v6365_v4 }
0x1a82   :  { %6460 = vadd.xlane.f32.xlu0 %v6459_v5  ;;  %6475 = vadd.xlane.f32.xlu1 %v6474_v32  ;;  %v12264_v5 = vld [vmem:[%s12865_s3 + $0x50] sm:$0xff]  ;;  %v6288_v32 = vcombine.high %v6284_v6, %v6284_v6  ;;  %v6486_v40 = vsel %vm709_vm5, %v6430_v27, 0.0  ;;  %v6429_v6 = vmul.f32 %v12289_v37, %v6361_v28 }
0x1a83   :  { %12986 = vst [vmem:[#allocation23_spill] sm:$0xff] %v12264_v5  ;;  %v6428_v39 = vmul.f32 %v12264_v5, %v6361_v28 }
0x1a84   :  { %v6483_v25 = vsel %vm709_vm5, %v6429_v6, 0.0 }
0x1a85   :  { %v6480_v60 = vsel %vm709_vm5, %v6428_v39, 0.0 }
0x1a86   :  { %6466 = vadd.xlane.f32.xlu0 %v6465_v13  ;;  %6517 = vadd.xlane.f32.xlu1 %v6516_v50  ;;  %v6537_v13 = vsel %vm709_vm5, %v6447_v31, 0.0  ;;  %v6369_v50 = vrot.slane %v6288_v32, %v9989_v15  ;;  %v12318_v31 = vld [vmem:[%s12865_s3 + $0x78] sm:$0xff] }
0x1a87   :  { %12993 = vst [vmem:[#allocation21_spill] sm:$0xff] %v12318_v31 }
0x1a8a   :  { %6478 = vadd.xlane.f32.xlu0 %v6477_v45  ;;  %6529 = vadd.xlane.f32.xlu1 %v6528_v16  ;;  %v12295_v45 = vld [vmem:[%s12865_s3 + $0x70] sm:$0xff]  ;;  %v6401_v16 = vrot.slane %v6337_v44, %v9989_v15 }
0x1a8b   :  { %12990 = vst [vmem:[#allocation5_spill] sm:$0xff] %v12295_v45  ;;  %v6432_v41 = vmul.f32 %v12295_v45, %v6369_v50 }
0x1a8d   :  { %v6492_v9 = vsel %vm709_vm5, %v6432_v41, 0.0 }
0x1a8e   :  { %6520 = vadd.xlane.f32.xlu0 %v6519_v12  ;;  %6535 = vadd.xlane.f32.xlu1 %v6534_v43  ;;  %v12304_v12 = vld [vmem:[%s12865_s3 + $0x68] sm:$0xff]  ;;  %v12310_v43 = vld [vmem:[%s12865_s3 + $0xf0] sm:$0xff] }
0x1a8f   :  { %12991 = vst [vmem:[#allocation10_spill] sm:$0xff] %v12304_v12  ;;  %v6431_v29 = vmul.f32 %v12304_v12, %v6365_v4  ;;  %12992 = vst [vmem:[#allocation24_spill] sm:$0xff] %v12310_v43  ;;  %v6448_v23 = vmul.f32 %v12310_v43, %v6401_v16  ;;  %v6433_v4 = vmul.f32 %v12318_v31, %v6369_v50 }
0x1a91   :  { %v6489_v14 = vsel %vm709_vm5, %v6431_v29, 0.0  ;;  %v6540_v28 = vsel %vm709_vm5, %v6448_v23, 0.0 }
0x1a92   :  { %6532 = vadd.xlane.f32.xlu0 %v6531_v46  ;;  %6469 = vadd.xlane.f32.xlu1 %v6468_v22  ;;  %v6495_v46 = vsel %vm709_vm5, %v6433_v4, 0.0  ;;  %v12325_v22 = vld [vmem:[%s12865_s3 + $0xf8] sm:$0xff] }
0x1a93   :  { %12994 = vst [vmem:[#allocation6_spill] sm:$0xff] %v12325_v22  ;;  %v6449_v39 = vmul.f32 %v12325_v22, %v6401_v16 }
0x1a95   :  { %v6543_v32 = vsel %vm709_vm5, %v6449_v39, 0.0 }
0x1a96   :  { %6538 = vadd.xlane.f32.xlu0 %v6537_v13  ;;  %6481 = vadd.xlane.f32.xlu1 %v6480_v60 }
0x1a9a   :  { %6472 = vadd.xlane.f32.xlu0 %v6471_v57  ;;  %6487 = vadd.xlane.f32.xlu1 %v6486_v40 }
0x1a9e   :  { %6484 = vadd.xlane.f32.xlu0 %v6483_v25  ;;  %6493 = vadd.xlane.f32.xlu1 %v6492_v9 }
0x1aa2   :  { %6490 = vadd.xlane.f32.xlu0 %v6489_v14  ;;  %6541 = vadd.xlane.f32.xlu1 %v6540_v28 }
0x1aa6   :  { %6496 = vadd.xlane.f32.xlu0 %v6495_v46 }
0x1aaa   :  { %6544 = vadd.xlane.f32.xlu0 %v6543_v32 }
0x1af7   :  { %v6503_v35 = vpop.xlane.xlu0 %6502  ;;  %v6500_v27 = vpop.xlane.xlu1 %6499 }
0x1af8   :  { %v6665_v33 = vrot.slane %v6503_v35, %v10306_v3  ;;  %v6661_v54 = vrot.slane %v6500_v27, %v10303_v1 }
0x1afb   :  { %v6455_v13 = vpop.xlane.xlu1 %6454  ;;  %v6452_v60 = vpop.xlane.xlu0 %6451 }
0x1afc   :  { %v6593_v47 = vrot.slane %v6455_v13, %v10306_v3  ;;  %v6589_v62 = vrot.slane %v6452_v60, %v10303_v1 }
0x1aff   :  { %v6506_v50 = vpop.xlane.xlu1 %6505  ;;  %v6509_v44 = vpop.xlane.xlu0 %6508 }
0x1b00   :  { %v6670_v12 = vrot.slane %v6506_v50, %v10303_v1  ;;  %v6674_v5 = vrot.slane %v6509_v44, %v10306_v3 }
0x1b02   :  { %v6675_v56 = vsel %vm853_vm6, %v6674_v5, %v6670_v12 }
0x1b03   :  { %v6512_v57 = vpop.xlane.xlu1 %6511  ;;  %v6515_v40 = vpop.xlane.xlu0 %6514 }
0x1b04   :  { %v6679_v37 = vrot.slane %v6512_v57, %v10303_v1  ;;  %v6683_v21 = vrot.slane %v6515_v40, %v10306_v3 }
0x1b06   :  { %v6684_v57 = vsel %vm853_vm6, %v6683_v21, %v6679_v37  ;;  %v6594_v37 = vsel %vm853_vm6, %v6593_v47, %v6589_v62 }
0x1b07   :  { %v6524_v6 = vpop.xlane.xlu1 %6523  ;;  %v6527_v41 = vpop.xlane.xlu0 %6526 }
0x1b08   :  { %v6697_v50 = vrot.slane %v6524_v6, %v10303_v1  ;;  %v6701_v44 = vrot.slane %v6527_v41, %v10306_v3 }
0x1b0b   :  { %v6464_v25 = vpop.xlane.xlu1 %6463  ;;  %v6458_v9 = vpop.xlane.xlu0 %6457 }
0x1b0c   :  { %v6598_v40 = vrot.slane %v6458_v9, %v10303_v1  ;;  %v6607_v12 = vrot.slane %v6464_v25, %v10303_v1  ;;  %v6702_v9 = vsel %vm853_vm6, %v6701_v44, %v6697_v50 }
0x1b0f   :  { %v6461_v29 = vpop.xlane.xlu0 %6460  ;;  %v12329_v23 = vpop.xlane.xlu1 %6475 }
0x1b10   :  { %v6602_v63 = vrot.slane %v6461_v29, %v10306_v3  ;;  %v6666_v29 = vsel %vm853_vm6, %v6665_v33, %v6661_v54  ;;  %v6625_v62 = vrot.slane %v12329_v23, %v10303_v1 }
0x1b11   :  { %v6737_v5 = vsel %vm990_vm7, %v6675_v56, %v6666_v29 }
0x1b12   :  { %v6603_v6 = vsel %vm853_vm6, %v6602_v63, %v6598_v40  ;;  %v6738_v41 = vsel %vm992_vm8, %v6684_v57, %v6737_v5 }
0x1b13   :  { %v6467_v16 = vpop.xlane.xlu0 %6466  ;;  %v6518_v14 = vpop.xlane.xlu1 %6517  ;;  %v6730_v63 = vsel %vm990_vm7, %v6603_v6, %v6594_v37 }
0x1b14   :  { %v6611_v35 = vrot.slane %v6467_v16, %v10306_v3  ;;  %v6688_v21 = vrot.slane %v6518_v14, %v10303_v1 }
0x1b16   :  { %v6612_v33 = vsel %vm853_vm6, %v6611_v35, %v6607_v12 }
0x1b17   :  { %v12331_v28 = vpop.xlane.xlu0 %6478  ;;  %v6530_v4 = vpop.xlane.xlu1 %6529  ;;  %v6731_v44 = vsel %vm992_vm8, %v6612_v33, %v6730_v63  ;;  %v12400_v63 = vld [vmem:[%s12881_s27 + $0x8] sm:$0xff] }
0x1b1b   :  { %v6521_v46 = vpop.xlane.xlu0 %6520  ;;  %v6536_v39 = vpop.xlane.xlu1 %6535 }
0x1b1c   :  { %v6692_v27 = vrot.slane %v6521_v46, %v10306_v3  ;;  %v6706_v46 = vrot.slane %v6530_v4, %v10303_v1  ;;  %v6715_v50 = vrot.slane %v6536_v39, %v10303_v1 }
0x1b1e   :  { %v6693_v54 = vsel %vm853_vm6, %v6692_v27, %v6688_v21 }
0x1b1f   :  { %v6533_v32 = vpop.xlane.xlu0 %6532  ;;  %v6470_v43 = vpop.xlane.xlu1 %6469  ;;  %v6739_v57 = vsel %vm994_vm9, %v6693_v54, %v6738_v41 }
0x1b20   :  { %v6616_v16 = vrot.slane %v6470_v43, %v10303_v1  ;;  %v6710_v56 = vrot.slane %v6533_v32, %v10306_v3  ;;  %v6629_v43 = vrot.slane %v12331_v28, %v10306_v3  ;;  %v6740_v12 = vsel %vm996_vm10, %v6702_v9, %v6739_v57 }
0x1b23   :  { %v6539_v22 = vpop.xlane.xlu0 %6538  ;;  %v6482_v45 = vpop.xlane.xlu1 %6481 }
0x1b24   :  { %v6634_v23 = vrot.slane %v6482_v45, %v10303_v1  ;;  %v6630_v45 = vsel %vm853_vm6, %v6629_v43, %v6625_v62 }
0x1b27   :  { %v6473_v31 = vpop.xlane.xlu0 %6472  ;;  %v6488_v11 = vpop.xlane.xlu1 %6487 }
0x1b28   :  { %v6620_v60 = vrot.slane %v6473_v31, %v10306_v3  ;;  %v6719_v31 = vrot.slane %v6539_v22, %v10306_v3  ;;  %v6643_v4 = vrot.slane %v6488_v11, %v10303_v1 }
0x1b2a   :  { %v6621_v47 = vsel %vm853_vm6, %v6620_v60, %v6616_v16  ;;  %v6720_v35 = vsel %vm853_vm6, %v6719_v31, %v6715_v50 }
0x1b2b   :  { %v6485_v51 = vpop.xlane.xlu0 %6484  ;;  %v6494_v55 = vpop.xlane.xlu1 %6493  ;;  %v6732_v28 = vsel %vm994_vm9, %v6621_v47, %v6731_v44  ;;  %v12406_v47 = vld [vmem:[%s12881_s27] sm:$0xff]  ;;  %s12995_s27 = smov 48  }
0x1b2c   :  { %v6638_v14 = vrot.slane %v6485_v51, %v10306_v3  ;;  %v6711_v51 = vsel %vm853_vm6, %v6710_v56, %v6706_v46  ;;  %v6733_v37 = vsel %vm996_vm10, %v6630_v45, %v6732_v28 }
0x1b2d   :  { %v6741_v21 = vsel %vm998_vm11, %v6711_v51, %v6740_v12 }
0x1b2e   :  { %v6639_v27 = vsel %vm853_vm6, %v6638_v14, %v6634_v23 }
0x1b2f   :  { %v6491_v13 = vpop.xlane.xlu0 %6490  ;;  %v6542_v22 = vpop.xlane.xlu1 %6541  ;;  %v6734_v41 = vsel %vm998_vm11, %v6639_v27, %v6733_v37 }
0x1b30   :  { %v6647_v32 = vrot.slane %v6491_v13, %v10306_v3  ;;  %v6652_v13 = vrot.slane %v6494_v55, %v10303_v1  ;;  %v6724_v29 = vrot.slane %v6542_v22, %v10303_v1  ;;  %v6742_v55 = vsel %vm1000_vm13, %v6720_v35, %v6741_v21 }
0x1b32   :  { %v6648_v5 = vsel %vm853_vm6, %v6647_v32, %v6643_v4  ;;  %v8457_v4 = vld [vmem:[%s12748_s8 + $0x30] sm:$0xff] }
0x1b33   :  { %v6497_v25 = vpop.xlane.xlu0 %6496  ;;  %v6735_v54 = vsel %vm1000_vm13, %v6648_v5, %v6734_v41  ;;  %9026 = vmatprep.subr.mxu0 %v8457_v4 }
0x1b34   :  { %v6656_v40 = vrot.slane %v6497_v25, %v10306_v3  ;;  %9027 = vmatpush3.msra.mxu0 %v8457_v4 }
0x1b36   :  { %v6657_v11 = vsel %vm853_vm6, %v6656_v40, %v6652_v13 }
0x1b37   :  { %v6545_v39 = vpop.xlane.xlu0 %6544  ;;  %v6736_v9 = vsel %vm1002_vm12, %v6657_v11, %v6735_v54 }
0x1b38   :  { %v6728_v60 = vrot.slane %v6545_v39, %v10306_v3 }
0x1b3a   :  { %v6729_v6 = vsel %vm853_vm6, %v6728_v60, %v6724_v29 }
0x1b3b   :  { %v6743_v16 = vsel %vm1002_vm12, %v6729_v6, %v6742_v55 }
0x1b3e   :  { %v9018_v33 = vpop.f32.mrb[22].mxu0 }
0x1b3f   :  { %v6826_v56 = vadd.f32 %v9018_v33, %v6743_v16  ;;  %v6820_v31 = vpop.f32.mrb[23].mxu0 }
0x1b40   :  { %v6821_v25 = vadd.f32 %v6820_v31, %v6736_v9 }
0x1b41   :  { %v6830_v62 = vadd.f32 %v12400_v63, %v6826_v56 }
0x1b42   :  { %v6829_v14 = vadd.f32 %v12406_v47, %v6821_v25 }
0x1b43   :  { %v6834_v43 = vsel %vm709_vm5, %v6830_v62, -inf }
0x1b44   :  { %6835 = vmax.xlane.f32.xlu0 %v6834_v43  ;;  %v6831_v46 = vsel %vm709_vm5, %v6829_v14, -inf }
0x1b45   :  { %6832 = vmax.xlane.f32.xlu1 %v6831_v46 }
0x1bd1   :  { %v6836_v50 = vpop.xlane.xlu0 %6835 }
0x1bd2   :  { %v6838_v32 = vsub.f32 %v6830_v62, %v6836_v50  ;;  %v6833_v22 = vpop.xlane.xlu1 %6832 }
0x1bd3   :  { %v6837_v44 = vsub.f32 %v6829_v14, %v6833_v22 }
0x1bd4   :  { %v6841_v57 = vmul.f32 1.442695, %v6838_v32 }
0x1bd5   :  { %v6839_v23 = vmul.f32 1.442695, %v6837_v44 }
0x1bd6   :  { %9555 = vpow2.f32 %v6841_v57 }
0x1bd7   :  { %9557 = vpow2.f32 %v6839_v23 }
0x1be0   :  { %v9556_v40 = vpop.eup %9555 }
0x1be1   :  { %v9558_v51 = vpop.eup %9557  ;;  %v6846_v35 = vsel %vm709_vm5, %v9556_v40, 0.0 }
0x1be2   :  { %6847 = vadd.xlane.f32.xlu0 %v6846_v35  ;;  %v6843_v28 = vsel %vm709_vm5, %v9558_v51, 0.0 }
0x1be3   :  { %6844 = vadd.xlane.f32.xlu1 %v6843_v28 }
0x1bf4   :  { %9476 = vrot.lane.b32.xlu1 %v11362_v18, %s12995_s27 }
0x1bf8   :  { %9481 = vrot.lane.b32.xlu0 %v12976_v38, %s12996_s4  ;;  %7023 = vrot.lane.b32.xlu1 %v11366_v7, %s12996_s4 }
0x1bfc   :  { %9486 = vrot.lane.b32.xlu0 %v11362_v18, %s12997_s10  ;;  %7025 = vrot.lane.b32.xlu1 %v11380_v30, %s12996_s4 }
0x1c00   :  { %7424 = vrot.lane.b32.xlu0 %v11388_v24, %s12996_s4  ;;  %7422 = vrot.lane.b32.xlu1 %v11368_v0, %s12996_s4  ;;  %s13018_s4 = sld [smem:[#allocation30_spill]] }
0x1c6f   :  { %v6848_v38 = vpop.xlane.xlu0 %6847 }
0x1c70   :  { %9559 = vrcp.f32 %v6848_v38  ;;  %v6845_v7 = vpop.xlane.xlu1 %6844 }
0x1c71   :  { %9561 = vrcp.f32 %v6845_v7 }
0x1c73   :  { %v9482_v39 = vpop.permute.xlu0 %9481 }
0x1c74   :  { %v9477_v27 = vpop.permute.xlu1 %9476  ;;  %v9484_v13 = vunpack.i.h.bf16 %v9482_v39  ;;  %v9483_v29 = vunpack.i.l.bf16 %v9482_v39 }
0x1c75   :  { %v9479_v60 = vunpack.i.h.bf16 %v9477_v27  ;;  %v9478_v45 = vunpack.i.l.bf16 %v9477_v27 }
0x1c76   :  { %v9305_v21 = vpack.c.bf16 %v9484_v13, %v9483_v29 }
0x1c77   :  { %v9301_v5 = vpack.c.bf16 %v9479_v60, %v9478_v45  ;;  %v9487_v30 = vpop.permute.xlu0 %9486 }
0x1c78   :  { %v9489_v12 = vunpack.i.h.bf16 %v9487_v30  ;;  %v9488_v6 = vunpack.i.l.bf16 %v9487_v30  ;;  %v7024_v41 = vpop.permute.xlu1 %7023 }
0x1c79   :  { %9302 = vmatprep.subr.bf16.mxu1 %v9301_v5 }
0x1c7a   :  { %v9560_v24 = vpop.eup %9559  ;;  %v9311_v11 = vpack.c.bf16 %v9489_v12, %v9488_v6  ;;  %9304 = vmatpush3.bf16.msra.mxu1 %v9301_v5 }
0x1c7b   :  { %v9562_v0 = vpop.eup %9561  ;;  %9307 = vmatprep.subr.msk.bf16.mxu1 %vm9954_vm4, %v9305_v21  ;;  %v6852_v55 = vmul.f32 %v9560_v24, %v9556_v40  ;;  %v7425_v9 = vpop.permute.xlu0 %7424 }
0x1c7c   :  { %9313 = vmatprep.subr.msk.bf16.mxu0 %vm9954_vm4, %v9311_v11  ;;  %v6851_v37 = vmul.f32 %v9562_v0, %v9558_v51  ;;  %v7026_v16 = vpop.permute.xlu1 %7025 }
0x1c7e   :  { %9023 = vmatprep.mubr.msk.f32.mxu1 %vm709_vm5, %v6851_v37 }
0x1c7f   :  { %9024 = vmatmul.mubr.msk.f32.vlgmr.msra.gmra.mrb[34].mxu1 %vm709_vm5, %v6852_v55 }
0x1c80   :  { %9035 = vmatprep.mubr.msk.f32.mxu1 %vm409_vm3, %v7024_v41  ;;  %v7423_v56 = vpop.permute.xlu1 %7422 }
0x1c83   :  { %9310 = vmatpush3.bf16.xpose.msk.msra.mxu1 %vm9954_vm4, %v9305_v21 }
0x1c8a   :  { %9036 = vmatmul.mubr.msk.f32.vlgmr.msra.gmra.mrb[36].mxu1 %vm409_vm3, %v7026_v16 }
0x1d52   :  { %v9025_v33 = vpop.f32.mrb[34].mxu1 }
0x1d53   :  { %v6931_v54 = vpop.f32.mrb[35].mxu1 }
0x1d54   :  { %9028 = vmatprep.mubr.msk.f32.mxu0 %vm409_vm3, %v6931_v54 }
0x1d55   :  { %9029 = vmatmul.mubr.msk.f32.vlgmr.msra.gmra.mrb[20].mxu0 %vm409_vm3, %v9025_v33 }
0x1d56   :  { %9316 = vmatpush3.bf16.xpose.msk.msra.mxu0 %vm9954_vm4, %v9311_v11  ;;  %9042 = vmatprep.mubr.msk.f32.mxu0 %vm409_vm3, %v7423_v56 }
0x1d5d   :  { %9043 = vmatmul.mubr.msk.f32.vlgmr.msra.gmra.mrb[24].mxu0 %vm409_vm3, %v7425_v9  ;;  %v9037_v31 = vpop.f32.mrb[36].mxu1 }
0x1d5e   :  { %v7172_v25 = vrot.slane %v9037_v31, %v9984_v10  ;;  %v7105_v62 = vpop.f32.mrb[37].mxu1  ;;  %v7165_v32 = vcombine.high %v9037_v31, %v9037_v31 }
0x1d5f   :  { %v7123_v14 = vrot.slane %v7105_v62, %v9984_v10 }
0x1d60   :  { %v7180_v43 = vcombine.high %v7172_v25, %v7172_v25  ;;  %v7188_v46 = vrot.slane %v7172_v25, %v9984_v10  ;;  %v7179_v40 = vrot.slane %v7165_v32, %v9984_v10 }
0x1d61   :  { %v7139_v50 = vrot.slane %v7123_v14, %v9984_v10  ;;  %v7131_v39 = vcombine.high %v7123_v14, %v7123_v14 }
0x1d62   :  { %v12451_v58 = vrot.slane %v7180_v43, %v9984_v10  ;;  %v7249_v22 = vrot.slane %v7188_v46, %v9989_v15  ;;  %v7210_v51 = vcombine.high %v7188_v46, %v7188_v46  ;;  %v7181_v54 = vcombine.high %v7179_v40, %v7179_v40 }
0x1d63   :  { %v7217_v44 = vrot.slane %v7139_v50, %v9989_v15 }
0x1d64   :  { %v7311_v57 = vmul.f32 %v12053_v17, %v7249_v22  ;;  %v7310_v23 = vmul.f32 %v12059_v19, %v7249_v22  ;;  %v7253_v35 = vrot.slane %v12451_v58, %v9989_v15  ;;  %v7195_v17 = vrot.slane %v7179_v40, %v9984_v10 }
0x1d65   :  { %v7295_v38 = vmul.f32 %v12073_v36, %v7217_v44  ;;  %v7294_v7 = vmul.f32 %v12079_v61, %v7217_v44  ;;  %v7257_v19 = vrot.slane %v7210_v51, %v9989_v15  ;;  %v7116_v36 = vcombine.high %v7105_v62, %v7105_v62 }
0x1d66   :  { %v7377_v28 = vsel %vm709_vm5, %v7311_v57, 0.0  ;;  %v7374_v4 = vsel %vm709_vm5, %v7310_v23, 0.0  ;;  %v7312_v29 = vmul.f32 %v12092_v42, %v7253_v35  ;;  %v7313_v60 = vmul.f32 %v12098_v59, %v7253_v35 }
0x1d67   :  { %7378 = vadd.xlane.f32.xlu1 %v7377_v28  ;;  %7375 = vadd.xlane.f32.xlu0 %v7374_v4  ;;  %v7329_v27 = vsel %vm709_vm5, %v7295_v38, 0.0  ;;  %v7326_v13 = vsel %vm709_vm5, %v7294_v7, 0.0  ;;  %v7153_v61 = vrot.slane %v7131_v39, %v9984_v10  ;;  %v7265_v45 = vrot.slane %v7195_v17, %v9989_v15  ;;  %v13001_v4 = vld [vmem:[#allocation8_spill] sm:$0xff] }
0x1d68   :  { %v7380_v5 = vsel %vm709_vm5, %v7312_v29, 0.0  ;;  %v7383_v30 = vsel %vm709_vm5, %v7313_v60, 0.0  ;;  %v7314_v12 = vmul.f32 %v12114_v52, %v7257_v19  ;;  %v7315_v6 = vmul.f32 %v12120_v2, %v7257_v19  ;;  %v13002_v7 = vld [vmem:[#allocation12_spill] sm:$0xff]  ;;  %v13003_v29 = vld [vmem:[#allocation19_spill] sm:$0xff] }
0x1d69   :  { %v7130_v42 = vrot.slane %v7116_v36, %v9984_v10  ;;  %v7161_v59 = vcombine.high %v7139_v50, %v7139_v50  ;;  %v7221_v21 = vrot.slane %v7153_v61, %v9989_v15  ;;  %v7318_v0 = vmul.f32 %v12135_v53, %v7265_v45  ;;  %v13004_v36 = vld [vmem:[#allocation20_spill] sm:$0xff] }
0x1d6a   :  { %v7386_v24 = vsel %vm709_vm5, %v7314_v12, 0.0  ;;  %v7389_v11 = vsel %vm709_vm5, %v7315_v6, 0.0  ;;  %v7319_v37 = vmul.f32 %v12141_v26, %v7265_v45  ;;  %v7212_v25 = vcombine.high %v12451_v58, %v12451_v58  ;;  %v12999_v58 = vld [vmem:[#allocation11_spill] sm:$0xff]  ;;  %v13005_v6 = vld [vmem:[#allocation17_spill] sm:$0xff] }
0x1d6b   :  { %7330 = vadd.xlane.f32.xlu0 %v7329_v27  ;;  %7327 = vadd.xlane.f32.xlu1 %v7326_v13  ;;  %v7146_v52 = vrot.slane %v7130_v42, %v9984_v10  ;;  %v7225_v2 = vrot.slane %v7161_v59, %v9989_v15  ;;  %v7398_v55 = vsel %vm709_vm5, %v7318_v0, 0.0  ;;  %v7297_v16 = vmul.f32 %v12167_v8, %v7221_v21  ;;  %v12998_v8 = vld [vmem:[#allocation18_spill] sm:$0xff] }
0x1d6c   :  { %v7401_v41 = vsel %vm709_vm5, %v7319_v37, 0.0  ;;  %v7296_v33 = vmul.f32 %v12159_v20, %v7221_v21  ;;  %v7261_v43 = vrot.slane %v7212_v25, %v9989_v15  ;;  %v7209_v46 = vrot.slane %v7181_v54, %v9984_v10  ;;  %v13007_v37 = vld [vmem:[#allocation13_spill] sm:$0xff] }
0x1d6d   :  { %v7299_v53 = vmul.f32 %v12186_v34, %v7225_v2  ;;  %v7233_v26 = vrot.slane %v7146_v52, %v9989_v15  ;;  %v7335_v56 = vsel %vm709_vm5, %v7297_v16, 0.0  ;;  %v7298_v31 = vmul.f32 %v12149_v48, %v7225_v2 }
0x1d6e   :  { %v7332_v9 = vsel %vm709_vm5, %v7296_v33, 0.0  ;;  %v7211_v50 = vcombine.high %v7195_v17, %v7195_v17  ;;  %v7317_v22 = vmul.f32 %v12999_v58, %v7261_v43  ;;  %v7269_v57 = vrot.slane %v7209_v46, %v9989_v15  ;;  %v13010_v33 = vld [vmem:[#allocation22_spill] sm:$0xff] }
0x1d6f   :  { %7381 = vadd.xlane.f32.xlu0 %v7380_v5  ;;  %7384 = vadd.xlane.f32.xlu1 %v7383_v30  ;;  %v7303_v20 = vmul.f32 %v12206_v49, %v7233_v26  ;;  %v7302_v62 = vmul.f32 %v12998_v8, %v7233_v26  ;;  %v7341_v14 = vsel %vm709_vm5, %v7299_v53, 0.0  ;;  %v7338_v34 = vsel %vm709_vm5, %v7298_v31, 0.0  ;;  %v13000_v49 = vld [vmem:[#allocation16_spill] sm:$0xff] }
0x1d70   :  { %v7316_v44 = vmul.f32 %v13000_v49, %v7261_v43  ;;  %v7132_v23 = vcombine.high %v7130_v42, %v7130_v42  ;;  %v7273_v40 = vrot.slane %v7211_v50, %v9989_v15  ;;  %v7163_v51 = vcombine.high %v7153_v61, %v7153_v61  ;;  %v13013_v50 = vld [vmem:[#allocation6_spill] sm:$0xff] }
0x1d71   :  { %v7353_v48 = vsel %vm709_vm5, %v7303_v20, 0.0  ;;  %v7350_v32 = vsel %vm709_vm5, %v7302_v62, 0.0  ;;  %v7395_v35 = vsel %vm709_vm5, %v7317_v22, 0.0  ;;  %v7321_v38 = vmul.f32 %v13001_v4, %v7269_v57  ;;  %v13011_v20 = vld [vmem:[#allocation21_spill] sm:$0xff] }
0x1d72   :  { %v7392_v28 = vsel %vm709_vm5, %v7316_v44, 0.0  ;;  %v7320_v17 = vmul.f32 %v13002_v7, %v7269_v57  ;;  %v7229_v39 = vrot.slane %v7163_v51, %v9989_v15  ;;  %v7160_v19 = vrot.slane %v7132_v23, %v9984_v10  ;;  %v13006_v10 = vld [vmem:[#allocation7_spill] sm:$0xff]  ;;  %v13012_v62 = vld [vmem:[#allocation5_spill] sm:$0xff] }
0x1d73   :  { %7387 = vadd.xlane.f32.xlu0 %v7386_v24  ;;  %7390 = vadd.xlane.f32.xlu1 %v7389_v11  ;;  %v7407_v27 = vsel %vm709_vm5, %v7321_v38, 0.0  ;;  %v7323_v60 = vmul.f32 %v13003_v29, %v7273_v40  ;;  %v7322_v61 = vmul.f32 %v13004_v36, %v7273_v40  ;;  %v7162_v5 = vcombine.high %v7146_v52, %v7146_v52  ;;  %v13008_v52 = vld [vmem:[#allocation23_spill] sm:$0xff] }
0x1d74   :  { %v7404_v13 = vsel %vm709_vm5, %v7320_v17, 0.0  ;;  %v7237_v45 = vrot.slane %v7160_v19, %v9989_v15  ;;  %v7301_v42 = vmul.f32 %v13005_v6, %v7229_v39  ;;  %v7300_v59 = vmul.f32 %v13006_v10, %v7229_v39 }
0x1d75   :  { %v7413_v30 = vsel %vm709_vm5, %v7323_v60, 0.0  ;;  %v7410_v12 = vsel %vm709_vm5, %v7322_v61, 0.0  ;;  %v7241_v21 = vrot.slane %v7162_v5, %v9989_v15  ;;  %v7164_v24 = vcombine.high %v7160_v19, %v7160_v19 }
0x1d76   :  { %v7347_v11 = vsel %vm709_vm5, %v7301_v42, 0.0  ;;  %v7344_v0 = vsel %vm709_vm5, %v7300_v59, 0.0  ;;  %v7305_v2 = vmul.f32 %v13007_v37, %v7237_v45 }
0x1d77   :  { %7399 = vadd.xlane.f32.xlu0 %v7398_v55  ;;  %7402 = vadd.xlane.f32.xlu1 %v7401_v41  ;;  %v7304_v55 = vmul.f32 %v13008_v52, %v7237_v45  ;;  %v13009_v41 = vld [vmem:[#allocation10_spill] sm:$0xff]  ;;  %v7306_v54 = vmul.f32 %v13010_v33, %v7241_v21 }
0x1d78   :  { %v7307_v16 = vmul.f32 %v13009_v41, %v7241_v21  ;;  %v7359_v53 = vsel %vm709_vm5, %v7305_v2, 0.0 }
0x1d79   :  { %v7356_v26 = vsel %vm709_vm5, %v7304_v55, 0.0  ;;  %v7362_v25 = vsel %vm709_vm5, %v7306_v54, 0.0 }
0x1d7a   :  { %v7365_v31 = vsel %vm709_vm5, %v7307_v16, 0.0 }
0x1d7b   :  { %7336 = vadd.xlane.f32.xlu1 %v7335_v56  ;;  %7333 = vadd.xlane.f32.xlu0 %v7332_v9  ;;  %v7245_v56 = vrot.slane %v7164_v24, %v9989_v15  ;;  %v7213_v9 = vcombine.high %v7209_v46, %v7209_v46 }
0x1d7d   :  { %v7309_v8 = vmul.f32 %v13011_v20, %v7245_v56 }
0x1d7f   :  { %7342 = vadd.xlane.f32.xlu1 %v7341_v14  ;;  %7339 = vadd.xlane.f32.xlu0 %v7338_v34  ;;  %v7308_v14 = vmul.f32 %v13012_v62, %v7245_v56  ;;  %v7277_v34 = vrot.slane %v7213_v9, %v9989_v15  ;;  %v7371_v43 = vsel %vm709_vm5, %v7309_v8, 0.0 }
0x1d81   :  { %v7325_v46 = vmul.f32 %v13013_v50, %v7277_v34 }
0x1d83   :  { %7354 = vadd.xlane.f32.xlu1 %v7353_v48  ;;  %7351 = vadd.xlane.f32.xlu0 %v7350_v32  ;;  %v7368_v48 = vsel %vm709_vm5, %v7308_v14, 0.0  ;;  %v13014_v32 = vld [vmem:[#allocation24_spill] sm:$0xff]  ;;  %v7419_v22 = vsel %vm709_vm5, %v7325_v46, 0.0 }
0x1d84   :  { %v7324_v58 = vmul.f32 %v13014_v32, %v7277_v34 }
0x1d86   :  { %v7416_v49 = vsel %vm709_vm5, %v7324_v58, 0.0 }
0x1d87   :  { %7396 = vadd.xlane.f32.xlu1 %v7395_v35  ;;  %7393 = vadd.xlane.f32.xlu0 %v7392_v28 }
0x1d8b   :  { %7408 = vadd.xlane.f32.xlu1 %v7407_v27  ;;  %7405 = vadd.xlane.f32.xlu0 %v7404_v13 }
0x1d8f   :  { %7414 = vadd.xlane.f32.xlu1 %v7413_v30  ;;  %7411 = vadd.xlane.f32.xlu0 %v7410_v12 }
0x1d93   :  { %7348 = vadd.xlane.f32.xlu1 %v7347_v11  ;;  %7345 = vadd.xlane.f32.xlu0 %v7344_v0 }
0x1d97   :  { %7360 = vadd.xlane.f32.xlu1 %v7359_v53  ;;  %7357 = vadd.xlane.f32.xlu0 %v7356_v26 }
0x1d9b   :  { %7366 = vadd.xlane.f32.xlu1 %v7365_v31  ;;  %7363 = vadd.xlane.f32.xlu0 %v7362_v25 }
0x1d9f   :  { %7372 = vadd.xlane.f32.xlu1 %v7371_v43  ;;  %7369 = vadd.xlane.f32.xlu0 %v7368_v48 }
0x1da3   :  { %7420 = vadd.xlane.f32.xlu1 %v7419_v22  ;;  %7417 = vadd.xlane.f32.xlu0 %v7416_v49 }
0x1df4   :  { %v7379_v44 = vpop.xlane.xlu1 %7378  ;;  %v7376_v15 = vpop.xlane.xlu0 %7375 }
0x1df5   :  { %v7541_v52 = vrot.slane %v7379_v44, %v10306_v3  ;;  %v7537_v55 = vrot.slane %v7376_v15, %v10303_v1 }
0x1df7   :  { %v7542_v14 = vsel %vm853_vm6, %v7541_v52, %v7537_v55 }
0x1df8   :  { %v7331_v57 = vpop.xlane.xlu0 %7330  ;;  %v7328_v23 = vpop.xlane.xlu1 %7327 }
0x1df9   :  { %v7469_v30 = vrot.slane %v7331_v57, %v10306_v3  ;;  %v7465_v12 = vrot.slane %v7328_v23, %v10303_v1 }
0x1dfb   :  { %v7470_v33 = vsel %vm853_vm6, %v7469_v30, %v7465_v12 }
0x1dfc   :  { %v7382_v40 = vpop.xlane.xlu0 %7381  ;;  %v7385_v51 = vpop.xlane.xlu1 %7384 }
0x1dfd   :  { %v7546_v10 = vrot.slane %v7382_v40, %v10303_v1  ;;  %v7550_v59 = vrot.slane %v7385_v51, %v10306_v3 }
0x1dff   :  { %v7551_v54 = vsel %vm853_vm6, %v7550_v59, %v7546_v10 }
0x1e00   :  { %v7388_v35 = vpop.xlane.xlu0 %7387  ;;  %v7391_v28 = vpop.xlane.xlu1 %7390  ;;  %v7613_v32 = vsel %vm990_vm7, %v7551_v54, %v7542_v14 }
0x1e01   :  { %v7555_v26 = vrot.slane %v7388_v35, %v10303_v1  ;;  %v7559_v56 = vrot.slane %v7391_v28, %v10306_v3 }
0x1e03   :  { %v7560_v44 = vsel %vm853_vm6, %v7559_v56, %v7555_v26 }
0x1e04   :  { %v12543_v4 = vpop.xlane.xlu0 %7399  ;;  %v12545_v38 = vpop.xlane.xlu1 %7402 }
0x1e05   :  { %v7573_v15 = vrot.slane %v12543_v4, %v10303_v1  ;;  %v7577_v57 = vrot.slane %v12545_v38, %v10306_v3 }
0x1e08   :  { %v7337_v7 = vpop.xlane.xlu1 %7336  ;;  %v7334_v17 = vpop.xlane.xlu0 %7333 }
0x1e09   :  { %v7478_v21 = vrot.slane %v7337_v7, %v10306_v3  ;;  %v7474_v24 = vrot.slane %v7334_v17, %v10303_v1 }
0x1e0b   :  { %v7479_v53 = vsel %vm853_vm6, %v7478_v21, %v7474_v24 }
0x1e0c   :  { %v7343_v39 = vpop.xlane.xlu1 %7342  ;;  %v7340_v19 = vpop.xlane.xlu0 %7339  ;;  %v7606_v34 = vsel %vm990_vm7, %v7479_v53, %v7470_v33 }
0x1e0d   :  { %v7487_v11 = vrot.slane %v7343_v39, %v10306_v3  ;;  %v7483_v0 = vrot.slane %v7340_v19, %v10303_v1 }
0x1e0f   :  { %v7488_v9 = vsel %vm853_vm6, %v7487_v11, %v7483_v0 }
0x1e10   :  { %v7355_v27 = vpop.xlane.xlu1 %7354  ;;  %v7352_v13 = vpop.xlane.xlu0 %7351  ;;  %v7607_v58 = vsel %vm992_vm8, %v7488_v9, %v7606_v34 }
0x1e11   :  { %v7505_v43 = vrot.slane %v7355_v27, %v10306_v3  ;;  %v7501_v48 = vrot.slane %v7352_v13, %v10303_v1  ;;  %v7614_v27 = vsel %vm992_vm8, %v7560_v44, %v7613_v32 }
0x1e13   :  { %v7506_v7 = vsel %vm853_vm6, %v7505_v43, %v7501_v48 }
0x1e14   :  { %v7397_v29 = vpop.xlane.xlu1 %7396  ;;  %v7394_v60 = vpop.xlane.xlu0 %7393 }
0x1e15   :  { %v7568_v31 = vrot.slane %v7397_v29, %v10306_v3  ;;  %v7564_v25 = vrot.slane %v7394_v60, %v10303_v1 }
0x1e17   :  { %v7569_v40 = vsel %vm853_vm6, %v7568_v31, %v7564_v25 }
0x1e18   :  { %v12547_v36 = vpop.xlane.xlu1 %7408  ;;  %v12549_v61 = vpop.xlane.xlu0 %7405 }
0x1e19   :  { %v7586_v51 = vrot.slane %v12547_v36, %v10306_v3  ;;  %v7582_v35 = vrot.slane %v12549_v61, %v10303_v1  ;;  %v7615_v36 = vsel %vm994_vm9, %v7569_v40, %v7614_v27  ;;  %v13016_v40 = vld [vmem:[#allocation15_spill] sm:$0xff] }
0x1e1b   :  { %v7587_v30 = vsel %vm853_vm6, %v7586_v51, %v7582_v35  ;;  %v13017_v35 = vld [vmem:[#allocation14_spill] sm:$0xff] }
0x1e1c   :  { %v12551_v45 = vpop.xlane.xlu1 %7414  ;;  %v12553_v5 = vpop.xlane.xlu0 %7411 }
0x1e1d   :  { %v7595_v4 = vrot.slane %v12551_v45, %v10306_v3  ;;  %v7591_v38 = vrot.slane %v12553_v5, %v10303_v1 }
0x1e1f   :  { %v7596_v10 = vsel %vm853_vm6, %v7595_v4, %v7591_v38 }
0x1e20   :  { %v7349_v6 = vpop.xlane.xlu1 %7348  ;;  %v7346_v42 = vpop.xlane.xlu0 %7345 }
0x1e21   :  { %v7496_v37 = vrot.slane %v7349_v6, %v10306_v3  ;;  %v7492_v2 = vrot.slane %v7346_v42, %v10303_v1  ;;  %v7578_v42 = vsel %vm853_vm6, %v7577_v57, %v7573_v15 }
0x1e22   :  { %v7616_v11 = vsel %vm996_vm10, %v7578_v42, %v7615_v36 }
0x1e23   :  { %v7497_v20 = vsel %vm853_vm6, %v7496_v37, %v7492_v2  ;;  %v7617_v52 = vsel %vm998_vm11, %v7587_v30, %v7616_v11  ;;  %v8512_v30 = vld [vmem:[%s12753_s13 + $0x28] sm:$0xff] }
0x1e24   :  { %v7361_v41 = vpop.xlane.xlu1 %7360  ;;  %v7358_v16 = vpop.xlane.xlu0 %7357  ;;  %v7608_v23 = vsel %vm994_vm9, %v7497_v20, %v7607_v58  ;;  %v7618_v55 = vsel %vm1000_vm13, %v7596_v10, %v7617_v52 }
0x1e25   :  { %v7514_v8 = vrot.slane %v7361_v41, %v10306_v3  ;;  %v7510_v62 = vrot.slane %v7358_v16, %v10303_v1  ;;  %v7609_v60 = vsel %vm996_vm10, %v7506_v7, %v7608_v23 }
0x1e27   :  { %v7515_v28 = vsel %vm853_vm6, %v7514_v8, %v7510_v62 }
0x1e28   :  { %v7367_v50 = vpop.xlane.xlu1 %7366  ;;  %v7364_v46 = vpop.xlane.xlu0 %7363  ;;  %v7610_v45 = vsel %vm998_vm11, %v7515_v28, %v7609_v60 }
0x1e29   :  { %v7523_v22 = vrot.slane %v7367_v50, %v10306_v3  ;;  %v7519_v49 = vrot.slane %v7364_v46, %v10303_v1 }
0x1e2b   :  { %v7524_v17 = vsel %vm853_vm6, %v7523_v22, %v7519_v49 }
0x1e2c   :  { %v7373_v39 = vpop.xlane.xlu1 %7372  ;;  %v7370_v19 = vpop.xlane.xlu0 %7369  ;;  %v7611_v12 = vsel %vm1000_vm13, %v7524_v17, %v7610_v45  ;;  %v8511_v45 = vld [vmem:[%s12753_s13 + $0x20] sm:$0xff] }
0x1e2d   :  { %v7532_v13 = vrot.slane %v7373_v39, %v10306_v3  ;;  %v7528_v29 = vrot.slane %v7370_v19, %v10303_v1 }
0x1e2f   :  { %v7533_v5 = vsel %vm853_vm6, %v7532_v13, %v7528_v29 }
0x1e30   :  { %v9044_v61 = vpop.f32.mrb[24].mxu0  ;;  %v7421_v59 = vpop.xlane.xlu1 %7420  ;;  %v7612_v24 = vsel %vm1002_vm12, %v7533_v5, %v7611_v12  ;;  %v8513_v5 = vld [vmem:[%s12753_s13 + $0x30] sm:$0xff]  ;;  %v9321_v12 = vpack.c.bf16 %v8512_v30, %v8511_v45 }
0x1e31   :  { %v7696_v6 = vpop.f32.mrb[25].mxu0  ;;  %v7418_v21 = vpop.xlane.xlu0 %7417  ;;  %v7604_v0 = vrot.slane %v7421_v59, %v10306_v3 }
0x1e32   :  { %v7600_v37 = vrot.slane %v7418_v21, %v10303_v1  ;;  %v7697_v2 = vadd.f32 %v7696_v6, %v7612_v24  ;;  %v8514_v6 = vld [vmem:[%s12753_s13 + $0x38] sm:$0xff] }
0x1e33   :  { %v9325_v42 = vpack.c.bf16 %v8514_v6, %v8513_v5  ;;  %v9725_v6 = vmov 0.0|0.0  }
0x1e34   :  { %v7605_v41 = vsel %vm853_vm6, %v7604_v0, %v7600_v37  ;;  %v7705_v16 = vadd.f32 %v12406_v47, %v7697_v2  ;;  %v8509_v2 = vld [vmem:[%s12751_s11 + $0x1] ss:$0 sm:$0xff] }
0x1e35   :  { %v7619_v33 = vsel %vm1002_vm12, %v7605_v41, %v7618_v55  ;;  %v8510_v55 = vld [vmem:[%s12752_s12 + $0x1] ss:$0 sm:$0xff] }
0x1e36   :  { %v7707_v54 = vsel %vm709_vm5, %v7705_v16, -inf  ;;  %v7702_v53 = vadd.f32 %v9044_v61, %v7619_v33 }
0x1e37   :  { %7708 = vmax.xlane.f32.xlu0 %v7707_v54 }
0x1e38   :  { %v7706_v26 = vadd.f32 %v12400_v63, %v7702_v53  ;;  %v8458_v63 = vld [vmem:[%s12748_s8 + $0x38] sm:$0xff] }
0x1e39   :  { %9052 = vmatprep.subr.mxu0 %v8458_v63 }
0x1e3a   :  { %v7710_v3 = vsel %vm709_vm5, %v7706_v26, -inf  ;;  %9053 = vmatpush3.msra.mxu0 %v8458_v63 }
0x1e3b   :  { %7711 = vmax.xlane.f32.xlu1 %v7710_v3  ;;  %v8519_v3 = vld [vmem:[%s12755_s15 + $0x40] sm:$0xff] }
0x1ec4   :  { %v7709_v1 = vpop.xlane.xlu0 %7708 }
0x1ec5   :  { %v7713_v56 = vsub.f32 %v7705_v16, %v7709_v1  ;;  %v8520_v1 = vld [vmem:[%s12755_s15 + $0x48] sm:$0xff] }
0x1ec7   :  { %v7715_v9 = vmul.f32 1.442695, %v7713_v56  ;;  %v9329_v56 = vpack.c.bf16 %v8520_v1, %v8519_v3  ;;  %v8271_v3 = vld [vmem:[%s12759_s19] sm:$0xff]  ;;  %v8272_v1 = vld [vmem:[%s12759_s19 + $0x8] sm:$0xff] }
0x1ec8   :  { %v7712_v31 = vpop.xlane.xlu1 %7711 }
0x1ec9   :  { %9563 = vpow2.f32 %v7715_v9  ;;  %v7714_v25 = vsub.f32 %v7706_v26, %v7712_v31  ;;  %v8521_v9 = vld [vmem:[%s12755_s15 + $0x50] sm:$0xff]  ;;  %v8522_v31 = vld [vmem:[%s12755_s15 + $0x58] sm:$0xff]  ;;  %9330 = vmatprep.subr.bf16.mxu0 %v9329_v56 }
0x1ecb   :  { %v7717_v20 = vmul.f32 1.442695, %v7714_v25  ;;  %v9333_v25 = vpack.c.bf16 %v8522_v31, %v8521_v9  ;;  %v8197_v9 = vld [vmem:[%s13018_s4] sm:$0x3]  ;;  %v9349_v31 = vpack.c.bf16 %v8272_v1, %v8271_v3 }
0x1ecd   :  { %9565 = vpow2.f32 %v7717_v20  ;;  %v8523_v20 = vld [vmem:[%s12755_s15 + $0x60] sm:$0xff] }
0x1ed3   :  { %v9564_v47 = vpop.eup %9563 }
0x1ed4   :  { %v7719_v8 = vsel %vm709_vm5, %v9564_v47, 0.0 }
0x1ed5   :  { %7720 = vadd.xlane.f32.xlu0 %v7719_v8 }
0x1ed7   :  { %v9566_v62 = vpop.eup %9565 }
0x1ed8   :  { %v7722_v14 = vsel %vm709_vm5, %v9566_v62, 0.0 }
0x1ed9   :  { %7723 = vadd.xlane.f32.xlu1 %v7722_v14  ;;  %v8526_v14 = vld [vmem:[%s12755_s15 + $0x78] sm:$0xff] }
0x1eeb   :  { %9491 = vrot.lane.b32.xlu0 %v11362_v18, %s13015_s30 }
0x1f62   :  { %v7721_v34 = vpop.xlane.xlu0 %7720 }
0x1f63   :  { %9567 = vrcp.f32 %v7721_v34  ;;  %v8516_v34 = vld [vmem:[%s12754_s14 + $0x1] ss:$0 sm:$0xff] }
0x1f66   :  { %v7724_v43 = vpop.xlane.xlu1 %7723  ;;  %v9492_v48 = vpop.permute.xlu0 %9491 }
0x1f67   :  { %9569 = vrcp.f32 %v7724_v43  ;;  %v9494_v50 = vunpack.i.h.bf16 %v9492_v48  ;;  %v9493_v46 = vunpack.i.l.bf16 %v9492_v48 }
0x1f69   :  { %v9317_v32 = vpack.c.bf16 %v9494_v50, %v9493_v46 }
0x1f6b   :  { %9318 = vmatprep.subr.bf16.mxu1 %v9317_v32 }
0x1f6c   :  { %9320 = vmatpush3.bf16.msra.mxu1 %v9317_v32 }
0x1f6d   :  { %v9568_v58 = vpop.eup %9567  ;;  %9322 = vmatprep.subr.bf16.mxu1 %v9321_v12 }
0x1f6e   :  { %v7727_v22 = vmul.f32 %v9568_v58, %v9564_v47  ;;  %v8524_v47 = vld [vmem:[%s12755_s15 + $0x68] sm:$0xff] }
0x1f6f   :  { %v9337_v8 = vpack.c.bf16 %v8524_v47, %v8523_v20  ;;  %v8274_v20 = vld [vmem:[%s12759_s19 + $0x18] sm:$0xff] }
0x1f70   :  { %9049 = vmatprep.mubr.msk.f32.mxu1 %vm709_vm5, %v7727_v22 }
0x1f71   :  { %v9570_v18 = vpop.eup %9569 }
0x1f72   :  { %v7728_v49 = vmul.f32 %v9570_v18, %v9566_v62  ;;  %v8525_v62 = vld [vmem:[%s12755_s15 + $0x70] sm:$0xff] }
0x1f73   :  { %v9341_v63 = vpack.c.bf16 %v8526_v14, %v8525_v62  ;;  %v8536_v14 = vld [vmem:[%s12760_s20] ss:$0 sm:$0xff] }
0x1f74   :  { %9050 = vmatmul.mubr.msk.f32.vlgmr.msra.gmra.mrb[38].mxu1 %vm709_vm5, %v7728_v49 }
0x1f75   :  { %9324 = vmatpush3.bf16.msra.mxu1 %v9321_v12 }
0x1f76   :  { %9326 = vmatprep.subr.bf16.mxu1 %v9325_v42 }
0x1f79   :  { %9328 = vmatpush3.bf16.msra.mxu1 %v9325_v42  ;;  %v9727_v42 = vmov 0.0  }
0x1f7a   :  { %9345 = vmatprep.subr.bf16.mxu1 %v9725_v6 }
0x2047   :  { %v9051_v44 = vpop.f32.mrb[38].mxu1 }
0x2048   :  { %v7807_v15 = vpop.f32.mrb[39].mxu1 }
0x2049   :  { %9054 = vmatprep.mubr.msk.f32.mxu0 %vm409_vm3, %v7807_v15 }
0x204a   :  { %9055 = vmatmul.mubr.msk.f32.vlgmr.msra.gmra.mrb[20].mxu0 %vm409_vm3, %v9051_v44 }
0x204b   :  { %9332 = vmatpush3.bf16.msra.mxu0 %v9329_v56 }
0x204c   :  { %9334 = vmatprep.subr.bf16.mxu0 %v9333_v25 }
0x204f   :  { %9336 = vmatpush3.bf16.msra.mxu0 %v9333_v25  ;;  %v8273_v25 = vld [vmem:[%s12759_s19 + $0x10] sm:$0xff]  ;;  %s9687_s19 = scalar_lea.vmem %s8364_s22, 32 }
0x2050   :  { %9338 = vmatprep.subr.bf16.mxu0 %v9337_v8  ;;  %v9352_v47 = vpack.c.bf16 %v8274_v20, %v8273_v25  ;;  %p9688_p0 = scmp.ne.s32.totalorder %s8364_s22, %s9687_s19  ;;  %p9693_p2 = scmp.lt.s32.totalorder %s9687_s19, %s9687_s19 }
0x2052   :  { %p9694_p3 = por %p9693_p2, %p9692_p1 }
0x2053   :  { %9340 = vmatpush3.bf16.msra.mxu0 %v9337_v8 }
0x2054   :  { %9342 = vmatprep.subr.bf16.mxu0 %v9341_v63  ;;  %p9695_p4 = pnand %p9694_p3, %p9688_p0 }
0x2057   :  { %9344 = vmatpush3.bf16.msra.mxu0 %v9341_v63 }
0x211d   :  { %v9056_v57 = vpop.f32.mrb[20].mxu0 }
0x211e   :  { %v7888_v23 = vpop.f32.mrb[21].mxu0  ;;  %v7900_v28 = vadd.f32 %v9056_v57, %v13017_v35 }
0x211f   :  { %v7899_v51 = vadd.f32 %v7888_v23, %v13016_v40 }
0x2120   :  { %v7908_v4 = vsel %vm216_vm2, %v7900_v28, 0.0 }
0x2121   :  { %v7905_v7 = vsel %vm216_vm2, %v7899_v51, 0.0 }
0x2122   :  { %7906 = vadd.xlane.f32.xlu1 %v7905_v7 }
0x2126   :  { %7909 = vadd.xlane.f32.xlu1 %v7908_v4 }
0x21af   :  { %v7907_v38 = vpop.xlane.xlu1 %7906 }
0x21b0   :  { %v7911_v17 = vmul.f32 0.03125, %v7907_v38 }
0x21b2   :  { %v7913_v39 = vsub.f32 %v7899_v51, %v7911_v17  ;;  %v8528_v51 = vld [vmem:[%s12935_s16 + $0x1] ss:$0 sm:$0xff] }
0x21b3   :  { %v7910_v19 = vpop.xlane.xlu1 %7909 }
0x21b4   :  { %v7912_v27 = vmul.f32 0.03125, %v7910_v19  ;;  %v7915_v13 = vmul.f32 %v7913_v39, %v7913_v39 }
0x21b6   :  { %v7914_v29 = vsub.f32 %v7900_v28, %v7912_v27  ;;  %v7917_v60 = vsel %vm216_vm2, %v7915_v13, 0.0 }
0x21b7   :  { %7918 = vadd.xlane.f32.xlu1 %v7917_v60 }
0x21b8   :  { %v7916_v36 = vmul.f32 %v7914_v29, %v7914_v29 }
0x21ba   :  { %v7920_v61 = vsel %vm216_vm2, %v7916_v36, 0.0 }
0x21bb   :  { %7921 = vadd.xlane.f32.xlu1 %v7920_v61 }
0x2244   :  { %v7919_v10 = vpop.xlane.xlu1 %7918 }
0x2245   :  { %v7923_v59 = vmul.f32 0.03125, %v7919_v10 }
0x2247   :  { %v7925_v21 = vadd.f32 1e-12, %v7923_v59 }
0x2248   :  { %v7922_v24 = vpop.xlane.xlu1 %7921 }
0x2249   :  { %9571 = vrsqrt.f32 %v7925_v21  ;;  %v7924_v11 = vmul.f32 0.03125, %v7922_v24 }
0x224b   :  { %v7926_v0 = vadd.f32 1e-12, %v7924_v11 }
0x224d   :  { %9573 = vrsqrt.f32 %v7926_v0 }
0x2253   :  { %v9572_v37 = vpop.eup %9571 }
0x2254   :  { %v7929_v52 = vmul.f32 %v9572_v37, %v7913_v39 }
0x2256   :  { %v7937_v41 = vmul.f32 %v8509_v2, %v7929_v52  ;;  %v8533_v52 = vld [vmem:[%s12757_s17 + $0x1] ss:$0 sm:$0xff] }
0x2257   :  { %v9574_v16 = vpop.eup %9573 }
0x2258   :  { %v7930_v33 = vmul.f32 %v9574_v16, %v7914_v29  ;;  %v7945_v54 = vadd.f32 %v8510_v55, %v7937_v41 }
0x225a   :  { %v7938_v53 = vmul.f32 %v8509_v2, %v7930_v33  ;;  %9065 = vmatprep.mubr.msk.f32.mxu1 %vm216_vm2, %v7945_v54  ;;  %v8534_v33 = vld [vmem:[%s12758_s18 + $0x1] ss:$0 sm:$0xff] }
0x225c   :  { %v7946_v26 = vadd.f32 %v8510_v55, %v7938_v53 }
0x225e   :  { %9066 = vmatmul.mubr.msk.f32.vlgmr.msra.gmra.mrb[40].mxu1 %vm216_vm2, %v7946_v26 }
0x225f   :  { %9091 = vmatprep.mubr.msk.f32.mxu1 %vm9726_vm15, %v9727_v42 }
0x2331   :  { %v9067_v43 = vpop.f32.mrb[40].mxu1 }
0x2332   :  { %v8038_v48 = vadd.f32 %v9067_v43, %v8516_v34  ;;  %v8032_v50 = vpop.f32.mrb[41].mxu1 }
0x2333   :  { %v8033_v46 = vadd.f32 %v8516_v34, %v8032_v50 }
0x2334   :  { %v8044_v32 = vmul.f32 0.70710677, %v8038_v48  ;;  %v8042_v57 = vmul.f32 0.5, %v8038_v48 }
0x2335   :  { %v8043_v58 = vmul.f32 0.70710677, %v8033_v46  ;;  %v8041_v44 = vmul.f32 0.5, %v8033_v46 }
0x2336   :  { %9575 = verf.f32 %v8044_v32 }
0x2337   :  { %9577 = verf.f32 %v8043_v58 }
0x2340   :  { %v9576_v22 = vpop.eup %9575 }
0x2341   :  { %v9578_v18 = vpop.eup %9577  ;;  %v8048_v49 = vadd.f32 1.0, %v9576_v22 }
0x2342   :  { %v8047_v15 = vadd.f32 1.0, %v9578_v18 }
0x2343   :  { %v8050_v40 = vmul.f32 %v8048_v49, %v8042_v57 }
0x2344   :  { %v8049_v23 = vmul.f32 %v8047_v15, %v8041_v44 }
0x2346   :  { %9084 = vmatprep.mubr.msk.f32.mxu0 %vm4080_vm14, %v8049_v23 }
0x2347   :  { %9085 = vmatmul.mubr.msk.f32.vlgmr.msra.gmra.mrb[26].mxu0 %vm4080_vm14, %v8050_v40 }
0x241a   :  { %v9086_v35 = vpop.f32.mrb[26].mxu0 }
0x241b   :  { %v8140_v28 = vpop.f32.mrb[27].mxu0  ;;  %v8146_v7 = vadd.f32 %v9086_v35, %v8528_v51 }
0x241c   :  { %v8141_v4 = vadd.f32 %v8528_v51, %v8140_v28 }
0x241d   :  { %v8150_v17 = vadd.f32 %v8146_v7, %v7946_v26 }
0x241e   :  { %v8149_v38 = vadd.f32 %v8141_v4, %v7945_v54 }
0x241f   :  { %v8158_v19 = vsel %vm216_vm2, %v8150_v17, 0.0 }
0x2420   :  { %v8155_v39 = vsel %vm216_vm2, %v8149_v38, 0.0 }
0x2421   :  { %8156 = vadd.xlane.f32.xlu1 %v8155_v39 }
0x2425   :  { %8159 = vadd.xlane.f32.xlu1 %v8158_v19 }
0x24ae   :  { %v8157_v27 = vpop.xlane.xlu1 %8156 }
0x24af   :  { %v8161_v13 = vmul.f32 0.03125, %v8157_v27 }
0x24b1   :  { %v8163_v29 = vsub.f32 %v8149_v38, %v8161_v13 }
0x24b2   :  { %v8160_v60 = vpop.xlane.xlu1 %8159 }
0x24b3   :  { %v8162_v36 = vmul.f32 0.03125, %v8160_v60  ;;  %v8165_v61 = vmul.f32 %v8163_v29, %v8163_v29 }
0x24b5   :  { %v8164_v45 = vsub.f32 %v8150_v17, %v8162_v36  ;;  %v8167_v30 = vsel %vm216_vm2, %v8165_v61, 0.0 }
0x24b6   :  { %8168 = vadd.xlane.f32.xlu0 %v8167_v30 }
0x24b7   :  { %v8166_v5 = vmul.f32 %v8164_v45, %v8164_v45 }
0x24b9   :  { %v8170_v12 = vsel %vm216_vm2, %v8166_v5, 0.0 }
0x24ba   :  { %8171 = vadd.xlane.f32.xlu1 %v8170_v12 }
0x2543   :  { %v8169_v10 = vpop.xlane.xlu0 %8168 }
0x2544   :  { %v8173_v59 = vmul.f32 0.03125, %v8169_v10 }
0x2546   :  { %v8175_v21 = vadd.f32 1e-12, %v8173_v59 }
0x2547   :  { %v8172_v24 = vpop.xlane.xlu1 %8171 }
0x2548   :  { %9579 = vrsqrt.f32 %v8175_v21  ;;  %v8174_v11 = vmul.f32 0.03125, %v8172_v24 }
0x254a   :  { %v8176_v0 = vadd.f32 1e-12, %v8174_v11 }
0x254c   :  { %9581 = vrsqrt.f32 %v8176_v0 }
0x2552   :  { %v9580_v37 = vpop.eup %9579 }
0x2553   :  { %v8179_v2 = vmul.f32 %v9580_v37, %v8163_v29 }
0x2555   :  { %v8187_v16 = vmul.f32 %v8533_v52, %v8179_v2 }
0x2556   :  { %v9582_v55 = vpop.eup %9581 }
0x2557   :  { %v8180_v41 = vmul.f32 %v9582_v55, %v8164_v45  ;;  %v8195_v53 = vadd.f32 %v8534_v33, %v8187_v16 }
0x2559   :  { %v8188_v54 = vmul.f32 %v8533_v52, %v8180_v41 }
0x255b   :  { %v8196_v26 = vadd.f32 %v8534_v33, %v8188_v54 }
0x255d   :  { %v9346_v56 = vpack.c.bf16 %v8196_v26, %v8195_v53 }
0x255f   :  { %9347 = vmatpush3.bf16.msra.mxu1 %v9346_v56 }
0x2560   :  { %9348 = vmatprep.subr.bf16.mxu1 %v9725_v6 }
0x2562   :  { %9092 = vmatmul.mubr.msk.f32.vlgmr.msra.gmra.mrb[42].mxu1 %vm709_vm5, %v8197_v9 }
0x2563   :  { %9350 = vmatpush3.bf16.msra.mxu1 %v9349_v31  ;;  %9102 = vmatprep.mubr.msk.f32.mxu1 %vm9726_vm15, %v9727_v42 }
0x2564   :  { %9351 = vmatprep.subr.bf16.mxu1 %v9725_v6 }
0x2567   :  { %9353 = vmatpush3.bf16.msra.mxu1 %v9352_v47 }
0x2635   :  { %v8267_v8 = vpop.f32.mrb[42].mxu1 }
0x2636   :  { %v9093_v62 = vpop.f32.mrb[43].mxu1  ;;  %9103 = vmatmul.mubr.msk.f32.vlgmr.msra.gmra.mrb[44].mxu1 %vm216_vm2, %v8267_v8 }
0x2709   :  { %v8351_v63 = vpop.f32.mrb[44].mxu1 }
0x270a   :  { %v8352_v34 = vadd.f32 %v8536_v14, %v8351_v63  ;;  %v9104_v43 = vpop.f32.mrb[45].mxu1 }
0x270c   :  { %8356 = vst.msk [vmem:[#allocation2] sm:$0x3] %vm8355_vm0, %v8352_v34 }
0x270d   :  { %9698 = shalt.err (!%p9695_p4)
}
0x270e   :  { %s9699_s29 = scalar_lea.hbm %s12761_s21, 32 }
0x270f   :  { %p9700_p5 = scmp.ne.s32.totalorder %s12761_s21, %s9699_s29  ;;  %p9703_p6 = scmp.lt.u32.totalorder %s9699_s29, %s12761_s21 }
0x2711   :  { %p9705_p7 = pnand %p9703_p6, %p9700_p5 }
0x2713   :  { %9708 = shalt.err (!%p9705_p7)
}
0x2714   :  { %8366 = dma.vmem_to_hbm [thread:$0]  %s8364_s22, 32, %s12761_s21, [#allocation3]  }
0x2715   :  { %9709 = dma.done.wait [#allocation3], 32  }
0x2716   :  { %9710 = vsyncadd [#allocation3], 4294967264 }
0x2717   :  { %8370 = vsyncpa [#allocation3], 1 }

</bundles_post_ra>
